<compile_context>
chip_gen: v7x
topology: tpu7x:2x2x1
jax: 0.10.0
libtpu: 0.0.40
codegen_flags: <defaults>
</compile_context>

<pallas_src>
import jax
import jax.numpy as jnp
from jax.experimental import pallas as pl
from jax.experimental.pallas import tpu as pltpu

LEAKY_SLOPE = 0.01
BN_EPS = 1e-5

# (kernel_size, padding, leaky_relu_after) for the 8 conv stages, in order:
#   stem conv1a (+BN0 folded), stem conv1b,
#   res1.conv1 (+BN1), res1.conv2 (+BN2), res1.conv3 (x2 folded),
#   res2.conv1 (+BN1), res2.conv2 (+BN2), res2.conv3 (x2 folded)
_CONV_CFG = (
    (3, 0, False),
    (3, 0, True),
    (3, 1, True),
    (3, 1, False),
    (1, 0, True),
    (3, 1, True),
    (3, 1, False),
    (1, 0, True),
)
_NUM_FC = 3
_C_RES = 64          # residual-block channel count


def _leaky(v):
    return jnp.where(v >= 0, v, v * LEAKY_SLOPE)


# ----------------------------- fused Pallas kernel --------------------------

def _fused_forward_kernel(x_ref, *refs):
    """Whole-model forward for one batch element.

    refs = 22 weight/bias refs (8 conv stages + 3 FC layers, each (w, b)),
           then o_ref, col_ref (im2col staging), flat_ref (flatten staging).
    """
    o_ref, col_ref, flat_ref = refs[-3], refs[-2], refs[-1]
    prefs = refs[:-3]

    # Halo cells of the im2col buffer must be zero for the 'same'-padded convs;
    # zero the whole staging buffer once per grid step (a handful of vector stores).
    col_ref[...] = jnp.zeros(col_ref.shape, col_ref.dtype)

    h = x_ref[0].astype(jnp.float32)            # (L0, Cin=1): length x channels
    idx = 0

    # ---------------- conv stages ----------------
    for K, pad, act in _CONV_CFG:
        w = prefs[idx][...]                     # (K*Cin, Cout), BN scale / 2x folded in
        b = prefs[idx + 1][...]                 # (1, Cout),  conv bias + BN shift folded
        idx += 2
        Lin, Cin = h.shape
        Cout = w.shape[1]
        Lout = Lin + 2 * pad - K + 1

        if K == 1:                              # 1x1 conv == plain matmul
            y = jnp.dot(h, w, preferred_element_type=jnp.float32)
        elif K * Cin < 8:                       # stem conv, Ci=1 (depth-3 contraction):
            y = jnp.zeros((Lout, Cout), jnp.float32)   # cheaper on the VPU than the MXU
            for k in range(K):
                for ci in range(Cin):
                    y = y + (h[k:k + Lout, ci:ci + 1]
                             * w[k * Cin + ci:k * Cin + ci + 1, :])
        else:
            # im2col: scatter the K taps into the staging buffer (static ref-slice
            # stores at lane offsets), then ONE MXU matmul with contraction depth
            # K*Cin (= 192 for the residual convs).
            base = 0 if pad else _C_RES         # un-padded stage keeps clear of halo cells
            for k in range(K):
                lo = max(0, pad - k)
                hi = min(Lout, Lin + pad - k)
                col_ref[lo:hi, base + k * Cin: base + (k + 1) * Cin] = (
                    h[lo + k - pad: hi + k - pad, :])
            taps = col_ref[0:Lout, base: base + K * Cin]
            y = jnp.dot(taps, w, preferred_element_type=jnp.float32)

        y = y + b
        h = _leaky(y) if act else y

    # ---------------- flatten ----------------
    # PyTorch's .view(B, -1) flattens (C, L) channel-major; the kernel holds (L, C) and
    # fc1's weight rows were pre-permuted to the matching l*C + c order, so the flatten
    # is just L lane-offset row stores into the staging buffer (no reshape needed).
    Lf, C = h.shape
    for l in range(Lf):
        flat_ref[0:1, l * C:(l + 1) * C] = h[l:l + 1, :]
    z = flat_ref[...]                           # (1, Lf*C) = (1, 1664)

    # ---------------- FC head ----------------
    # TODO(synk): Dropout(0.5) layers are identity here (inference mode).
    for j in range(_NUM_FC):
        w = prefs[idx][...]                     # (Fin, Fout)
        b = prefs[idx + 1][...]                 # (1, Fout)
        idx += 2
        z = jnp.dot(z, w, preferred_element_type=jnp.float32) + b
        if j < _NUM_FC - 1:
            z = _leaky(z)

    o_ref[0] = z.astype(o_ref.dtype)


# ----------------------------- wrappers --------------------------------------

def pack_params(p):
    """Fold BN / bias / the residual '2x' into the conv weights and pre-transpose all
    parameters into the kernel's layouts.  Runs once, outside jit."""
    packed = []

    def pack_conv(w, b, scale=None, shift=None, pre=1.0):
        co, ci, k = w.shape
        wc = jnp.transpose(w, (2, 1, 0)).reshape(k * ci, co)      # row index = k*Ci + ci
        if scale is None:
            scale = jnp.ones((co,), jnp.float32)
            shift = jnp.zeros((co,), jnp.float32)
        packed.append((wc * (scale * pre)[None, :]).astype(jnp.float32))
        packed.append(((b * scale + shift) * pre).reshape(1, co).astype(jnp.float32))

    pack_conv(p['c1a_w'], p['c1a_b'], p['bn0_scale'], p['bn0_shift'])
    pack_conv(p['c1b_w'], p['c1b_b'])
    for name in ('res1', 'res2'):
        r = p[name]
        pack_conv(r['w1'], r['b1'], r['bn1_scale'], r['bn1_shift'])
        pack_conv(r['w2'], r['b2'], r['bn2_scale'], r['bn2_shift'])
        pack_conv(r['w3'], r['b3'], pre=2.0)      # leaky_relu(x + x) == leaky_relu(2*conv3(.))

    # fc1: PyTorch flattens (C, L) channel-major (index c*L + l); the kernel flattens
    # its (L, C) activation as l*C + c -> permute fc1's input dimension once to match.
    w1 = p['fc1_w']                               # (128, C*L)
    nf = w1.shape[0]
    c = _C_RES
    l = w1.shape[1] // c
    w1p = w1.reshape(nf, c, l).transpose(2, 1, 0).reshape(l * c, nf)
    packed.append(w1p.astype(jnp.float32))
    packed.append(p['fc1_b'].reshape(1, -1).astype(jnp.float32))
    packed.append(p['fc2_w'].T.astype(jnp.float32))
    packed.append(p['fc2_b'].reshape(1, -1).astype(jnp.float32))
    packed.append(p['fc3_w'].T.astype(jnp.float32))
    packed.append(p['fc3_b'].reshape(1, -1).astype(jnp.float32))
    return packed


def _forward(x, packed):
    B, L = x.shape
    Lf = L - 4                                    # length after the two valid k=3 stem convs
    x3 = x[:, :, None].astype(jnp.float32)        # (B, L, 1): length on sublanes, Ci on lanes

    in_specs = [pl.BlockSpec((1, L, 1), lambda i: (i, 0, 0))]
    for arr in packed:                            # weights: resident, never re-fetched
        in_specs.append(pl.BlockSpec(arr.shape, lambda i, n=arr.ndim: (0,) * n))

    out = pl.pallas_call(
        _fused_forward_kernel,
        out_shape=jax.ShapeDtypeStruct((B, 1, 1), jnp.float32),
        grid=(B,),
        in_specs=in_specs,
        out_specs=pl.BlockSpec((1, 1, 1), lambda i: (i, 0, 0)),
        scratch_shapes=[
            pltpu.VMEM((Lf, 3 * _C_RES), jnp.float32),   # im2col staging (halo cells = 0)
            pltpu.VMEM((1, Lf * _C_RES), jnp.float32),   # flatten staging for fc1
        ],
        compiler_params=pltpu.CompilerParams(
            # one independent sample per grid step -> batch splits across TCs on v7x
            dimension_semantics=("parallel",),
        ),
    )(x3, *packed)
    return out[:, :, 0]


my_model_forward = jax.jit(_forward)


# ----------------------------- params ----------------------------------------

def _normal(key, shape, scale):
    return (scale * jax.random.normal(key, shape)).astype(jnp.float32)


def _bn_affine(key, c):
    k1, k2, k3, k4 = jax.random.split(key, 4)
    gamma = 1.0 + 0.1 * jax.random.normal(k1, (c,))
    beta = 0.1 * jax.random.normal(k2, (c,))
    mean = 0.1 * jax.random.normal(k3, (c,))
    var = 1.0 + 0.1 * jnp.abs(jax.random.normal(k4, (c,)))
    scale = (gamma / jnp.sqrt(var + BN_EPS)).astype(jnp.float32)
    shift = (beta - mean * scale).astype(jnp.float32)
    return scale, shift


def init_params(key):
    ks = iter(jax.random.split(key, 48))
    nxt = lambda: next(ks)

    def conv(co, ci, k):
        s = 1.0 / (ci * k) ** 0.5
        return _normal(nxt(), (co, ci, k), s), _normal(nxt(), (co,), s)

    def lin(fo, fi):
        s = 1.0 / fi ** 0.5
        return _normal(nxt(), (fo, fi), s), _normal(nxt(), (fo,), s)

    p = {}
    p['c1a_w'], p['c1a_b'] = conv(16, 1, 3)
    p['bn0_scale'], p['bn0_shift'] = _bn_affine(nxt(), 16)
    p['c1b_w'], p['c1b_b'] = conv(64, 16, 3)
    for name in ('res1', 'res2'):
        r = {}
        r['w1'], r['b1'] = conv(64, 64, 3)
        r['bn1_scale'], r['bn1_shift'] = _bn_affine(nxt(), 64)
        r['w2'], r['b2'] = conv(64, 64, 3)
        r['bn2_scale'], r['bn2_shift'] = _bn_affine(nxt(), 64)
        r['w3'], r['b3'] = conv(64, 64, 1)
        p[name] = r
    p['fc1_w'], p['fc1_b'] = lin(128, 64 * 26)
    p['fc2_w'], p['fc2_b'] = lin(32, 128)
    p['fc3_w'], p['fc3_b'] = lin(1, 32)
    return p


# ----------------------------- pure-JAX reference ----------------------------

def _ref_conv1d(x, w, b, padding=0):
    y = jax.lax.conv_general_dilated(
        x, w, window_strides=(1,), padding=[(padding, padding)],
        dimension_numbers=('NCH', 'OIH', 'NCH'))
    return y + b[None, :, None]


def _ref_residual(x, r):
    h = _ref_conv1d(x, r['w1'], r['b1'], 1)
    h = _leaky(h * r['bn1_scale'][None, :, None] + r['bn1_shift'][None, :, None])
    h = _ref_conv1d(h, r['w2'], r['b2'], 1)
    h = h * r['bn2_scale'][None, :, None] + r['bn2_shift'][None, :, None]
    h = _ref_conv1d(h, r['w3'], r['b3'], 0)
    return _leaky(h + h)


def ref_forward(x, p):
    h = x[:, None, :]
    h = _ref_conv1d(h, p['c1a_w'], p['c1a_b'])
    h = h * p['bn0_scale'][None, :, None] + p['bn0_shift'][None, :, None]
    h = _leaky(_ref_conv1d(h, p['c1b_w'], p['c1b_b']))
    h = _ref_residual(h, p['res1'])
    h = _ref_residual(h, p['res2'])
    h = h.reshape(h.shape[0], -1)
    h = _leaky(h @ p['fc1_w'].T + p['fc1_b'])
    h = _leaky(h @ p['fc2_w'].T + p['fc2_b'])
    h = h @ p['fc3_w'].T + p['fc3_b']
    return h


# ----------------------------- main -------------------------------------------

if __name__ == "__main__":
    root = jax.random.PRNGKey(0)
    pkey, xkey = jax.random.split(root)
    params = init_params(pkey)
    packed = pack_params(params)              # one-time parameter packing (outside jit)

    # L=30 -> two valid k=3 convs give length 26, matching nn.Linear(64*26, 128).
    B, L = 2, 30
    x = jax.random.normal(xkey, (B, L), jnp.float32)

    out = jax.block_until_ready(my_model_forward(x, packed))
    assert out.shape == (B, 1), out.shape

    ref = ref_forward(x, params)
    if not bool(jnp.allclose(out, ref, rtol=1e-4, atol=1e-4)):
        raise AssertionError(f"Pallas/ref mismatch:\n{out}\n{ref}")

    print("KERNEL_OK")
</pallas_src>

<mosaic_0001>
module attributes {stable_mosaic.version = 11 : i64} {
  func.func @_fused_forward_kernel(%arg0: i32, %arg1: memref<1x30x1xf32, #tpu.memory_space<vmem>>, %arg2: memref<3x16xf32, #tpu.memory_space<vmem>>, %arg3: memref<1x16xf32, #tpu.memory_space<vmem>>, %arg4: memref<48x64xf32, #tpu.memory_space<vmem>>, %arg5: memref<1x64xf32, #tpu.memory_space<vmem>>, %arg6: memref<192x64xf32, #tpu.memory_space<vmem>>, %arg7: memref<1x64xf32, #tpu.memory_space<vmem>>, %arg8: memref<192x64xf32, #tpu.memory_space<vmem>>, %arg9: memref<1x64xf32, #tpu.memory_space<vmem>>, %arg10: memref<64x64xf32, #tpu.memory_space<vmem>>, %arg11: memref<1x64xf32, #tpu.memory_space<vmem>>, %arg12: memref<192x64xf32, #tpu.memory_space<vmem>>, %arg13: memref<1x64xf32, #tpu.memory_space<vmem>>, %arg14: memref<192x64xf32, #tpu.memory_space<vmem>>, %arg15: memref<1x64xf32, #tpu.memory_space<vmem>>, %arg16: memref<64x64xf32, #tpu.memory_space<vmem>>, %arg17: memref<1x64xf32, #tpu.memory_space<vmem>>, %arg18: memref<1664x128xf32, #tpu.memory_space<vmem>>, %arg19: memref<1x128xf32, #tpu.memory_space<vmem>>, %arg20: memref<128x32xf32, #tpu.memory_space<vmem>>, %arg21: memref<1x32xf32, #tpu.memory_space<vmem>>, %arg22: memref<32x1xf32, #tpu.memory_space<vmem>>, %arg23: memref<1x1xf32, #tpu.memory_space<vmem>>, %arg24: memref<1x1x1xf32, #tpu.memory_space<vmem>>, %arg25: memref<26x192xf32, #tpu.memory_space<vmem>>, %arg26: memref<1x1664xf32, #tpu.memory_space<vmem>>) attributes {dimension_semantics = [#tpu.dimension_semantics<parallel>], iteration_bounds = array<i64: 2>, scalar_prefetch = 0 : i64, scratch_operands = 2 : i64, tpu.core_type = #tpu.core_type<tc>, window_params = [{transform_indices = @transform_0, window_bounds = array<i64: 1, 30, 1>}, {pipeline_mode = #tpu.pipeline_mode<synchronous>, transform_indices = @transform_1, window_bounds = array<i64: 3, 16>}, {pipeline_mode = #tpu.pipeline_mode<synchronous>, transform_indices = @transform_2, window_bounds = array<i64: 1, 16>}, {pipeline_mode = #tpu.pipeline_mode<synchronous>, transform_indices = @transform_3, window_bounds = array<i64: 48, 64>}, {pipeline_mode = #tpu.pipeline_mode<synchronous>, transform_indices = @transform_4, window_bounds = array<i64: 1, 64>}, {pipeline_mode = #tpu.pipeline_mode<synchronous>, transform_indices = @transform_5, window_bounds = array<i64: 192, 64>}, {pipeline_mode = #tpu.pipeline_mode<synchronous>, transform_indices = @transform_6, window_bounds = array<i64: 1, 64>}, {pipeline_mode = #tpu.pipeline_mode<synchronous>, transform_indices = @transform_7, window_bounds = array<i64: 192, 64>}, {pipeline_mode = #tpu.pipeline_mode<synchronous>, transform_indices = @transform_8, window_bounds = array<i64: 1, 64>}, {pipeline_mode = #tpu.pipeline_mode<synchronous>, transform_indices = @transform_9, window_bounds = array<i64: 64, 64>}, {pipeline_mode = #tpu.pipeline_mode<synchronous>, transform_indices = @transform_10, window_bounds = array<i64: 1, 64>}, {pipeline_mode = #tpu.pipeline_mode<synchronous>, transform_indices = @transform_11, window_bounds = array<i64: 192, 64>}, {pipeline_mode = #tpu.pipeline_mode<synchronous>, transform_indices = @transform_12, window_bounds = array<i64: 1, 64>}, {pipeline_mode = #tpu.pipeline_mode<synchronous>, transform_indices = @transform_13, window_bounds = array<i64: 192, 64>}, {pipeline_mode = #tpu.pipeline_mode<synchronous>, transform_indices = @transform_14, window_bounds = array<i64: 1, 64>}, {pipeline_mode = #tpu.pipeline_mode<synchronous>, transform_indices = @transform_15, window_bounds = array<i64: 64, 64>}, {pipeline_mode = #tpu.pipeline_mode<synchronous>, transform_indices = @transform_16, window_bounds = array<i64: 1, 64>}, {pipeline_mode = #tpu.pipeline_mode<synchronous>, transform_indices = @transform_17, window_bounds = array<i64: 1664, 128>}, {pipeline_mode = #tpu.pipeline_mode<synchronous>, transform_indices = @transform_18, window_bounds = array<i64: 1, 128>}, {pipeline_mode = #tpu.pipeline_mode<synchronous>, transform_indices = @transform_19, window_bounds = array<i64: 128, 32>}, {pipeline_mode = #tpu.pipeline_mode<synchronous>, transform_indices = @transform_20, window_bounds = array<i64: 1, 32>}, {pipeline_mode = #tpu.pipeline_mode<synchronous>, transform_indices = @transform_21, window_bounds = array<i64: 32, 1>}, {pipeline_mode = #tpu.pipeline_mode<synchronous>, transform_indices = @transform_22, window_bounds = array<i64: 1, 1>}, {transform_indices = @transform_23, window_bounds = array<i64: 1, 1, 1>}]} {
    %cst = arith.constant 0.000000e+00 : f32
    %0 = vector.broadcast %cst : f32 to vector<26x192xf32>
    %c0 = arith.constant 0 : index
    %c0_0 = arith.constant 0 : index
    %1 = vector.load %arg25[%c0, %c0_0] : memref<26x192xf32, #tpu.memory_space<vmem>>, vector<26x192xf32>
    tpu.vector_store %arg25[%c0, %c0_0], %0 {strides = array<i32>} : memref<26x192xf32, #tpu.memory_space<vmem>>, vector<26x192xf32>,
    %c0_1 = arith.constant 0 : index
    %c0_2 = arith.constant 0 : index
    %c0_3 = arith.constant 0 : index
    %2 = vector.load %arg1[%c0_1, %c0_2, %c0_3] : memref<1x30x1xf32, #tpu.memory_space<vmem>>, vector<1x30x1xf32>
    %3 = vector.shape_cast %2 : vector<1x30x1xf32> to vector<30x1xf32>
    %c0_4 = arith.constant 0 : index
    %c0_5 = arith.constant 0 : index
    %4 = vector.load %arg2[%c0_4, %c0_5] : memref<3x16xf32, #tpu.memory_space<vmem>>, vector<3x16xf32>
    %c0_6 = arith.constant 0 : index
    %c0_7 = arith.constant 0 : index
    %5 = vector.load %arg3[%c0_6, %c0_7] : memref<1x16xf32, #tpu.memory_space<vmem>>, vector<1x16xf32>
    %cst_8 = arith.constant 0.000000e+00 : f32
    %6 = vector.broadcast %cst_8 : f32 to vector<28x16xf32>
    %7 = vector.extract_strided_slice %3 {offsets = [0, 0], sizes = [28, 1], strides = [1, 1]} : vector<30x1xf32> to vector<28x1xf32>
    %8 = vector.extract_strided_slice %4 {offsets = [0, 0], sizes = [1, 16], strides = [1, 1]} : vector<3x16xf32> to vector<1x16xf32>
    %9 = vector.broadcast %7 : vector<28x1xf32> to vector<28x16xf32>
    %10 = vector.broadcast %8 : vector<1x16xf32> to vector<28x16xf32>
    %11 = arith.mulf %9, %10 : vector<28x16xf32>
    %12 = arith.addf %6, %11 : vector<28x16xf32>
    %13 = vector.extract_strided_slice %3 {offsets = [1, 0], sizes = [28, 1], strides = [1, 1]} : vector<30x1xf32> to vector<28x1xf32>
    %14 = vector.extract_strided_slice %4 {offsets = [1, 0], sizes = [1, 16], strides = [1, 1]} : vector<3x16xf32> to vector<1x16xf32>
    %15 = vector.broadcast %13 : vector<28x1xf32> to vector<28x16xf32>
    %16 = vector.broadcast %14 : vector<1x16xf32> to vector<28x16xf32>
    %17 = arith.mulf %15, %16 : vector<28x16xf32>
    %18 = arith.addf %12, %17 : vector<28x16xf32>
    %19 = vector.extract_strided_slice %3 {offsets = [2, 0], sizes = [28, 1], strides = [1, 1]} : vector<30x1xf32> to vector<28x1xf32>
    %20 = vector.extract_strided_slice %4 {offsets = [2, 0], sizes = [1, 16], strides = [1, 1]} : vector<3x16xf32> to vector<1x16xf32>
    %21 = vector.broadcast %19 : vector<28x1xf32> to vector<28x16xf32>
    %22 = vector.broadcast %20 : vector<1x16xf32> to vector<28x16xf32>
    %23 = arith.mulf %21, %22 : vector<28x16xf32>
    %24 = arith.addf %18, %23 : vector<28x16xf32>
    %25 = vector.broadcast %5 : vector<1x16xf32> to vector<28x16xf32>
    %26 = arith.addf %24, %25 : vector<28x16xf32>
    %c0_9 = arith.constant 0 : index
    %c0_10 = arith.constant 0 : index
    %27 = vector.load %arg4[%c0_9, %c0_10] : memref<48x64xf32, #tpu.memory_space<vmem>>, vector<48x64xf32>
    %c0_11 = arith.constant 0 : index
    %c0_12 = arith.constant 0 : index
    %28 = vector.load %arg5[%c0_11, %c0_12] : memref<1x64xf32, #tpu.memory_space<vmem>>, vector<1x64xf32>
    %29 = vector.extract_strided_slice %26 {offsets = [0, 0], sizes = [26, 16], strides = [1, 1]} : vector<28x16xf32> to vector<26x16xf32>
    %c0_13 = arith.constant 0 : index
    %c64 = arith.constant 64 : index
    %30 = vector.load %arg25[%c0_13, %c64] : memref<26x192xf32, #tpu.memory_space<vmem>>, vector<26x16xf32>
    tpu.vector_store %arg25[%c0_13, %c64], %29 {strides = array<i32>} : memref<26x192xf32, #tpu.memory_space<vmem>>, vector<26x16xf32>,
    %31 = vector.extract_strided_slice %26 {offsets = [1, 0], sizes = [26, 16], strides = [1, 1]} : vector<28x16xf32> to vector<26x16xf32>
    %c0_14 = arith.constant 0 : index
    %c80 = arith.constant 80 : index
    %32 = vector.load %arg25[%c0_14, %c80] : memref<26x192xf32, #tpu.memory_space<vmem>>, vector<26x16xf32>
    tpu.vector_store %arg25[%c0_14, %c80], %31 {strides = array<i32>} : memref<26x192xf32, #tpu.memory_space<vmem>>, vector<26x16xf32>,
    %33 = vector.extract_strided_slice %26 {offsets = [2, 0], sizes = [26, 16], strides = [1, 1]} : vector<28x16xf32> to vector<26x16xf32>
    %c0_15 = arith.constant 0 : index
    %c96 = arith.constant 96 : index
    %34 = vector.load %arg25[%c0_15, %c96] : memref<26x192xf32, #tpu.memory_space<vmem>>, vector<26x16xf32>
    tpu.vector_store %arg25[%c0_15, %c96], %33 {strides = array<i32>} : memref<26x192xf32, #tpu.memory_space<vmem>>, vector<26x16xf32>,
    %c0_16 = arith.constant 0 : index
    %c64_17 = arith.constant 64 : index
    %35 = vector.load %arg25[%c0_16, %c64_17] : memref<26x192xf32, #tpu.memory_space<vmem>>, vector<26x48xf32>
    %cst_18 = arith.constant dense<0.000000e+00> : vector<26x64xf32>
    %36 = tpu.matmul %35, %27, %cst_18 {dimension_numbers = #tpu.dot_dimension_numbers<[1], [0], [0], [1], [0, 0, 1, 1], [], []>} : vector<26x48xf32>, vector<48x64xf32>, vector<26x64xf32> -> vector<26x64xf32>
    %37 = vector.broadcast %28 : vector<1x64xf32> to vector<26x64xf32>
    %38 = arith.addf %36, %37 : vector<26x64xf32>
    %cst_19 = arith.constant 0.000000e+00 : f32
    %39 = vector.broadcast %cst_19 : f32 to vector<26x64xf32>
    %40 = arith.cmpf oge, %38, %39 : vector<26x64xf32>
    %cst_20 = arith.constant 0.00999999977 : f32
    %41 = vector.broadcast %cst_20 : f32 to vector<26x64xf32>
    %42 = arith.mulf %38, %41 : vector<26x64xf32>
    %43 = arith.select %40, %38, %42 : vector<26x64xi1>, vector<26x64xf32>
    %c0_21 = arith.constant 0 : index
    %c0_22 = arith.constant 0 : index
    %44 = vector.load %arg6[%c0_21, %c0_22] : memref<192x64xf32, #tpu.memory_space<vmem>>, vector<192x64xf32>
    %c0_23 = arith.constant 0 : index
    %c0_24 = arith.constant 0 : index
    %45 = vector.load %arg7[%c0_23, %c0_24] : memref<1x64xf32, #tpu.memory_space<vmem>>, vector<1x64xf32>
    %46 = vector.extract_strided_slice %43 {offsets = [0, 0], sizes = [25, 64], strides = [1, 1]} : vector<26x64xf32> to vector<25x64xf32>
    %c1 = arith.constant 1 : index
    %c0_25 = arith.constant 0 : index
    %47 = vector.load %arg25[%c1, %c0_25] : memref<26x192xf32, #tpu.memory_space<vmem>>, vector<25x64xf32>
    tpu.vector_store %arg25[%c1, %c0_25], %46 {strides = array<i32>} : memref<26x192xf32, #tpu.memory_space<vmem>>, vector<25x64xf32>,
    %c0_26 = arith.constant 0 : index
    %c64_27 = arith.constant 64 : index
    %48 = vector.load %arg25[%c0_26, %c64_27] : memref<26x192xf32, #tpu.memory_space<vmem>>, vector<26x64xf32>
    tpu.vector_store %arg25[%c0_26, %c64_27], %43 {strides = array<i32>} : memref<26x192xf32, #tpu.memory_space<vmem>>, vector<26x64xf32>,
    %49 = vector.extract_strided_slice %43 {offsets = [1, 0], sizes = [25, 64], strides = [1, 1]} : vector<26x64xf32> to vector<25x64xf32>
    %c0_28 = arith.constant 0 : index
    %c128 = arith.constant 128 : index
    %50 = vector.load %arg25[%c0_28, %c128] : memref<26x192xf32, #tpu.memory_space<vmem>>, vector<25x64xf32>
    tpu.vector_store %arg25[%c0_28, %c128], %49 {strides = array<i32>} : memref<26x192xf32, #tpu.memory_space<vmem>>, vector<25x64xf32>,
    %c0_29 = arith.constant 0 : index
    %c0_30 = arith.constant 0 : index
    %51 = vector.load %arg25[%c0_29, %c0_30] : memref<26x192xf32, #tpu.memory_space<vmem>>, vector<26x192xf32>
    %cst_31 = arith.constant dense<0.000000e+00> : vector<26x64xf32>
    %52 = tpu.matmul %51, %44, %cst_31 {dimension_numbers = #tpu.dot_dimension_numbers<[1], [0], [0], [1], [0, 0, 1, 1], [], []>} : vector<26x192xf32>, vector<192x64xf32>, vector<26x64xf32> -> vector<26x64xf32>
    %53 = vector.broadcast %45 : vector<1x64xf32> to vector<26x64xf32>
    %54 = arith.addf %52, %53 : vector<26x64xf32>
    %cst_32 = arith.constant 0.000000e+00 : f32
    %55 = vector.broadcast %cst_32 : f32 to vector<26x64xf32>
    %56 = arith.cmpf oge, %54, %55 : vector<26x64xf32>
    %cst_33 = arith.constant 0.00999999977 : f32
    %57 = vector.broadcast %cst_33 : f32 to vector<26x64xf32>
    %58 = arith.mulf %54, %57 : vector<26x64xf32>
    %59 = arith.select %56, %54, %58 : vector<26x64xi1>, vector<26x64xf32>
    %c0_34 = arith.constant 0 : index
    %c0_35 = arith.constant 0 : index
    %60 = vector.load %arg8[%c0_34, %c0_35] : memref<192x64xf32, #tpu.memory_space<vmem>>, vector<192x64xf32>
    %c0_36 = arith.constant 0 : index
    %c0_37 = arith.constant 0 : index
    %61 = vector.load %arg9[%c0_36, %c0_37] : memref<1x64xf32, #tpu.memory_space<vmem>>, vector<1x64xf32>
    %62 = vector.extract_strided_slice %59 {offsets = [0, 0], sizes = [25, 64], strides = [1, 1]} : vector<26x64xf32> to vector<25x64xf32>
    %c1_38 = arith.constant 1 : index
    %c0_39 = arith.constant 0 : index
    %63 = vector.load %arg25[%c1_38, %c0_39] : memref<26x192xf32, #tpu.memory_space<vmem>>, vector<25x64xf32>
    tpu.vector_store %arg25[%c1_38, %c0_39], %62 {strides = array<i32>} : memref<26x192xf32, #tpu.memory_space<vmem>>, vector<25x64xf32>,
    %c0_40 = arith.constant 0 : index
    %c64_41 = arith.constant 64 : index
    %64 = vector.load %arg25[%c0_40, %c64_41] : memref<26x192xf32, #tpu.memory_space<vmem>>, vector<26x64xf32>
    tpu.vector_store %arg25[%c0_40, %c64_41], %59 {strides = array<i32>} : memref<26x192xf32, #tpu.memory_space<vmem>>, vector<26x64xf32>,
    %65 = vector.extract_strided_slice %59 {offsets = [1, 0], sizes = [25, 64], strides = [1, 1]} : vector<26x64xf32> to vector<25x64xf32>
    %c0_42 = arith.constant 0 : index
    %c128_43 = arith.constant 128 : index
    %66 = vector.load %arg25[%c0_42, %c128_43] : memref<26x192xf32, #tpu.memory_space<vmem>>, vector<25x64xf32>
    tpu.vector_store %arg25[%c0_42, %c128_43], %65 {strides = array<i32>} : memref<26x192xf32, #tpu.memory_space<vmem>>, vector<25x64xf32>,
    %c0_44 = arith.constant 0 : index
    %c0_45 = arith.constant 0 : index
    %67 = vector.load %arg25[%c0_44, %c0_45] : memref<26x192xf32, #tpu.memory_space<vmem>>, vector<26x192xf32>
    %cst_46 = arith.constant dense<0.000000e+00> : vector<26x64xf32>
    %68 = tpu.matmul %67, %60, %cst_46 {dimension_numbers = #tpu.dot_dimension_numbers<[1], [0], [0], [1], [0, 0, 1, 1], [], []>} : vector<26x192xf32>, vector<192x64xf32>, vector<26x64xf32> -> vector<26x64xf32>
    %69 = vector.broadcast %61 : vector<1x64xf32> to vector<26x64xf32>
    %70 = arith.addf %68, %69 : vector<26x64xf32>
    %c0_47 = arith.constant 0 : index
    %c0_48 = arith.constant 0 : index
    %71 = vector.load %arg10[%c0_47, %c0_48] : memref<64x64xf32, #tpu.memory_space<vmem>>, vector<64x64xf32>
    %c0_49 = arith.constant 0 : index
    %c0_50 = arith.constant 0 : index
    %72 = vector.load %arg11[%c0_49, %c0_50] : memref<1x64xf32, #tpu.memory_space<vmem>>, vector<1x64xf32>
    %cst_51 = arith.constant dense<0.000000e+00> : vector<26x64xf32>
    %73 = tpu.matmul %70, %71, %cst_51 {dimension_numbers = #tpu.dot_dimension_numbers<[1], [0], [0], [1], [0, 0, 1, 1], [], []>} : vector<26x64xf32>, vector<64x64xf32>, vector<26x64xf32> -> vector<26x64xf32>
    %74 = vector.broadcast %72 : vector<1x64xf32> to vector<26x64xf32>
    %75 = arith.addf %73, %74 : vector<26x64xf32>
    %cst_52 = arith.constant 0.000000e+00 : f32
    %76 = vector.broadcast %cst_52 : f32 to vector<26x64xf32>
    %77 = arith.cmpf oge, %75, %76 : vector<26x64xf32>
    %cst_53 = arith.constant 0.00999999977 : f32
    %78 = vector.broadcast %cst_53 : f32 to vector<26x64xf32>
    %79 = arith.mulf %75, %78 : vector<26x64xf32>
    %80 = arith.select %77, %75, %79 : vector<26x64xi1>, vector<26x64xf32>
    %c0_54 = arith.constant 0 : index
    %c0_55 = arith.constant 0 : index
    %81 = vector.load %arg12[%c0_54, %c0_55] : memref<192x64xf32, #tpu.memory_space<vmem>>, vector<192x64xf32>
    %c0_56 = arith.constant 0 : index
    %c0_57 = arith.constant 0 : index
    %82 = vector.load %arg13[%c0_56, %c0_57] : memref<1x64xf32, #tpu.memory_space<vmem>>, vector<1x64xf32>
    %83 = vector.extract_strided_slice %80 {offsets = [0, 0], sizes = [25, 64], strides = [1, 1]} : vector<26x64xf32> to vector<25x64xf32>
    %c1_58 = arith.constant 1 : index
    %c0_59 = arith.constant 0 : index
    %84 = vector.load %arg25[%c1_58, %c0_59] : memref<26x192xf32, #tpu.memory_space<vmem>>, vector<25x64xf32>
    tpu.vector_store %arg25[%c1_58, %c0_59], %83 {strides = array<i32>} : memref<26x192xf32, #tpu.memory_space<vmem>>, vector<25x64xf32>,
    %c0_60 = arith.constant 0 : index
    %c64_61 = arith.constant 64 : index
    %85 = vector.load %arg25[%c0_60, %c64_61] : memref<26x192xf32, #tpu.memory_space<vmem>>, vector<26x64xf32>
    tpu.vector_store %arg25[%c0_60, %c64_61], %80 {strides = array<i32>} : memref<26x192xf32, #tpu.memory_space<vmem>>, vector<26x64xf32>,
    %86 = vector.extract_strided_slice %80 {offsets = [1, 0], sizes = [25, 64], strides = [1, 1]} : vector<26x64xf32> to vector<25x64xf32>
    %c0_62 = arith.constant 0 : index
    %c128_63 = arith.constant 128 : index
    %87 = vector.load %arg25[%c0_62, %c128_63] : memref<26x192xf32, #tpu.memory_space<vmem>>, vector<25x64xf32>
    tpu.vector_store %arg25[%c0_62, %c128_63], %86 {strides = array<i32>} : memref<26x192xf32, #tpu.memory_space<vmem>>, vector<25x64xf32>,
    %c0_64 = arith.constant 0 : index
    %c0_65 = arith.constant 0 : index
    %88 = vector.load %arg25[%c0_64, %c0_65] : memref<26x192xf32, #tpu.memory_space<vmem>>, vector<26x192xf32>
    %cst_66 = arith.constant dense<0.000000e+00> : vector<26x64xf32>
    %89 = tpu.matmul %88, %81, %cst_66 {dimension_numbers = #tpu.dot_dimension_numbers<[1], [0], [0], [1], [0, 0, 1, 1], [], []>} : vector<26x192xf32>, vector<192x64xf32>, vector<26x64xf32> -> vector<26x64xf32>
    %90 = vector.broadcast %82 : vector<1x64xf32> to vector<26x64xf32>
    %91 = arith.addf %89, %90 : vector<26x64xf32>
    %cst_67 = arith.constant 0.000000e+00 : f32
    %92 = vector.broadcast %cst_67 : f32 to vector<26x64xf32>
    %93 = arith.cmpf oge, %91, %92 : vector<26x64xf32>
    %cst_68 = arith.constant 0.00999999977 : f32
    %94 = vector.broadcast %cst_68 : f32 to vector<26x64xf32>
    %95 = arith.mulf %91, %94 : vector<26x64xf32>
    %96 = arith.select %93, %91, %95 : vector<26x64xi1>, vector<26x64xf32>
    %c0_69 = arith.constant 0 : index
    %c0_70 = arith.constant 0 : index
    %97 = vector.load %arg14[%c0_69, %c0_70] : memref<192x64xf32, #tpu.memory_space<vmem>>, vector<192x64xf32>
    %c0_71 = arith.constant 0 : index
    %c0_72 = arith.constant 0 : index
    %98 = vector.load %arg15[%c0_71, %c0_72] : memref<1x64xf32, #tpu.memory_space<vmem>>, vector<1x64xf32>
    %99 = vector.extract_strided_slice %96 {offsets = [0, 0], sizes = [25, 64], strides = [1, 1]} : vector<26x64xf32> to vector<25x64xf32>
    %c1_73 = arith.constant 1 : index
    %c0_74 = arith.constant 0 : index
    %100 = vector.load %arg25[%c1_73, %c0_74] : memref<26x192xf32, #tpu.memory_space<vmem>>, vector<25x64xf32>
    tpu.vector_store %arg25[%c1_73, %c0_74], %99 {strides = array<i32>} : memref<26x192xf32, #tpu.memory_space<vmem>>, vector<25x64xf32>,
    %c0_75 = arith.constant 0 : index
    %c64_76 = arith.constant 64 : index
    %101 = vector.load %arg25[%c0_75, %c64_76] : memref<26x192xf32, #tpu.memory_space<vmem>>, vector<26x64xf32>
    tpu.vector_store %arg25[%c0_75, %c64_76], %96 {strides = array<i32>} : memref<26x192xf32, #tpu.memory_space<vmem>>, vector<26x64xf32>,
    %102 = vector.extract_strided_slice %96 {offsets = [1, 0], sizes = [25, 64], strides = [1, 1]} : vector<26x64xf32> to vector<25x64xf32>
    %c0_77 = arith.constant 0 : index
    %c128_78 = arith.constant 128 : index
    %103 = vector.load %arg25[%c0_77, %c128_78] : memref<26x192xf32, #tpu.memory_space<vmem>>, vector<25x64xf32>
    tpu.vector_store %arg25[%c0_77, %c128_78], %102 {strides = array<i32>} : memref<26x192xf32, #tpu.memory_space<vmem>>, vector<25x64xf32>,
    %c0_79 = arith.constant 0 : index
    %c0_80 = arith.constant 0 : index
    %104 = vector.load %arg25[%c0_79, %c0_80] : memref<26x192xf32, #tpu.memory_space<vmem>>, vector<26x192xf32>
    %cst_81 = arith.constant dense<0.000000e+00> : vector<26x64xf32>
    %105 = tpu.matmul %104, %97, %cst_81 {dimension_numbers = #tpu.dot_dimension_numbers<[1], [0], [0], [1], [0, 0, 1, 1], [], []>} : vector<26x192xf32>, vector<192x64xf32>, vector<26x64xf32> -> vector<26x64xf32>
    %106 = vector.broadcast %98 : vector<1x64xf32> to vector<26x64xf32>
    %107 = arith.addf %105, %106 : vector<26x64xf32>
    %c0_82 = arith.constant 0 : index
    %c0_83 = arith.constant 0 : index
    %108 = vector.load %arg16[%c0_82, %c0_83] : memref<64x64xf32, #tpu.memory_space<vmem>>, vector<64x64xf32>
    %c0_84 = arith.constant 0 : index
    %c0_85 = arith.constant 0 : index
    %109 = vector.load %arg17[%c0_84, %c0_85] : memref<1x64xf32, #tpu.memory_space<vmem>>, vector<1x64xf32>
    %cst_86 = arith.constant dense<0.000000e+00> : vector<26x64xf32>
    %110 = tpu.matmul %107, %108, %cst_86 {dimension_numbers = #tpu.dot_dimension_numbers<[1], [0], [0], [1], [0, 0, 1, 1], [], []>} : vector<26x64xf32>, vector<64x64xf32>, vector<26x64xf32> -> vector<26x64xf32>
    %111 = vector.broadcast %109 : vector<1x64xf32> to vector<26x64xf32>
    %112 = arith.addf %110, %111 : vector<26x64xf32>
    %cst_87 = arith.constant 0.000000e+00 : f32
    %113 = vector.broadcast %cst_87 : f32 to vector<26x64xf32>
    %114 = arith.cmpf oge, %112, %113 : vector<26x64xf32>
    %cst_88 = arith.constant 0.00999999977 : f32
    %115 = vector.broadcast %cst_88 : f32 to vector<26x64xf32>
    %116 = arith.mulf %112, %115 : vector<26x64xf32>
    %117 = arith.select %114, %112, %116 : vector<26x64xi1>, vector<26x64xf32>
    %118 = vector.extract_strided_slice %117 {offsets = [0, 0], sizes = [1, 64], strides = [1, 1]} : vector<26x64xf32> to vector<1x64xf32>
    %c0_89 = arith.constant 0 : index
    %c0_90 = arith.constant 0 : index
    %119 = vector.load %arg26[%c0_89, %c0_90] : memref<1x1664xf32, #tpu.memory_space<vmem>>, vector<1x64xf32>
    tpu.vector_store %arg26[%c0_89, %c0_90], %118 {strides = array<i32>} : memref<1x1664xf32, #tpu.memory_space<vmem>>, vector<1x64xf32>,
    %120 = vector.extract_strided_slice %117 {offsets = [1, 0], sizes = [1, 64], strides = [1, 1]} : vector<26x64xf32> to vector<1x64xf32>
    %c0_91 = arith.constant 0 : index
    %c64_92 = arith.constant 64 : index
    %121 = vector.load %arg26[%c0_91, %c64_92] : memref<1x1664xf32, #tpu.memory_space<vmem>>, vector<1x64xf32>
    tpu.vector_store %arg26[%c0_91, %c64_92], %120 {strides = array<i32>} : memref<1x1664xf32, #tpu.memory_space<vmem>>, vector<1x64xf32>,
    %122 = vector.extract_strided_slice %117 {offsets = [2, 0], sizes = [1, 64], strides = [1, 1]} : vector<26x64xf32> to vector<1x64xf32>
    %c0_93 = arith.constant 0 : index
    %c128_94 = arith.constant 128 : index
    %123 = vector.load %arg26[%c0_93, %c128_94] : memref<1x1664xf32, #tpu.memory_space<vmem>>, vector<1x64xf32>
    tpu.vector_store %arg26[%c0_93, %c128_94], %122 {strides = array<i32>} : memref<1x1664xf32, #tpu.memory_space<vmem>>, vector<1x64xf32>,
    %124 = vector.extract_strided_slice %117 {offsets = [3, 0], sizes = [1, 64], strides = [1, 1]} : vector<26x64xf32> to vector<1x64xf32>
    %c0_95 = arith.constant 0 : index
    %c192 = arith.constant 192 : index
    %125 = vector.load %arg26[%c0_95, %c192] : memref<1x1664xf32, #tpu.memory_space<vmem>>, vector<1x64xf32>
    tpu.vector_store %arg26[%c0_95, %c192], %124 {strides = array<i32>} : memref<1x1664xf32, #tpu.memory_space<vmem>>, vector<1x64xf32>,
    %126 = vector.extract_strided_slice %117 {offsets = [4, 0], sizes = [1, 64], strides = [1, 1]} : vector<26x64xf32> to vector<1x64xf32>
    %c0_96 = arith.constant 0 : index
    %c256 = arith.constant 256 : index
    %127 = vector.load %arg26[%c0_96, %c256] : memref<1x1664xf32, #tpu.memory_space<vmem>>, vector<1x64xf32>
    tpu.vector_store %arg26[%c0_96, %c256], %126 {strides = array<i32>} : memref<1x1664xf32, #tpu.memory_space<vmem>>, vector<1x64xf32>,
    %128 = vector.extract_strided_slice %117 {offsets = [5, 0], sizes = [1, 64], strides = [1, 1]} : vector<26x64xf32> to vector<1x64xf32>
    %c0_97 = arith.constant 0 : index
    %c320 = arith.constant 320 : index
    %129 = vector.load %arg26[%c0_97, %c320] : memref<1x1664xf32, #tpu.memory_space<vmem>>, vector<1x64xf32>
    tpu.vector_store %arg26[%c0_97, %c320], %128 {strides = array<i32>} : memref<1x1664xf32, #tpu.memory_space<vmem>>, vector<1x64xf32>,
    %130 = vector.extract_strided_slice %117 {offsets = [6, 0], sizes = [1, 64], strides = [1, 1]} : vector<26x64xf32> to vector<1x64xf32>
    %c0_98 = arith.constant 0 : index
    %c384 = arith.constant 384 : index
    %131 = vector.load %arg26[%c0_98, %c384] : memref<1x1664xf32, #tpu.memory_space<vmem>>, vector<1x64xf32>
    tpu.vector_store %arg26[%c0_98, %c384], %130 {strides = array<i32>} : memref<1x1664xf32, #tpu.memory_space<vmem>>, vector<1x64xf32>,
    %132 = vector.extract_strided_slice %117 {offsets = [7, 0], sizes = [1, 64], strides = [1, 1]} : vector<26x64xf32> to vector<1x64xf32>
    %c0_99 = arith.constant 0 : index
    %c448 = arith.constant 448 : index
    %133 = vector.load %arg26[%c0_99, %c448] : memref<1x1664xf32, #tpu.memory_space<vmem>>, vector<1x64xf32>
    tpu.vector_store %arg26[%c0_99, %c448], %132 {strides = array<i32>} : memref<1x1664xf32, #tpu.memory_space<vmem>>, vector<1x64xf32>,
    %134 = vector.extract_strided_slice %117 {offsets = [8, 0], sizes = [1, 64], strides = [1, 1]} : vector<26x64xf32> to vector<1x64xf32>
    %c0_100 = arith.constant 0 : index
    %c512 = arith.constant 512 : index
    %135 = vector.load %arg26[%c0_100, %c512] : memref<1x1664xf32, #tpu.memory_space<vmem>>, vector<1x64xf32>
    tpu.vector_store %arg26[%c0_100, %c512], %134 {strides = array<i32>} : memref<1x1664xf32, #tpu.memory_space<vmem>>, vector<1x64xf32>,
    %136 = vector.extract_strided_slice %117 {offsets = [9, 0], sizes = [1, 64], strides = [1, 1]} : vector<26x64xf32> to vector<1x64xf32>
    %c0_101 = arith.constant 0 : index
    %c576 = arith.constant 576 : index
    %137 = vector.load %arg26[%c0_101, %c576] : memref<1x1664xf32, #tpu.memory_space<vmem>>, vector<1x64xf32>
    tpu.vector_store %arg26[%c0_101, %c576], %136 {strides = array<i32>} : memref<1x1664xf32, #tpu.memory_space<vmem>>, vector<1x64xf32>,
    %138 = vector.extract_strided_slice %117 {offsets = [10, 0], sizes = [1, 64], strides = [1, 1]} : vector<26x64xf32> to vector<1x64xf32>
    %c0_102 = arith.constant 0 : index
    %c640 = arith.constant 640 : index
    %139 = vector.load %arg26[%c0_102, %c640] : memref<1x1664xf32, #tpu.memory_space<vmem>>, vector<1x64xf32>
    tpu.vector_store %arg26[%c0_102, %c640], %138 {strides = array<i32>} : memref<1x1664xf32, #tpu.memory_space<vmem>>, vector<1x64xf32>,
    %140 = vector.extract_strided_slice %117 {offsets = [11, 0], sizes = [1, 64], strides = [1, 1]} : vector<26x64xf32> to vector<1x64xf32>
    %c0_103 = arith.constant 0 : index
    %c704 = arith.constant 704 : index
    %141 = vector.load %arg26[%c0_103, %c704] : memref<1x1664xf32, #tpu.memory_space<vmem>>, vector<1x64xf32>
    tpu.vector_store %arg26[%c0_103, %c704], %140 {strides = array<i32>} : memref<1x1664xf32, #tpu.memory_space<vmem>>, vector<1x64xf32>,
    %142 = vector.extract_strided_slice %117 {offsets = [12, 0], sizes = [1, 64], strides = [1, 1]} : vector<26x64xf32> to vector<1x64xf32>
    %c0_104 = arith.constant 0 : index
    %c768 = arith.constant 768 : index
    %143 = vector.load %arg26[%c0_104, %c768] : memref<1x1664xf32, #tpu.memory_space<vmem>>, vector<1x64xf32>
    tpu.vector_store %arg26[%c0_104, %c768], %142 {strides = array<i32>} : memref<1x1664xf32, #tpu.memory_space<vmem>>, vector<1x64xf32>,
    %144 = vector.extract_strided_slice %117 {offsets = [13, 0], sizes = [1, 64], strides = [1, 1]} : vector<26x64xf32> to vector<1x64xf32>
    %c0_105 = arith.constant 0 : index
    %c832 = arith.constant 832 : index
    %145 = vector.load %arg26[%c0_105, %c832] : memref<1x1664xf32, #tpu.memory_space<vmem>>, vector<1x64xf32>
    tpu.vector_store %arg26[%c0_105, %c832], %144 {strides = array<i32>} : memref<1x1664xf32, #tpu.memory_space<vmem>>, vector<1x64xf32>,
    %146 = vector.extract_strided_slice %117 {offsets = [14, 0], sizes = [1, 64], strides = [1, 1]} : vector<26x64xf32> to vector<1x64xf32>
    %c0_106 = arith.constant 0 : index
    %c896 = arith.constant 896 : index
    %147 = vector.load %arg26[%c0_106, %c896] : memref<1x1664xf32, #tpu.memory_space<vmem>>, vector<1x64xf32>
    tpu.vector_store %arg26[%c0_106, %c896], %146 {strides = array<i32>} : memref<1x1664xf32, #tpu.memory_space<vmem>>, vector<1x64xf32>,
    %148 = vector.extract_strided_slice %117 {offsets = [15, 0], sizes = [1, 64], strides = [1, 1]} : vector<26x64xf32> to vector<1x64xf32>
    %c0_107 = arith.constant 0 : index
    %c960 = arith.constant 960 : index
    %149 = vector.load %arg26[%c0_107, %c960] : memref<1x1664xf32, #tpu.memory_space<vmem>>, vector<1x64xf32>
    tpu.vector_store %arg26[%c0_107, %c960], %148 {strides = array<i32>} : memref<1x1664xf32, #tpu.memory_space<vmem>>, vector<1x64xf32>,
    %150 = vector.extract_strided_slice %117 {offsets = [16, 0], sizes = [1, 64], strides = [1, 1]} : vector<26x64xf32> to vector<1x64xf32>
    %c0_108 = arith.constant 0 : index
    %c1024 = arith.constant 1024 : index
    %151 = vector.load %arg26[%c0_108, %c1024] : memref<1x1664xf32, #tpu.memory_space<vmem>>, vector<1x64xf32>
    tpu.vector_store %arg26[%c0_108, %c1024], %150 {strides = array<i32>} : memref<1x1664xf32, #tpu.memory_space<vmem>>, vector<1x64xf32>,
    %152 = vector.extract_strided_slice %117 {offsets = [17, 0], sizes = [1, 64], strides = [1, 1]} : vector<26x64xf32> to vector<1x64xf32>
    %c0_109 = arith.constant 0 : index
    %c1088 = arith.constant 1088 : index
    %153 = vector.load %arg26[%c0_109, %c1088] : memref<1x1664xf32, #tpu.memory_space<vmem>>, vector<1x64xf32>
    tpu.vector_store %arg26[%c0_109, %c1088], %152 {strides = array<i32>} : memref<1x1664xf32, #tpu.memory_space<vmem>>, vector<1x64xf32>,
    %154 = vector.extract_strided_slice %117 {offsets = [18, 0], sizes = [1, 64], strides = [1, 1]} : vector<26x64xf32> to vector<1x64xf32>
    %c0_110 = arith.constant 0 : index
    %c1152 = arith.constant 1152 : index
    %155 = vector.load %arg26[%c0_110, %c1152] : memref<1x1664xf32, #tpu.memory_space<vmem>>, vector<1x64xf32>
    tpu.vector_store %arg26[%c0_110, %c1152], %154 {strides = array<i32>} : memref<1x1664xf32, #tpu.memory_space<vmem>>, vector<1x64xf32>,
    %156 = vector.extract_strided_slice %117 {offsets = [19, 0], sizes = [1, 64], strides = [1, 1]} : vector<26x64xf32> to vector<1x64xf32>
    %c0_111 = arith.constant 0 : index
    %c1216 = arith.constant 1216 : index
    %157 = vector.load %arg26[%c0_111, %c1216] : memref<1x1664xf32, #tpu.memory_space<vmem>>, vector<1x64xf32>
    tpu.vector_store %arg26[%c0_111, %c1216], %156 {strides = array<i32>} : memref<1x1664xf32, #tpu.memory_space<vmem>>, vector<1x64xf32>,
    %158 = vector.extract_strided_slice %117 {offsets = [20, 0], sizes = [1, 64], strides = [1, 1]} : vector<26x64xf32> to vector<1x64xf32>
    %c0_112 = arith.constant 0 : index
    %c1280 = arith.constant 1280 : index
    %159 = vector.load %arg26[%c0_112, %c1280] : memref<1x1664xf32, #tpu.memory_space<vmem>>, vector<1x64xf32>
    tpu.vector_store %arg26[%c0_112, %c1280], %158 {strides = array<i32>} : memref<1x1664xf32, #tpu.memory_space<vmem>>, vector<1x64xf32>,
    %160 = vector.extract_strided_slice %117 {offsets = [21, 0], sizes = [1, 64], strides = [1, 1]} : vector<26x64xf32> to vector<1x64xf32>
    %c0_113 = arith.constant 0 : index
    %c1344 = arith.constant 1344 : index
    %161 = vector.load %arg26[%c0_113, %c1344] : memref<1x1664xf32, #tpu.memory_space<vmem>>, vector<1x64xf32>
    tpu.vector_store %arg26[%c0_113, %c1344], %160 {strides = array<i32>} : memref<1x1664xf32, #tpu.memory_space<vmem>>, vector<1x64xf32>,
    %162 = vector.extract_strided_slice %117 {offsets = [22, 0], sizes = [1, 64], strides = [1, 1]} : vector<26x64xf32> to vector<1x64xf32>
    %c0_114 = arith.constant 0 : index
    %c1408 = arith.constant 1408 : index
    %163 = vector.load %arg26[%c0_114, %c1408] : memref<1x1664xf32, #tpu.memory_space<vmem>>, vector<1x64xf32>
    tpu.vector_store %arg26[%c0_114, %c1408], %162 {strides = array<i32>} : memref<1x1664xf32, #tpu.memory_space<vmem>>, vector<1x64xf32>,
    %164 = vector.extract_strided_slice %117 {offsets = [23, 0], sizes = [1, 64], strides = [1, 1]} : vector<26x64xf32> to vector<1x64xf32>
    %c0_115 = arith.constant 0 : index
    %c1472 = arith.constant 1472 : index
    %165 = vector.load %arg26[%c0_115, %c1472] : memref<1x1664xf32, #tpu.memory_space<vmem>>, vector<1x64xf32>
    tpu.vector_store %arg26[%c0_115, %c1472], %164 {strides = array<i32>} : memref<1x1664xf32, #tpu.memory_space<vmem>>, vector<1x64xf32>,
    %166 = vector.extract_strided_slice %117 {offsets = [24, 0], sizes = [1, 64], strides = [1, 1]} : vector<26x64xf32> to vector<1x64xf32>
    %c0_116 = arith.constant 0 : index
    %c1536 = arith.constant 1536 : index
    %167 = vector.load %arg26[%c0_116, %c1536] : memref<1x1664xf32, #tpu.memory_space<vmem>>, vector<1x64xf32>
    tpu.vector_store %arg26[%c0_116, %c1536], %166 {strides = array<i32>} : memref<1x1664xf32, #tpu.memory_space<vmem>>, vector<1x64xf32>,
    %168 = vector.extract_strided_slice %117 {offsets = [25, 0], sizes = [1, 64], strides = [1, 1]} : vector<26x64xf32> to vector<1x64xf32>
    %c0_117 = arith.constant 0 : index
    %c1600 = arith.constant 1600 : index
    %169 = vector.load %arg26[%c0_117, %c1600] : memref<1x1664xf32, #tpu.memory_space<vmem>>, vector<1x64xf32>
    tpu.vector_store %arg26[%c0_117, %c1600], %168 {strides = array<i32>} : memref<1x1664xf32, #tpu.memory_space<vmem>>, vector<1x64xf32>,
    %c0_118 = arith.constant 0 : index
    %c0_119 = arith.constant 0 : index
    %170 = vector.load %arg26[%c0_118, %c0_119] : memref<1x1664xf32, #tpu.memory_space<vmem>>, vector<1x1664xf32>
    %c0_120 = arith.constant 0 : index
    %c0_121 = arith.constant 0 : index
    %171 = vector.load %arg18[%c0_120, %c0_121] : memref<1664x128xf32, #tpu.memory_space<vmem>>, vector<1664x128xf32>
    %c0_122 = arith.constant 0 : index
    %c0_123 = arith.constant 0 : index
    %172 = vector.load %arg19[%c0_122, %c0_123] : memref<1x128xf32, #tpu.memory_space<vmem>>, vector<1x128xf32>
    %cst_124 = arith.constant dense<0.000000e+00> : vector<1x128xf32>
    %173 = tpu.matmul %170, %171, %cst_124 {dimension_numbers = #tpu.dot_dimension_numbers<[1], [0], [0], [1], [0, 0, 1, 1], [], []>} : vector<1x1664xf32>, vector<1664x128xf32>, vector<1x128xf32> -> vector<1x128xf32>
    %174 = arith.addf %173, %172 : vector<1x128xf32>
    %cst_125 = arith.constant 0.000000e+00 : f32
    %175 = vector.broadcast %cst_125 : f32 to vector<1x128xf32>
    %176 = arith.cmpf oge, %174, %175 : vector<1x128xf32>
    %cst_126 = arith.constant 0.00999999977 : f32
    %177 = vector.broadcast %cst_126 : f32 to vector<1x128xf32>
    %178 = arith.mulf %174, %177 : vector<1x128xf32>
    %179 = arith.select %176, %174, %178 : vector<1x128xi1>, vector<1x128xf32>
    %c0_127 = arith.constant 0 : index
    %c0_128 = arith.constant 0 : index
    %180 = vector.load %arg20[%c0_127, %c0_128] : memref<128x32xf32, #tpu.memory_space<vmem>>, vector<128x32xf32>
    %c0_129 = arith.constant 0 : index
    %c0_130 = arith.constant 0 : index
    %181 = vector.load %arg21[%c0_129, %c0_130] : memref<1x32xf32, #tpu.memory_space<vmem>>, vector<1x32xf32>
    %cst_131 = arith.constant dense<0.000000e+00> : vector<1x32xf32>
    %182 = tpu.matmul %179, %180, %cst_131 {dimension_numbers = #tpu.dot_dimension_numbers<[1], [0], [0], [1], [0, 0, 1, 1], [], []>} : vector<1x128xf32>, vector<128x32xf32>, vector<1x32xf32> -> vector<1x32xf32>
    %183 = arith.addf %182, %181 : vector<1x32xf32>
    %cst_132 = arith.constant 0.000000e+00 : f32
    %184 = vector.broadcast %cst_132 : f32 to vector<1x32xf32>
    %185 = arith.cmpf oge, %183, %184 : vector<1x32xf32>
    %cst_133 = arith.constant 0.00999999977 : f32
    %186 = vector.broadcast %cst_133 : f32 to vector<1x32xf32>
    %187 = arith.mulf %183, %186 : vector<1x32xf32>
    %188 = arith.select %185, %183, %187 : vector<1x32xi1>, vector<1x32xf32>
    %c0_134 = arith.constant 0 : index
    %c0_135 = arith.constant 0 : index
    %189 = vector.load %arg22[%c0_134, %c0_135] : memref<32x1xf32, #tpu.memory_space<vmem>>, vector<32x1xf32>
    %c0_136 = arith.constant 0 : index
    %c0_137 = arith.constant 0 : index
    %190 = vector.load %arg23[%c0_136, %c0_137] : memref<1x1xf32, #tpu.memory_space<vmem>>, vector<1x1xf32>
    %cst_138 = arith.constant dense<0.000000e+00> : vector<1x1xf32>
    %191 = tpu.matmul %188, %189, %cst_138 {dimension_numbers = #tpu.dot_dimension_numbers<[1], [0], [0], [1], [0, 0, 1, 1], [], []>} : vector<1x32xf32>, vector<32x1xf32>, vector<1x1xf32> -> vector<1x1xf32>
    %192 = arith.addf %191, %190 : vector<1x1xf32>
    %c0_139 = arith.constant 0 : index
    %c0_140 = arith.constant 0 : index
    %c0_141 = arith.constant 0 : index
    %193 = vector.load %arg24[%c0_139, %c0_140, %c0_141] : memref<1x1x1xf32, #tpu.memory_space<vmem>>, vector<1x1x1xf32>
    %194 = vector.shape_cast %193 : vector<1x1x1xf32> to vector<1x1xf32>
    %195 = vector.shape_cast %192 : vector<1x1xf32> to vector<1x1x1xf32>
    tpu.vector_store %arg24[%c0_139, %c0_140, %c0_141], %195 {strides = array<i32>} : memref<1x1x1xf32, #tpu.memory_space<vmem>>, vector<1x1x1xf32>,
    return
  }
  func.func @transform_0(%arg0: i32) -> (i32, i32, i32) {
    %c0_i32 = arith.constant 0 : i32
    %c0_i32_0 = arith.constant 0 : i32
    %c0_i32_1 = arith.constant 0 : i32
    return %arg0, %c0_i32, %c0_i32_0 : i32, i32, i32
  }
  func.func @transform_1(%arg0: i32) -> (i32, i32) {
    %c0_i32 = arith.constant 0 : i32
    %c0_i32_0 = arith.constant 0 : i32
    %c0_i32_1 = arith.constant 0 : i32
    return %c0_i32, %c0_i32_0 : i32, i32
  }
  func.func @transform_2(%arg0: i32) -> (i32, i32) {
    %c0_i32 = arith.constant 0 : i32
    %c0_i32_0 = arith.constant 0 : i32
    %c0_i32_1 = arith.constant 0 : i32
    return %c0_i32, %c0_i32_0 : i32, i32
  }
  func.func @transform_3(%arg0: i32) -> (i32, i32) {
    %c0_i32 = arith.constant 0 : i32
    %c0_i32_0 = arith.constant 0 : i32
    %c0_i32_1 = arith.constant 0 : i32
    return %c0_i32, %c0_i32_0 : i32, i32
  }
  func.func @transform_4(%arg0: i32) -> (i32, i32) {
    %c0_i32 = arith.constant 0 : i32
    %c0_i32_0 = arith.constant 0 : i32
    %c0_i32_1 = arith.constant 0 : i32
    return %c0_i32, %c0_i32_0 : i32, i32
  }
  func.func @transform_5(%arg0: i32) -> (i32, i32) {
    %c0_i32 = arith.constant 0 : i32
    %c0_i32_0 = arith.constant 0 : i32
    %c0_i32_1 = arith.constant 0 : i32
    return %c0_i32, %c0_i32_0 : i32, i32
  }
  func.func @transform_6(%arg0: i32) -> (i32, i32) {
    %c0_i32 = arith.constant 0 : i32
    %c0_i32_0 = arith.constant 0 : i32
    %c0_i32_1 = arith.constant 0 : i32
    return %c0_i32, %c0_i32_0 : i32, i32
  }
  func.func @transform_7(%arg0: i32) -> (i32, i32) {
    %c0_i32 = arith.constant 0 : i32
    %c0_i32_0 = arith.constant 0 : i32
    %c0_i32_1 = arith.constant 0 : i32
    return %c0_i32, %c0_i32_0 : i32, i32
  }
  func.func @transform_8(%arg0: i32) -> (i32, i32) {
    %c0_i32 = arith.constant 0 : i32
    %c0_i32_0 = arith.constant 0 : i32
    %c0_i32_1 = arith.constant 0 : i32
    return %c0_i32, %c0_i32_0 : i32, i32
  }
  func.func @transform_9(%arg0: i32) -> (i32, i32) {
    %c0_i32 = arith.constant 0 : i32
    %c0_i32_0 = arith.constant 0 : i32
    %c0_i32_1 = arith.constant 0 : i32
    return %c0_i32, %c0_i32_0 : i32, i32
  }
  func.func @transform_10(%arg0: i32) -> (i32, i32) {
    %c0_i32 = arith.constant 0 : i32
    %c0_i32_0 = arith.constant 0 : i32
    %c0_i32_1 = arith.constant 0 : i32
    return %c0_i32, %c0_i32_0 : i32, i32
  }
  func.func @transform_11(%arg0: i32) -> (i32, i32) {
    %c0_i32 = arith.constant 0 : i32
    %c0_i32_0 = arith.constant 0 : i32
    %c0_i32_1 = arith.constant 0 : i32
    return %c0_i32, %c0_i32_0 : i32, i32
  }
  func.func @transform_12(%arg0: i32) -> (i32, i32) {
    %c0_i32 = arith.constant 0 : i32
    %c0_i32_0 = arith.constant 0 : i32
    %c0_i32_1 = arith.constant 0 : i32
    return %c0_i32, %c0_i32_0 : i32, i32
  }
  func.func @transform_13(%arg0: i32) -> (i32, i32) {
    %c0_i32 = arith.constant 0 : i32
    %c0_i32_0 = arith.constant 0 : i32
    %c0_i32_1 = arith.constant 0 : i32
    return %c0_i32, %c0_i32_0 : i32, i32
  }
  func.func @transform_14(%arg0: i32) -> (i32, i32) {
    %c0_i32 = arith.constant 0 : i32
    %c0_i32_0 = arith.constant 0 : i32
    %c0_i32_1 = arith.constant 0 : i32
    return %c0_i32, %c0_i32_0 : i32, i32
  }
  func.func @transform_15(%arg0: i32) -> (i32, i32) {
    %c0_i32 = arith.constant 0 : i32
    %c0_i32_0 = arith.constant 0 : i32
    %c0_i32_1 = arith.constant 0 : i32
    return %c0_i32, %c0_i32_0 : i32, i32
  }
  func.func @transform_16(%arg0: i32) -> (i32, i32) {
    %c0_i32 = arith.constant 0 : i32
    %c0_i32_0 = arith.constant 0 : i32
    %c0_i32_1 = arith.constant 0 : i32
    return %c0_i32, %c0_i32_0 : i32, i32
  }
  func.func @transform_17(%arg0: i32) -> (i32, i32) {
    %c0_i32 = arith.constant 0 : i32
    %c0_i32_0 = arith.constant 0 : i32
    %c0_i32_1 = arith.constant 0 : i32
    return %c0_i32, %c0_i32_0 : i32, i32
  }
  func.func @transform_18(%arg0: i32) -> (i32, i32) {
    %c0_i32 = arith.constant 0 : i32
    %c0_i32_0 = arith.constant 0 : i32
    %c0_i32_1 = arith.constant 0 : i32
    return %c0_i32, %c0_i32_0 : i32, i32
  }
  func.func @transform_19(%arg0: i32) -> (i32, i32) {
    %c0_i32 = arith.constant 0 : i32
    %c0_i32_0 = arith.constant 0 : i32
    %c0_i32_1 = arith.constant 0 : i32
    return %c0_i32, %c0_i32_0 : i32, i32
  }
  func.func @transform_20(%arg0: i32) -> (i32, i32) {
    %c0_i32 = arith.constant 0 : i32
    %c0_i32_0 = arith.constant 0 : i32
    %c0_i32_1 = arith.constant 0 : i32
    return %c0_i32, %c0_i32_0 : i32, i32
  }
  func.func @transform_21(%arg0: i32) -> (i32, i32) {
    %c0_i32 = arith.constant 0 : i32
    %c0_i32_0 = arith.constant 0 : i32
    %c0_i32_1 = arith.constant 0 : i32
    return %c0_i32, %c0_i32_0 : i32, i32
  }
  func.func @transform_22(%arg0: i32) -> (i32, i32) {
    %c0_i32 = arith.constant 0 : i32
    %c0_i32_0 = arith.constant 0 : i32
    %c0_i32_1 = arith.constant 0 : i32
    return %c0_i32, %c0_i32_0 : i32, i32
  }
  func.func @transform_23(%arg0: i32) -> (i32, i32, i32) {
    %c0_i32 = arith.constant 0 : i32
    %c0_i32_0 = arith.constant 0 : i32
    %c0_i32_1 = arith.constant 0 : i32
    return %arg0, %c0_i32, %c0_i32_0 : i32, i32, i32
  }
}

</mosaic_0001>

<bundles_post_ra>
// kernel: _forward.1
= control target key start
LH: loop header
LB: loop body
LE: loop exit
PB: predicated region body
PF: predicated region fallthrough
CT: control target
= control target key end

     0   :  { %s5323_s0 = inlined_call_operand.vmem [shape: f32[2,30,1], index: 0, kind: input, shape index: {}]   ;;  %s5324_s1 = inlined_call_operand.vmem [shape: f32[3,16], index: 1, kind: input, shape index: {}]   ;;  %s5325_s2 = inlined_call_operand.vmem [shape: f32[1,16], index: 2, kind: input, shape index: {}]   ;;  %s5326_s3 = inlined_call_operand.vmem [shape: f32[48,64], index: 3, kind: input, shape index: {}]   ;;  %s5327_s4 = inlined_call_operand.vmem [shape: f32[1,64], index: 4, kind: input, shape index: {}]   ;;  %s5328_s5 = inlined_call_operand.vmem [shape: f32[192,64], index: 5, kind: input, shape index: {}]   ;;  %s5329_s6 = inlined_call_operand.vmem [shape: f32[1,64], index: 6, kind: input, shape index: {}]   ;;  %s5330_s7 = inlined_call_operand.vmem [shape: f32[192,64], index: 7, kind: input, shape index: {}]   ;;  %s5331_s8 = inlined_call_operand.vmem [shape: f32[1,64], index: 8, kind: input, shape index: {}]   ;;  %s5332_s9 = inlined_call_operand.vmem [shape: f32[64,64], index: 9, kind: input, shape index: {}]   ;;  %s5333_s10 = inlined_call_operand.vmem [shape: f32[1,64], index: 10, kind: input, shape index: {}]   ;;  %s5334_s11 = inlined_call_operand.vmem [shape: f32[192,64], index: 11, kind: input, shape index: {}]   ;;  %s5335_s12 = inlined_call_operand.vmem [shape: f32[1,64], index: 12, kind: input, shape index: {}]   ;;  %s5336_s13 = inlined_call_operand.vmem [shape: f32[192,64], index: 13, kind: input, shape index: {}]   ;;  %s5337_s14 = inlined_call_operand.vmem [shape: f32[1,64], index: 14, kind: input, shape index: {}]   ;;  %s5338_s15 = inlined_call_operand.vmem [shape: f32[64,64], index: 15, kind: input, shape index: {}]   ;;  %s5339_s16 = inlined_call_operand.vmem [shape: f32[1,64], index: 16, kind: input, shape index: {}]   ;;  %s5340_s17 = inlined_call_operand.hbm [shape: f32[1664,128], index: 17, kind: input, shape index: {}]   ;;  %s5341_s18 = inlined_call_operand.vmem [shape: f32[1,128], index: 18, kind: input, shape index: {}]   ;;  %s5342_s19 = inlined_call_operand.vmem [shape: f32[128,32], index: 19, kind: input, shape index: {}]   ;;  %s5343_s20 = inlined_call_operand.vmem [shape: f32[1,32], index: 20, kind: input, shape index: {}]   ;;  %s5344_s21 = inlined_call_operand.vmem [shape: f32[32,1], index: 21, kind: input, shape index: {}]   ;;  %s5345_s22 = inlined_call_operand.<no memory space> [shape: f32[1,1], index: 22, kind: input, shape index: {}]   ;;  %s5346_s23 = inlined_call_operand.vmem [shape: f32[2,1,1], index: 23, kind: output, shape index: {}]  }
   0x1   :  { %5352 = sst [smem:[#allocation8_spill]] %s5323_s0  ;;  %v28_v0 = vstv %s5345_s22 }
   0x2   :  { %5353 = sst [smem:[#allocation9_spill]] %s5324_s1  ;;  %29 = vst [vmem:[#allocation4] sm:$0x1] %v28_v0 }
   0x3   :  { %5354 = sst [smem:[#allocation10_spill]] %s5325_s2 }
   0x4   :  { %5355 = sst [smem:[#allocation11_spill]] %s5326_s3 }
   0x5   :  { %5356 = sst [smem:[#allocation12_spill]] %s5327_s4 }
   0x6   :  { %5357 = sst [smem:[#allocation13_spill]] %s5328_s5 }
   0x7   :  { %5358 = sst [smem:[#allocation14_spill]] %s5329_s6 }
   0x8   :  { %5359 = sst [smem:[#allocation15_spill]] %s5330_s7 }
   0x9   :  { %30 = vsyncpa [#allocation6], 0  ;;  %s4428_s24 = smov 0  }
   0xa LB: > { %s4434_s25 = sadd.s32 4294967295, %s4292_s24   ;;  %p3316_p0 = scmp.ge.s32.totalorder %s4292_s24, 1  ;;  %s4292_s24 = sphi %s4428_s24, %s36_s24  }
   0xb   : > { %p555_p1 = scmp.lt.s32.totalorder %s4292_s24, 3  ;;  %s4294_s5 = smov [#allocation5]  }
   0xc   : > { %s615_s22 = sshll.u32 %s4294_s5, 4  ;;  %p5350_p3 = scmp.eq.s32.totalorder %s4434_s25, 0  ;;  %s616_s22 = int_to_ptr.vmem [resolvable:$true] %s615_s22 }
   0xd   : > { %p4438_p2 = pnand %p3316_p0, %p555_p1  ;;  %s4254_s27 = scalar_lea.hbm %s5340_s17, 26624 }
   0xe   : > { %p4255_p6 = scmp.ne.s32.totalorder %s5340_s17, %s4254_s27  ;;  %p4261_p10 = scmp.lt.u32.totalorder %s4254_s27, %s5340_s17 }
   0xf   : > { %s5360_s1 = scalar_select %p4438_p2, 1, 0 }
  0x10   : > { %p4227_p4 = pneg %p4438_p2 }
  0x12   : > { %p4447_p5 = pnand %p5350_p3, %p4227_p4 }
  0x14   : > { %p4256_p7 = pneg %p4447_p5 }
  0x16   : > { %p4257_p8 = pnand %p4256_p7, %p4255_p6 }
  0x18   : > { %p4258_p9 = pneg %p4257_p8 }
  0x1a   : > { %p4263_p11 = pnand %p4261_p10, %p4258_p9 }
  0x1c   : > { %4266 = shalt.err (!%p4263_p11)
}
  0x1d   : > { %s4267_s0 = scalar_lea.vmem %s616_s22, 26624  ;;  %p4275_p1 = scmp.lt.s32.totalorder %s616_s22, %s616_s22 }
  0x1e   : > { %p4268_p12 = scmp.ne.s32.totalorder %s616_s22, %s4267_s0  ;;  %p4276_p4 = scmp.lt.s32.totalorder %s4267_s0, %s4267_s0 }
  0x20   : > { %p4270_p13 = pnand %p4268_p12, %p4256_p7  ;;  %p4277_p3 = por %p4276_p4, %p4275_p1 }
  0x22   : > { %p4271_p0 = pneg %p4270_p13 }
  0x24   : > { %p4278_p2 = pnand %p4277_p3, %p4271_p0 }
  0x26   : > { %4281 = shalt.err (!%p4278_p2)
}
  0x27   : > { %s4295_s4 = smov 128   ;;  %s4296_s30 = smov 8  }
  0x28   : > { %4230 = dma.hbm_to_vmem [thread:$0]  (!%p4447_p5), %s5340_s17, 26624, %s616_s22, [#allocation6], %s4295_s4, %s4295_s4, %s4296_s30  }
  0x29   : > { %p5362_p6 = scmp.ne.s32.totalorder %s5360_s1, 0 }
  0x2a   : > { %p5363_p8 = scmp.eq.s32.totalorder (!%p5362_p6), %s4434_s25, 0 }
  0x2b   : > { %654 = sbr.rel (%p5362_p6) target bundleno = 3355 (0xd1b), region = 112 }
  0x32   : > { %4287 = dma.done.wait (%p5363_p8), [#allocation6], 26624   ;;  %p5364_p7 = pmov %p5363_p8 }
  0x33   : > { %p716_p2 = scmp.lt.s32.totalorder %s4434_s25, 1  ;;  %v4297_v1 = vmov 0   ;;  %s5365_s1 = sld [smem:[#allocation8_spill]]  ;;  %v4298_v6 = vmov 0.0   ;;  %v760_v7 = vlaneseq  ;;  %vm784_vm0 = vcmask 1046528  }
  0x34   : > { %4289 = vsyncadd (%p5364_p7), [#allocation6], 4294940672  ;;  %4253 = vset.pattern.permute.xlu1 %v4297_v1  ;;  %4252 = vset.pattern.permute.xlu0 %v4297_v1  ;;  %724 = vst [vmem:[#allocation2] sm:$0xff] %v4298_v6  ;;  %s5366_s29 = sld [smem:[#allocation9_spill]]  ;;  %vm812_vm1 = vcmask 1045504   ;;  %s5367_s4 = sld [smem:[#allocation10_spill]] }
  0x35   : > { %s5378_s25 = smov (!%p716_p2, %s4434_s25), 1  ;;  %727 = vst [vmem:[#allocation2 + $0x10] sm:$0xff] %v4298_v6  ;;  %729 = vst [vmem:[#allocation2 + $0x20] sm:$0xff] %v4298_v6  ;;  %v4486_v8 = vshrl.u32 %v760_v7, 7  ;;  %s4299_s30 = smov 64   ;;  %vm861_vm2 = vcmask 654848  }
  0x36   : > { %s3362_s26 = sshll.u32 %s5378_s25, 5  ;;  %731 = vst [vmem:[#allocation2 + $0x30] sm:$0x3] %v4298_v6  ;;  %s4300_s5 = smov 80   ;;  %vm886_vm3 = vcmask 786048   ;;  %vm911_vm4 = vcmask 917248  }
  0x37   : > { %v4489_v9 = vsub.s32 1, %v4486_v8  ;;  %v4495_v11 = vsub.s32 2, %v4486_v8  ;;  %v4499_v15 = vsub.s32 0, %v4486_v8  ;;  %s4301_s2 = smov 96   ;;  %s5368_s6 = sld [smem:[#allocation11_spill]]  ;;  %vm865_vm5 = vcmask 648704  }
  0x38   : > { %vm890_vm6 = vcmask 779904   ;;  %vm915_vm7 = vcmask 911104   ;;  %vm939_vm8 = vcmask 392192   ;;  %vm725_vm9 = vcmask 523264   ;;  %s5370_s3 = sld [smem:[#allocation12_spill]]  ;;  %s5372_s0 = sld [smem:[#allocation14_spill]] }
  0x39   : > { %s720_s27 = scalar_lea.vmem %s5365_s1, %s3362_s26  ;;  %726 = vst.msk [vmem:[#allocation2 + $0x8] sm:$0xff] %vm725_vm9, %v4298_v6  ;;  %728 = vst.msk [vmem:[#allocation2 + $0x18] sm:$0xff] %vm725_vm9, %v4298_v6  ;;  %vm732_vm10 = vcmask 517120   ;;  %s5369_s1 = sld [smem:[#allocation13_spill]]  ;;  %vm1074_vm13 = vcmask 1040384   ;;  %vm1086_vm14 = vcmask 523265  }
  0x3a   : > { %v736_v2 = vld [vmem:[%s720_s27 + $0x10] sm:$0xff]  ;;  %v734_v3 = vld [vmem:[%s720_s27] sm:$0xff]  ;;  %v737_v4 = vld [vmem:[%s720_s27 + $0x18] sm:$0x3f]  ;;  %730 = vst.msk [vmem:[#allocation2 + $0x28] sm:$0xff] %vm725_vm9, %v4298_v6  ;;  %s5371_s26 = sld [smem:[#allocation15_spill]] }
  0x3b   : > { %752 = vperm.xlu1 %4253, %v736_v2   ;;  %742 = vperm.xlu0 %4252, %v734_v3   ;;  %v735_v5 = vld [vmem:[%s720_s27 + $0x8] sm:$0xff]  ;;  %v738_v10 = vld [vmem:[%s5366_s29] sm:$0x7]  ;;  %733 = vst.msk [vmem:[#allocation2 + $0x38] sm:$0x3] %vm732_vm10, %v4298_v6 }
  0x3c   : > { %v775_v12 = vrot.slane %v738_v10, %v4489_v9  ;;  %v803_v16 = vrot.slane %v738_v10, %v4495_v11  ;;  %v763_v21 = vrot.slane %v738_v10, %v4499_v15  ;;  %v3323_v45 = vld [vmem:[%s5367_s4] ss:$0 sm:$0xff] }
  0x3f   : > { %757 = vperm.xlu1 %4253, %v737_v4   ;;  %747 = vperm.xlu0 %4252, %v735_v5  }
  0xba   : > { %v753_v13 = vpop.permute.xlu1 %752  ;;  %v743_v14 = vpop.permute.xlu0 %742 }
  0xbb   : > { %v778_v17 = vmul.f32 %v775_v12, %v753_v13  ;;  %v776_v18 = vmul.f32 %v775_v12, %v743_v14  ;;  %v806_v22 = vmul.f32 %v803_v16, %v753_v13  ;;  %v804_v25 = vmul.f32 %v803_v16, %v743_v14 }
  0xbc   : > { %v766_v31 = vmul.f32 %v763_v21, %v753_v13  ;;  %v764_v36 = vmul.f32 %v763_v21, %v743_v14  ;;  %v838_v13 = vld [vmem:[%s5368_s6] sm:$0xff]  ;;  %v839_v14 = vld [vmem:[%s5368_s6 + $0x8] sm:$0xff] }
  0xbd   : > { %v788_v28 = vrot.slane %v778_v17, 1  ;;  %v785_v32 = vrot.slane %v776_v18, 1  ;;  %v816_v35 = vrot.slane %v806_v22, 2  ;;  %v813_v39 = vrot.slane %v804_v25, 2  ;;  %v841_v18 = vld [vmem:[%s5368_s6 + $0x18] sm:$0xff] }
  0xbe   : > { %v758_v19 = vpop.permute.xlu1 %757  ;;  %v748_v20 = vpop.permute.xlu0 %747  ;;  %v3789_v17 = vpack.c.bf16 %v839_v14, %v838_v13  ;;  %v1063_v13 = vld [vmem:[%s5369_s1 + $0x90] sm:$0xff]  ;;  %v1064_v14 = vld [vmem:[%s5369_s1 + $0x98] sm:$0xff] }
  0xbf   : > { %v779_v23 = vmul.f32 %v775_v12, %v758_v19  ;;  %v807_v24 = vmul.f32 %v803_v16, %v758_v19  ;;  %v777_v26 = vmul.f32 %v775_v12, %v748_v20  ;;  %v805_v27 = vmul.f32 %v803_v16, %v748_v20  ;;  %v840_v16 = vld [vmem:[%s5368_s6 + $0x10] sm:$0xff] }
  0xc0   : > { %v765_v38 = vmul.f32 %v763_v21, %v748_v20  ;;  %v767_v52 = vmul.f32 %v763_v21, %v758_v19  ;;  %v3793_v19 = vpack.c.bf16 %v841_v18, %v840_v16  ;;  %v842_v20 = vld [vmem:[%s5368_s6 + $0x20] sm:$0xff]  ;;  %v843_v21 = vld [vmem:[%s5368_s6 + $0x28] sm:$0xff]  ;;  %3790 = vmatprep.subr.bf16.mxu0 %v3789_v17  ;;  %v3829_v16 = vpack.c.bf16 %v1064_v14, %v1063_v13 }
  0xc1   : > { %v790_v29 = vrot.slane %v779_v23, 1  ;;  %v818_v30 = vrot.slane %v807_v24, 2  ;;  %v786_v33 = vrot.slane %v777_v26, 1  ;;  %v814_v34 = vrot.slane %v805_v27, 2  ;;  %3792 = vmatpush3.bf16.msra.mxu0 %v3789_v17  ;;  %v1065_v17 = vld [vmem:[%s5369_s1 + $0xa0] sm:$0xff]  ;;  %v1066_v18 = vld [vmem:[%s5369_s1 + $0xa8] sm:$0xff] }
  0xc2   : > { %v3797_v23 = vpack.c.bf16 %v843_v21, %v842_v20  ;;  %3794 = vmatprep.subr.bf16.mxu0 %v3793_v19  ;;  %v1067_v20 = vld [vmem:[%s5369_s1 + $0xb0] sm:$0xff]  ;;  %v1068_v21 = vld [vmem:[%s5369_s1 + $0xb8] sm:$0xff]  ;;  %v1252_v14 = vld [vmem:[%s5371_s26 + $0x20] sm:$0xff] }
  0xc3   : > { %v791_v37 = vsel %vm784_vm0, %v788_v28, %v790_v29  ;;  %v787_v41 = vsel %vm784_vm0, %v785_v32, %v786_v33  ;;  %v789_v42 = vsel %vm784_vm0, %v786_v33, %v788_v28  ;;  %v819_v43 = vsel %vm812_vm1, %v816_v35, %v818_v30 }
  0xc4   : > { %v798_v40 = vadd.f32 %v791_v37, %v766_v31  ;;  %v797_v44 = vadd.f32 %v789_v42, %v765_v38  ;;  %v796_v46 = vadd.f32 %v787_v41, %v764_v36  ;;  %v815_v48 = vsel %vm812_vm1, %v813_v39, %v814_v34 }
  0xc5   : > { %v817_v49 = vsel %vm812_vm1, %v814_v34, %v816_v35  ;;  %v799_v56 = vadd.f32 %v790_v29, %v767_v52  ;;  %3796 = vmatpush3.bf16.msra.mxu0 %v3793_v19  ;;  %v1050_v52 = vld [vmem:[%s5369_s1 + $0x28] sm:$0xff]  ;;  %v3832_v19 = vpack.c.bf16 %v1066_v18, %v1065_v17  ;;  %v1254_v18 = vld [vmem:[%s5371_s26 + $0x30] sm:$0xff] }
  0xc6   : > { %v826_v47 = vadd.f32 %v819_v43, %v798_v40  ;;  %v824_v50 = vadd.f32 %v815_v48, %v796_v46  ;;  %v825_v51 = vadd.f32 %v817_v49, %v797_v44  ;;  %3798 = vmatprep.subr.bf16.mxu0 %v3797_v23  ;;  %v1045_v44 = vld [vmem:[%s5369_s1] sm:$0xff]  ;;  %v1047_v46 = vld [vmem:[%s5369_s1 + $0x10] sm:$0xff]  ;;  %v1048_v49 = vld [vmem:[%s5369_s1 + $0x18] sm:$0xff] }
  0xc7   : > { %v827_v1 = vadd.f32 %v818_v30, %v799_v56 }
  0xc8   : > { %v836_v53 = vadd.f32 %v3323_v45, %v826_v47  ;;  %v834_v54 = vadd.f32 %v3323_v45, %v824_v50  ;;  %v835_v55 = vadd.f32 %v3323_v45, %v825_v51  ;;  %v4302_v47 = vmov 0.0|0.0   ;;  %v1049_v51 = vld [vmem:[%s5369_s1 + $0x20] sm:$0xff] }
  0xc9   : > { %v837_v4 = vadd.f32 %v3323_v45, %v827_v1  ;;  %3800 = vmatpush3.bf16.msra.mxu0 %v3797_v23  ;;  %v1046_v45 = vld [vmem:[%s5369_s1 + $0x8] sm:$0xff]  ;;  %3801 = vmatprep.subr.bf16.mxu1 %v4302_v47  ;;  %v3805_v50 = vpack.c.bf16 %v1048_v49, %v1047_v46  ;;  %v3324_v23 = vld [vmem:[%s5370_s3] ss:$0 sm:$0xff] }
  0xca   : > { %v870_v57 = vrot.slane %v836_v53, 1  ;;  %849 = vrot.lane.b32.xlu0 %v834_v54, %s4299_s30  ;;  %851 = vrot.lane.b32.xlu1 %v835_v55, %s4299_s30  ;;  %v868_v58 = vrot.slane %v835_v55, 1  ;;  %v867_v59 = vrot.slane %v834_v54, 1  ;;  %v893_v62 = vrot.slane %v835_v55, 2  ;;  %v1052_v55 = vld [vmem:[%s5369_s1 + $0x38] sm:$0xff] }
  0xcb   : > { %v895_v63 = vrot.slane %v836_v53, 2  ;;  %v892_v0 = vrot.slane %v834_v54, 2  ;;  %v872_v5 = vrot.slane %v837_v4, 1  ;;  %v897_v12 = vrot.slane %v837_v4, 2  ;;  %3837 = vmatprep.subr.bf16.mxu0 %v4302_v47  ;;  %v1051_v54 = vld [vmem:[%s5369_s1 + $0x30] sm:$0xff] }
  0xcc   : > { %v871_v60 = vsel %vm784_vm0, %v868_v58, %v870_v57  ;;  %v869_v61 = vsel %vm784_vm0, %v867_v59, %v868_v58  ;;  %v3802_v48 = vpack.c.bf16 %v1046_v45, %v1045_v44  ;;  %v3811_v56 = vpack.c.bf16 %v1052_v55, %v1051_v54  ;;  %v1054_v58 = vld [vmem:[%s5369_s1 + $0x48] sm:$0xff] }
  0xcd   : > { %v896_v2 = vsel %vm812_vm1, %v893_v62, %v895_v63  ;;  %v894_v3 = vsel %vm812_vm1, %v892_v0, %v893_v62  ;;  %v873_v10 = vsel %vm784_vm0, %v870_v57, %v872_v5  ;;  %v898_v22 = vsel %vm812_vm1, %v895_v63, %v897_v12  ;;  %v1053_v57 = vld [vmem:[%s5369_s1 + $0x40] sm:$0xff]  ;;  %v1058_v0 = vld [vmem:[%s5369_s1 + $0x68] sm:$0xff] }
  0xce   : > { %876 = vrot.lane.b32.xlu1 %v871_v60, %s4300_s5  ;;  %874 = vrot.lane.b32.xlu0 %v869_v61, %s4300_s5  ;;  %v3814_v59 = vpack.c.bf16 %v1054_v58, %v1053_v57  ;;  %v1055_v60 = vld [vmem:[%s5369_s1 + $0x50] sm:$0xff]  ;;  %v1056_v61 = vld [vmem:[%s5369_s1 + $0x58] sm:$0xff] }
  0xcf   : > { %3803 = vmatpush1.bf16.msra.mxu1 %v3802_v48  ;;  %v3817_v62 = vpack.c.bf16 %v1056_v61, %v1055_v60  ;;  %v1057_v63 = vld [vmem:[%s5369_s1 + $0x60] sm:$0xff] }
  0xd0   : > { %3804 = vmatprep.subr.bf16.mxu1 %v4302_v47  ;;  %v3820_v1 = vpack.c.bf16 %v1058_v0, %v1057_v63 }
  0xd2   : > { %901 = vrot.lane.b32.xlu1 %v896_v2, %s4301_s2  ;;  %899 = vrot.lane.b32.xlu0 %v894_v3, %s4301_s2  ;;  %v1059_v2 = vld [vmem:[%s5369_s1 + $0x70] sm:$0xff]  ;;  %v1060_v3 = vld [vmem:[%s5369_s1 + $0x78] sm:$0xff] }
  0xd3   : > { %3806 = vmatpush1.bf16.msra.mxu1 %v3805_v50 }
  0xd4   : > { %3807 = vmatprep.subr.bf16.mxu1 %v4302_v47 }
  0xd6   : > { %855 = vrot.lane.b32.xlu1 %v837_v4, %s4299_s30  ;;  %853 = vrot.lane.b32.xlu0 %v836_v53, %s4299_s30  ;;  %v3808_v53 = vpack.c.bf16 %v1050_v52, %v1049_v51  ;;  %v3823_v4 = vpack.c.bf16 %v1060_v3, %v1059_v2  ;;  %v1248_v3 = vld [vmem:[%s5371_s26] sm:$0xff] }
  0xd8   : > { %3809 = vmatpush1.bf16.msra.mxu1 %v3808_v53 }
  0xd9   : > { %3810 = vmatprep.subr.bf16.mxu1 %v4302_v47 }
  0xda   : > { %880 = vrot.lane.b32.xlu1 %v872_v5, %s4300_s5  ;;  %878 = vrot.lane.b32.xlu0 %v873_v10, %s4300_s5  ;;  %v1061_v5 = vld [vmem:[%s5369_s1 + $0x80] sm:$0xff]  ;;  %v1062_v10 = vld [vmem:[%s5369_s1 + $0x88] sm:$0xff] }
  0xdc   : > { %3812 = vmatpush1.bf16.msra.mxu1 %v3811_v56 }
  0xdd   : > { %3813 = vmatprep.subr.bf16.mxu1 %v4302_v47 }
  0xde   : > { %905 = vrot.lane.b32.xlu1 %v897_v12, %s4301_s2  ;;  %903 = vrot.lane.b32.xlu0 %v898_v22, %s4301_s2  ;;  %v3826_v12 = vpack.c.bf16 %v1062_v10, %v1061_v5  ;;  %v3835_v22 = vpack.c.bf16 %v1068_v21, %v1067_v20  ;;  %v1250_v5 = vld [vmem:[%s5371_s26 + $0x10] sm:$0xff]  ;;  %v1256_v21 = vld [vmem:[%s5371_s26 + $0x40] sm:$0xff] }
  0xe0   : > { %3815 = vmatpush1.bf16.msra.mxu1 %v3814_v59 }
  0xe1   : > { %3816 = vmatprep.subr.bf16.mxu1 %v4302_v47 }
  0xe4   : > { %3818 = vmatpush1.bf16.msra.mxu1 %v3817_v62 }
  0xe5   : > { %3819 = vmatprep.subr.bf16.mxu1 %v4302_v47 }
  0xe8   : > { %3821 = vmatpush1.bf16.msra.mxu1 %v3820_v1 }
  0xe9   : > { %3822 = vmatprep.subr.bf16.mxu1 %v4302_v47 }
  0xec   : > { %3824 = vmatpush1.bf16.msra.mxu1 %v3823_v4  ;;  %v1249_v4 = vld [vmem:[%s5371_s26 + $0x8] sm:$0xff] }
  0xed   : > { %3825 = vmatprep.subr.bf16.mxu1 %v4302_v47  ;;  %v3838_v10 = vpack.c.bf16 %v1249_v4, %v1248_v3 }
  0xf0   : > { %3827 = vmatpush1.bf16.msra.mxu1 %v3826_v12  ;;  %v1251_v12 = vld [vmem:[%s5371_s26 + $0x18] sm:$0xff] }
  0xf1   : > { %3828 = vmatprep.subr.bf16.mxu1 %v4302_v47  ;;  %v3841_v13 = vpack.c.bf16 %v1251_v12, %v1250_v5  ;;  %v1434_v12 = vld [vmem:[%s5332_s9] sm:$0xff] }
  0xf4   : > { %3830 = vmatpush1.bf16.msra.mxu1 %v3829_v16  ;;  %v1253_v16 = vld [vmem:[%s5371_s26 + $0x28] sm:$0xff] }
  0xf5   : > { %3831 = vmatprep.subr.bf16.mxu1 %v4302_v47  ;;  %v3844_v17 = vpack.c.bf16 %v1253_v16, %v1252_v14  ;;  %v1436_v14 = vld [vmem:[%s5332_s9 + $0x10] sm:$0xff] }
  0xf8   : > { %3833 = vmatpush1.bf16.msra.mxu1 %v3832_v19  ;;  %v1255_v19 = vld [vmem:[%s5371_s26 + $0x38] sm:$0xff] }
  0xf9   : > { %3834 = vmatprep.subr.bf16.mxu1 %v4302_v47  ;;  %v3847_v20 = vpack.c.bf16 %v1255_v19, %v1254_v18  ;;  %v1437_v19 = vld [vmem:[%s5332_s9 + $0x18] sm:$0xff] }
  0xfc   : > { %3836 = vmatpush1.bf16.msra.mxu1 %v3835_v22  ;;  %v1257_v22 = vld [vmem:[%s5371_s26 + $0x48] sm:$0xff] }
 0x13c   : > { %v850_v24 = vpop.permute.xlu0 %849  ;;  %v852_v25 = vpop.permute.xlu1 %851 }
 0x13d   : > { %862 = vst.msk [vmem:[#allocation2] sm:$0xff] %vm861_vm2, %v850_v24  ;;  %863 = vst.msk [vmem:[#allocation2 + $0x10] sm:$0xff] %vm861_vm2, %v852_v25 }
 0x140   : > { %v877_v26 = vpop.permute.xlu1 %876  ;;  %v875_v27 = vpop.permute.xlu0 %874 }
 0x141   : > { %888 = vst.msk [vmem:[#allocation2 + $0x10] sm:$0xff] %vm886_vm3, %v877_v26  ;;  %887 = vst.msk [vmem:[#allocation2] sm:$0xff] %vm886_vm3, %v875_v27 }
 0x144   : > { %v902_v28 = vpop.permute.xlu1 %901  ;;  %v900_v29 = vpop.permute.xlu0 %899 }
 0x145   : > { %913 = vst.msk [vmem:[#allocation2 + $0x10] sm:$0xff] %vm911_vm4, %v902_v28  ;;  %912 = vst.msk [vmem:[#allocation2] sm:$0xff] %vm911_vm4, %v900_v29 }
 0x148   : > { %v856_v30 = vpop.permute.xlu1 %855  ;;  %v854_v31 = vpop.permute.xlu0 %853 }
 0x149   : > { %866 = vst.msk [vmem:[#allocation2 + $0x30] sm:$0x3] %vm865_vm5, %v856_v30 }
 0x14a   : > { %864 = vst.msk [vmem:[#allocation2 + $0x20] sm:$0xff] %vm861_vm2, %v854_v31  ;;  %vm1123_vm2 = vcmask 516096  }
 0x14c   : > { %v881_v32 = vpop.permute.xlu1 %880  ;;  %v879_v33 = vpop.permute.xlu0 %878  ;;  %v918_v34 = vld [vmem:[#allocation2 + $0x10] sm:$0xff]  ;;  %v917_v35 = vld [vmem:[#allocation2] sm:$0xff] }
 0x14d   : > { %891 = vst.msk [vmem:[#allocation2 + $0x30] sm:$0x3] %vm890_vm6, %v881_v32  ;;  %933 = vrot.lane.b32.xlu1 %v918_v34, %s4299_s30  ;;  %931 = vrot.lane.b32.xlu0 %v917_v35, %s4299_s30 }
 0x14e   : > { %889 = vst.msk [vmem:[#allocation2 + $0x20] sm:$0xff] %vm886_vm3, %v879_v33  ;;  %vm1103_vm3 = vcmask 1048064  }
 0x150   : > { %v906_v36 = vpop.permute.xlu1 %905  ;;  %v904_v37 = vpop.permute.xlu0 %903 }
 0x151   : > { %916 = vst.msk [vmem:[#allocation2 + $0x30] sm:$0x3] %vm915_vm7, %v906_v36 }
 0x152   : > { %914 = vst.msk [vmem:[#allocation2 + $0x20] sm:$0xff] %vm911_vm4, %v904_v37  ;;  %vm1107_vm4 = vcmask 1041920  }
 0x158   : > { %v920_v38 = vld [vmem:[#allocation2 + $0x30] sm:$0x3] }
 0x159   : > { %v919_v39 = vld [vmem:[#allocation2 + $0x20] sm:$0xff]  ;;  %937 = vrot.lane.b32.xlu1 %v920_v38, %s4299_s30 }
 0x15a   : > { %935 = vrot.lane.b32.xlu0 %v919_v39, %s4299_s30 }
 0x1bf   : > { %v934_v40 = vpop.permute.xlu1 %933  ;;  %v932_v41 = vpop.permute.xlu0 %931 }
 0x1c0   : > { %3658 = vmatprep.mubr.msk.f32.mxu0 %vm939_vm8, %v932_v41 }
 0x1c1   : > { %3659 = vmatmul.mubr.msk.f32.vlgmr.msra.gmra.mrb[0].mxu0 %vm939_vm8, %v934_v40 }
 0x1c2   : > { %3839 = vmatpush1.bf16.msra.mxu0 %v3838_v10 }
 0x1c3   : > { %3840 = vmatprep.subr.bf16.mxu0 %v4302_v47 }
 0x1c6   : > { %3842 = vmatpush1.bf16.msra.mxu0 %v3841_v13  ;;  %v1435_v13 = vld [vmem:[%s5332_s9 + $0x8] sm:$0xff] }
 0x1c7   : > { %3843 = vmatprep.subr.bf16.mxu0 %v4302_v47  ;;  %v3873_v18 = vpack.c.bf16 %v1435_v13, %v1434_v12  ;;  %v1565_v12 = vld [vmem:[%s5334_s11 + $0x38] sm:$0xff] }
 0x1c9   : > { %3874 = vmatprep.subr.bf16.mxu1 %v3873_v18 }
 0x1ca   : > { %3845 = vmatpush1.bf16.msra.mxu0 %v3844_v17 }
 0x1cb   : > { %v938_v42 = vpop.permute.xlu1 %937  ;;  %3846 = vmatprep.subr.bf16.mxu0 %v4302_v47 }
 0x1cc   : > { %v936_v43 = vpop.permute.xlu0 %935 }
 0x1cd   : > { %3661 = vmatprep.mubr.msk.f32.mxu0 %vm939_vm8, %v936_v43 }
 0x1ce   : > { %3662 = vmatmul.mubr.msk.f32.gmra.mrb[2].mxu0 %vm939_vm8, %v938_v42 }
 0x1cf   : > { %3848 = vmatpush1.bf16.msra.mxu0 %v3847_v20 }
 0x1d0   : > { %3849 = vmatprep.subr.bf16.mxu0 %v4302_v47 }
 0x294   : > { %v3660_v24 = vpop.f32.mrb[0].mxu0 }
 0x295   : > { %v1020_v25 = vadd.f32 %v3660_v24, %v3324_v23  ;;  %v1014_v26 = vpop.f32.mrb[1].mxu0  ;;  %v1258_v24 = vld [vmem:[%s5371_s26 + $0x50] sm:$0xff] }
 0x296   : > { %v1015_v27 = vadd.f32 %v3324_v23, %v1014_v26 }
 0x297   : > { %v1038_v28 = vmul.f32 0.01, %v1020_v25  ;;  %vm1034_vm11 = vcmp.ge.f32.partialorder %v1020_v25, 0.0 }
 0x298   : > { %v1037_v29 = vmul.f32 0.01, %v1015_v27  ;;  %vm1033_vm12 = vcmp.ge.f32.partialorder %v1015_v27, 0.0 }
 0x299   : > { %v1042_v30 = vsel %vm1034_vm11, %v1020_v25, %v1038_v28  ;;  %v1259_v25 = vld [vmem:[%s5371_s26 + $0x58] sm:$0xff]  ;;  %v1261_v28 = vld [vmem:[%s5371_s26 + $0x68] sm:$0xff] }
 0x29a   : > { %1093 = vrot.lane.b32.xlu1 %v1042_v30, %s4299_s30  ;;  %v1076_v31 = vrot.slane %v1042_v30, 7  ;;  %v1110_v32 = vrot.slane %v1042_v30, 1  ;;  %v1041_v33 = vsel %vm1033_vm12, %v1015_v27, %v1037_v29  ;;  %v3853_v26 = vpack.c.bf16 %v1259_v25, %v1258_v24  ;;  %v1260_v27 = vld [vmem:[%s5371_s26 + $0x60] sm:$0xff]  ;;  %v1262_v30 = vld [vmem:[%s5371_s26 + $0x70] sm:$0xff] }
 0x29b   : > { %1091 = vrot.lane.b32.xlu0 %v1041_v33, %s4299_s30  ;;  %v1075_v34 = vrot.slane %v1041_v33, 7  ;;  %v1109_v35 = vrot.slane %v1041_v33, 1  ;;  %v3856_v29 = vpack.c.bf16 %v1261_v28, %v1260_v27  ;;  %v1264_v33 = vld [vmem:[%s5371_s26 + $0x80] sm:$0xff] }
 0x29d   : > { %v1077_v36 = vsel %vm1074_vm13, %v1075_v34, %v1076_v31  ;;  %1087 = vst.msk [vmem:[#allocation2] sm:$0xfe] %vm1086_vm14, %v1075_v34  ;;  %v1111_v37 = vsel %vm784_vm0, %v1109_v35, %v1110_v32  ;;  %v1265_v34 = vld [vmem:[%s5371_s26 + $0x88] sm:$0xff] }
 0x29e   : > { %1120 = vst.msk [vmem:[#allocation2 + $0x8] sm:$0xff] %vm725_vm9, %v1111_v37  ;;  %1088 = vst.msk [vmem:[#allocation2 + $0x10] sm:$0xff] %vm725_vm9, %v1077_v36  ;;  %v3862_v35 = vpack.c.bf16 %v1265_v34, %v1264_v33  ;;  %v1266_v36 = vld [vmem:[%s5371_s26 + $0x90] sm:$0xff]  ;;  %v1267_v37 = vld [vmem:[%s5371_s26 + $0x98] sm:$0xff] }
 0x2a1   : > { %v3663_v38 = vpop.f32.mrb[2].mxu0 }
 0x2a2   : > { %v1030_v39 = vadd.f32 %v3663_v38, %v3324_v23  ;;  %v1024_v40 = vpop.f32.mrb[3].mxu0  ;;  %v3865_v38 = vpack.c.bf16 %v1267_v37, %v1266_v36 }
 0x2a3   : > { %v1025_v41 = vadd.f32 %v3324_v23, %v1024_v40  ;;  %v3850_v23 = vpack.c.bf16 %v1257_v22, %v1256_v21  ;;  %v1269_v40 = vld [vmem:[%s5371_s26 + $0xa8] sm:$0xff]  ;;  %v3877_v21 = vpack.c.bf16 %v1437_v19, %v1436_v14  ;;  %v1438_v22 = vld [vmem:[%s5332_s9 + $0x20] sm:$0xff]  ;;  %v1569_v19 = vld [vmem:[%s5334_s11 + $0x58] sm:$0xff] }
 0x2a4   : > { %v1040_v42 = vmul.f32 0.01, %v1030_v39  ;;  %vm1036_vm15 = vcmp.ge.f32.partialorder %v1030_v39, 0.0  ;;  %v1566_v14 = vld [vmem:[%s5334_s11 + $0x40] sm:$0xff] }
 0x2a5   : > { %v1039_v43 = vmul.f32 0.01, %v1025_v41  ;;  %vm1035_vm1 = vcmp.ge.f32.partialorder %v1025_v41, 0.0  ;;  %v1126_v44 = vld [vmem:[#allocation2 + $0x8] sm:$0xff]  ;;  %3851 = vmatpush1.bf16.msra.mxu0 %v3850_v23 }
 0x2a6   : > { %v1044_v45 = vsel %vm1036_vm15, %v1030_v39, %v1040_v42  ;;  %3330 = vmatprep.mubr.msk.f32.mxu1 %vm725_vm9, %v1126_v44  ;;  %3852 = vmatprep.subr.bf16.mxu0 %v4302_v47  ;;  %v1268_v39 = vld [vmem:[%s5371_s26 + $0xa0] sm:$0xff]  ;;  %v1270_v42 = vld [vmem:[%s5371_s26 + $0xb0] sm:$0xff]  ;;  %v1439_v23 = vld [vmem:[%s5332_s9 + $0x28] sm:$0xff] }
 0x2a7   : > { %1097 = vrot.lane.b32.xlu1 %v1044_v45, %s4299_s30  ;;  %v1080_v46 = vrot.slane %v1044_v45, 7  ;;  %v1114_v48 = vrot.slane %v1044_v45, 1  ;;  %v1043_v49 = vsel %vm1035_vm1, %v1025_v41, %v1039_v43  ;;  %v3868_v41 = vpack.c.bf16 %v1269_v40, %v1268_v39  ;;  %v1271_v43 = vld [vmem:[%s5371_s26 + $0xb8] sm:$0xff]  ;;  %v3329_v45 = vld [vmem:[%s5372_s0] ss:$0 sm:$0xff]  ;;  %s723_s0 = scalar_lea.vmem %s5346_s23, %s5378_s25 }
 0x2a8   : > { %1095 = vrot.lane.b32.xlu0 %v1043_v49, %s4299_s30  ;;  %v1078_v50 = vrot.slane %v1043_v49, 7  ;;  %v1112_v51 = vrot.slane %v1043_v49, 1  ;;  %v3871_v44 = vpack.c.bf16 %v1271_v43, %v1270_v42 }
 0x2a9   : > { %1124 = vst.msk [vmem:[#allocation2 + $0x38] sm:$0x1] %vm1123_vm2, %v1114_v48  ;;  %3854 = vmatpush1.bf16.msra.mxu0 %v3853_v26 }
 0x2aa   : > { %v1079_v52 = vsel %vm1074_vm13, %v1076_v31, %v1078_v50  ;;  %v1081_v53 = vsel %vm1074_vm13, %v1078_v50, %v1080_v46  ;;  %v1113_v54 = vsel %vm784_vm0, %v1110_v32, %v1112_v51  ;;  %v1115_v55 = vsel %vm784_vm0, %v1112_v51, %v1114_v48  ;;  %3855 = vmatprep.subr.bf16.mxu0 %v4302_v47  ;;  %v1263_v31 = vld [vmem:[%s5371_s26 + $0x78] sm:$0xff] }
 0x2ab   : > { %1121 = vst.msk [vmem:[#allocation2 + $0x18] sm:$0xff] %vm725_vm9, %v1113_v54  ;;  %1122 = vst.msk [vmem:[#allocation2 + $0x28] sm:$0xff] %vm725_vm9, %v1115_v55  ;;  %v3859_v32 = vpack.c.bf16 %v1263_v31, %v1262_v30  ;;  %v3881_v30 = vpack.c.bf16 %v1439_v23, %v1438_v22  ;;  %v1571_v22 = vld [vmem:[%s5334_s11 + $0x68] sm:$0xff] }
 0x2ac   : > { %1089 = vst.msk [vmem:[#allocation2 + $0x20] sm:$0xff] %vm725_vm9, %v1079_v52 }
 0x2ad   : > { %1090 = vst.msk [vmem:[#allocation2 + $0x30] sm:$0x3] %vm732_vm10, %v1081_v53  ;;  %3857 = vmatpush1.bf16.msra.mxu0 %v3856_v29 }
 0x2ae   : > { %3858 = vmatprep.subr.bf16.mxu0 %v4302_v47 }
 0x2b0   : > { %v1132_v1 = vld [vmem:[#allocation2 + $0x38] sm:$0x3] }
 0x2b1   : > { %3860 = vmatpush1.bf16.msra.mxu0 %v3859_v32 }
 0x2b2   : > { %v1128_v59 = vld [vmem:[#allocation2 + $0x18] sm:$0xff]  ;;  %v1130_v63 = vld [vmem:[#allocation2 + $0x28] sm:$0xff]  ;;  %3861 = vmatprep.subr.bf16.mxu0 %v4302_v47 }
 0x2b5   : > { %3863 = vmatpush1.bf16.msra.mxu0 %v3862_v35 }
 0x2b6   : > { %3864 = vmatprep.subr.bf16.mxu0 %v4302_v47 }
 0x2b9   : > { %3866 = vmatpush1.bf16.msra.mxu0 %v3865_v38 }
 0x2ba   : > { %3867 = vmatprep.subr.bf16.mxu0 %v4302_v47 }
 0x2bd   : > { %3869 = vmatpush1.bf16.msra.mxu0 %v3868_v41 }
 0x2be   : > { %3870 = vmatprep.subr.bf16.mxu0 %v4302_v47 }
 0x2c1   : > { %3872 = vmatpush1.bf16.msra.mxu0 %v3871_v44  ;;  %v1440_v44 = vld [vmem:[%s5332_s9 + $0x30] sm:$0xff] }
 0x2c2   : > { %3889 = vmatprep.subr.bf16.mxu0 %v4302_v47 }
 0x30c   : > { %v1094_v56 = vpop.permute.xlu1 %1093 }
 0x30d   : > { %1105 = vst.msk [vmem:[#allocation2 + $0x10] sm:$0xff] %vm1103_vm3, %v1094_v56  ;;  %v1092_v57 = vpop.permute.xlu0 %1091 }
 0x30e   : > { %1104 = vst.msk [vmem:[#allocation2] sm:$0xff] %vm1103_vm3, %v1092_v57 }
 0x314   : > { %v1127_v62 = vld [vmem:[#allocation2 + $0x10] sm:$0xff] }
 0x315   : > { %v1125_v58 = vld [vmem:[#allocation2] sm:$0xff] }
 0x316   : > { %1216 = vmatmul.mubr.f32.vlgmr.msra.gmra.mrb[0].mxu1 %v1125_v58 }
 0x317   : > { %3331 = vmatprep.mubr.msk.f32.mxu1 %vm725_vm9, %v1128_v59  ;;  %3876 = vmatpush3.bf16.msra.mxu1 %v3873_v18  ;;  %v1568_v18 = vld [vmem:[%s5334_s11 + $0x50] sm:$0xff] }
 0x318   : > { %3878 = vmatprep.subr.bf16.mxu1 %v3877_v21 }
 0x319   : > { %v1098_v60 = vpop.permute.xlu1 %1097 }
 0x31a   : > { %1108 = vst.msk [vmem:[#allocation2 + $0x30] sm:$0x3] %vm1107_vm4, %v1098_v60  ;;  %v1096_v61 = vpop.permute.xlu0 %1095  ;;  %1221 = vmatmul.mubr.f32.gmra.mrb[2].mxu1 %v1127_v62 }
 0x31b   : > { %1106 = vst.msk [vmem:[#allocation2 + $0x20] sm:$0xff] %vm1103_vm3, %v1096_v61  ;;  %3332 = vmatprep.mubr.msk.f32.mxu1 %vm725_vm9, %v1130_v63  ;;  %3880 = vmatpush3.bf16.msra.mxu1 %v3877_v21  ;;  %v1570_v21 = vld [vmem:[%s5334_s11 + $0x60] sm:$0xff] }
 0x31c   : > { %3882 = vmatprep.subr.bf16.mxu1 %v3881_v30  ;;  %v3908_v23 = vpack.c.bf16 %v1571_v22, %v1570_v21 }
 0x31f   : > { %3884 = vmatpush3.bf16.msra.mxu1 %v3881_v30  ;;  %v1576_v30 = vld [vmem:[%s5334_s11 + $0x90] sm:$0xff] }
 0x321   : > { %v1131_v2 = vld [vmem:[#allocation2 + $0x30] sm:$0x3] }
 0x322   : > { %v1129_v0 = vld [vmem:[#allocation2 + $0x20] sm:$0xff] }
 0x323   : > { %1226 = vmatmul.mubr.f32.gmra.mrb[4].mxu1 %v1129_v0 }
 0x324   : > { %3333 = vmatprep.mubr.msk.f32.mxu1 %vm725_vm9, %v1132_v1 }
 0x327   : > { %1231 = vmatmul.mubr.f32.gmra.mrb[6].mxu1 %v1131_v2 }
 0x3e9   : > { %v1217_v46 = vpop.f32.mrb[0].mxu1 }
 0x3ea   : > { %v1218_v48 = vadd.f32 %v3329_v45, %v1217_v46  ;;  %v1219_v49 = vpop.f32.mrb[1].mxu1 }
 0x3ec   : > { %v1240_v50 = vmul.f32 0.01, %v1218_v48  ;;  %vm1236_vm5 = vcmp.ge.f32.partialorder %v1218_v48, 0.0 }
 0x3ed   : > { %v1222_v51 = vpop.f32.mrb[2].mxu1 }
 0x3ee   : > { %v1223_v52 = vadd.f32 %v3329_v45, %v1222_v51  ;;  %v1224_v53 = vpop.f32.mrb[3].mxu1  ;;  %v1244_v54 = vsel %vm1236_vm5, %v1218_v48, %v1240_v50  ;;  %v3334_v48 = vld [vmem:[%s5331_s8] ss:$0 sm:$0xff] }
 0x3ef   : > { %1292 = vrot.lane.b32.xlu0 %v1244_v54, %s4299_s30  ;;  %v1277_v55 = vrot.slane %v1244_v54, 7  ;;  %v1308_v58 = vrot.slane %v1244_v54, 1 }
 0x3f0   : > { %v1241_v56 = vmul.f32 0.01, %v1223_v52  ;;  %vm1237_vm6 = vcmp.ge.f32.partialorder %v1223_v52, 0.0 }
 0x3f1   : > { %1288 = vst.msk [vmem:[#allocation2] sm:$0xfe] %vm1086_vm14, %v1277_v55 }
 0x3f2   : > { %v1245_v57 = vsel %vm1237_vm6, %v1223_v52, %v1241_v56 }
 0x3f3   : > { %1294 = vrot.lane.b32.xlu1 %v1245_v57, %s4299_s30  ;;  %v1278_v59 = vrot.slane %v1245_v57, 7  ;;  %v1309_v60 = vrot.slane %v1245_v57, 1 }
 0x3f5   : > { %v1279_v61 = vsel %vm1074_vm13, %v1277_v55, %v1278_v59  ;;  %v1310_v62 = vsel %vm784_vm0, %v1308_v58, %v1309_v60 }
 0x3f6   : > { %v1227_v63 = vpop.f32.mrb[4].mxu1  ;;  %1319 = vst.msk [vmem:[#allocation2 + $0x8] sm:$0xff] %vm725_vm9, %v1310_v62  ;;  %1289 = vst.msk [vmem:[#allocation2 + $0x10] sm:$0xff] %vm725_vm9, %v1279_v61  ;;  %v1558_v61 = vld [vmem:[%s5334_s11] sm:$0xff]  ;;  %v1559_v62 = vld [vmem:[%s5334_s11 + $0x8] sm:$0xff] }
 0x3f7   : > { %v1228_v0 = vadd.f32 %v3329_v45, %v1227_v63  ;;  %v1229_v1 = vpop.f32.mrb[5].mxu1  ;;  %v1560_v63 = vld [vmem:[%s5334_s11 + $0x10] sm:$0xff] }
 0x3f8   : > { %v1561_v1 = vld [vmem:[%s5334_s11 + $0x18] sm:$0xff] }
 0x3f9   : > { %v1242_v2 = vmul.f32 0.01, %v1228_v0  ;;  %vm1238_vm7 = vcmp.ge.f32.partialorder %v1228_v0, 0.0 }
 0x3fa   : > { %v1232_v3 = vpop.f32.mrb[6].mxu1 }
 0x3fb   : > { %v1233_v4 = vadd.f32 %v3329_v45, %v1232_v3  ;;  %v1234_v5 = vpop.f32.mrb[7].mxu1  ;;  %v1246_v10 = vsel %vm1238_vm7, %v1228_v0, %v1242_v2  ;;  %v1441_v45 = vld [vmem:[%s5332_s9 + $0x38] sm:$0xff]  ;;  %v3890_v0 = vpack.c.bf16 %v1559_v62, %v1558_v61  ;;  %v3893_v2 = vpack.c.bf16 %v1561_v1, %v1560_v63  ;;  %v1562_v3 = vld [vmem:[%s5334_s11 + $0x20] sm:$0xff] }
 0x3fc   : > { %1296 = vrot.lane.b32.xlu0 %v1246_v10, %s4299_s30  ;;  %v1280_v16 = vrot.slane %v1246_v10, 7  ;;  %v1311_v17 = vrot.slane %v1246_v10, 1  ;;  %v3885_v46 = vpack.c.bf16 %v1441_v45, %v1440_v44  ;;  %v1564_v10 = vld [vmem:[%s5334_s11 + $0x30] sm:$0xff] }
 0x3fd   : > { %v1243_v20 = vmul.f32 0.01, %v1233_v4  ;;  %vm1239_vm8 = vcmp.ge.f32.partialorder %v1233_v4, 0.0  ;;  %v1324_v26 = vld [vmem:[#allocation2 + $0x8] sm:$0xff]  ;;  %v3899_v13 = vpack.c.bf16 %v1565_v12, %v1564_v10 }
 0x3fe   : > { %v1281_v24 = vsel %vm1074_vm13, %v1278_v59, %v1280_v16  ;;  %v1312_v25 = vsel %vm784_vm0, %v1309_v60, %v1311_v17  ;;  %3335 = vmatprep.mubr.msk.f32.mxu0 %vm725_vm9, %v1324_v26  ;;  %3886 = vmatprep.subr.bf16.mxu1 %v3885_v46 }
 0x3ff   : > { %1320 = vst.msk [vmem:[#allocation2 + $0x18] sm:$0xff] %vm725_vm9, %v1312_v25  ;;  %1290 = vst.msk [vmem:[#allocation2 + $0x20] sm:$0xff] %vm725_vm9, %v1281_v24  ;;  %v1247_v27 = vsel %vm1239_vm8, %v1233_v4, %v1243_v20  ;;  %3888 = vmatpush3.bf16.msra.mxu1 %v3885_v46  ;;  %v1563_v4 = vld [vmem:[%s5334_s11 + $0x28] sm:$0xff]  ;;  %v3905_v20 = vpack.c.bf16 %v1569_v19, %v1568_v18  ;;  %v1572_v24 = vld [vmem:[%s5334_s11 + $0x70] sm:$0xff] }
 0x400   : > { %1298 = vrot.lane.b32.xlu1 %v1247_v27, %s4299_s30  ;;  %v1282_v28 = vrot.slane %v1247_v27, 7  ;;  %v1313_v29 = vrot.slane %v1247_v27, 1  ;;  %3925 = vmatprep.subr.bf16.mxu1 %v4302_v47  ;;  %v3896_v5 = vpack.c.bf16 %v1563_v4, %v1562_v3  ;;  %v1573_v25 = vld [vmem:[%s5334_s11 + $0x78] sm:$0xff]  ;;  %v1574_v27 = vld [vmem:[%s5334_s11 + $0x80] sm:$0xff] }
 0x401   : > { %v3911_v26 = vpack.c.bf16 %v1573_v25, %v1572_v24  ;;  %v1756_v25 = vld [vmem:[%s5336_s13] sm:$0xff] }
 0x402   : > { %v1283_v31 = vsel %vm1074_vm13, %v1280_v16, %v1282_v28  ;;  %v1314_v32 = vsel %vm784_vm0, %v1311_v17, %v1313_v29  ;;  %1322 = vst.msk [vmem:[#allocation2 + $0x38] sm:$0x1] %vm1123_vm2, %v1313_v29  ;;  %v1567_v16 = vld [vmem:[%s5334_s11 + $0x48] sm:$0xff] }
 0x403   : > { %1321 = vst.msk [vmem:[#allocation2 + $0x28] sm:$0xff] %vm725_vm9, %v1314_v32  ;;  %v3902_v17 = vpack.c.bf16 %v1567_v16, %v1566_v14  ;;  %v1575_v28 = vld [vmem:[%s5334_s11 + $0x88] sm:$0xff] }
 0x404   : > { %1291 = vst.msk [vmem:[#allocation2 + $0x30] sm:$0x3] %vm732_vm10, %v1283_v31  ;;  %v3914_v29 = vpack.c.bf16 %v1575_v28, %v1574_v27  ;;  %v1577_v31 = vld [vmem:[%s5334_s11 + $0x98] sm:$0xff]  ;;  %v1758_v27 = vld [vmem:[%s5336_s13 + $0x10] sm:$0xff] }
 0x405   : > { %v3917_v32 = vpack.c.bf16 %v1577_v31, %v1576_v30  ;;  %v1760_v31 = vld [vmem:[%s5336_s13 + $0x20] sm:$0xff] }
 0x406   : > { %v1326_v36 = vld [vmem:[#allocation2 + $0x18] sm:$0xff] }
 0x409   : > { %v1330_v42 = vld [vmem:[#allocation2 + $0x38] sm:$0x3] }
 0x40a   : > { %v1328_v39 = vld [vmem:[#allocation2 + $0x28] sm:$0xff] }
 0x461   : > { %v1293_v33 = vpop.permute.xlu0 %1292 }
 0x462   : > { %1304 = vst.msk [vmem:[#allocation2] sm:$0xff] %vm1103_vm3, %v1293_v33  ;;  %v1578_v33 = vld [vmem:[%s5334_s11 + $0xa0] sm:$0xff] }
 0x465   : > { %v1295_v34 = vpop.permute.xlu1 %1294 }
 0x466   : > { %1305 = vst.msk [vmem:[#allocation2 + $0x10] sm:$0xff] %vm1103_vm3, %v1295_v34  ;;  %v1579_v34 = vld [vmem:[%s5334_s11 + $0xa8] sm:$0xff] }
 0x469   : > { %v1323_v35 = vld [vmem:[#allocation2] sm:$0xff] }
 0x46a   : > { %1414 = vmatmul.mubr.f32.vlgmr.msra.gmra.mrb[4].mxu0 %v1323_v35  ;;  %v3920_v35 = vpack.c.bf16 %v1579_v34, %v1578_v33  ;;  %v1762_v34 = vld [vmem:[%s5336_s13 + $0x30] sm:$0xff] }
 0x46b   : > { %3336 = vmatprep.mubr.msk.f32.mxu0 %vm725_vm9, %v1326_v36  ;;  %3891 = vmatpush1.bf16.msra.mxu0 %v3890_v0  ;;  %v1580_v36 = vld [vmem:[%s5334_s11 + $0xb0] sm:$0xff] }
 0x46c   : > { %3892 = vmatprep.subr.bf16.mxu0 %v4302_v47 }
 0x46d   : > { %v1325_v38 = vld [vmem:[#allocation2 + $0x10] sm:$0xff] }
 0x46e   : > { %v1297_v37 = vpop.permute.xlu0 %1296  ;;  %1419 = vmatmul.mubr.f32.gmra.mrb[6].mxu0 %v1325_v38 }
 0x46f   : > { %1306 = vst.msk [vmem:[#allocation2 + $0x20] sm:$0xff] %vm1103_vm3, %v1297_v37  ;;  %3337 = vmatprep.mubr.msk.f32.mxu0 %vm725_vm9, %v1328_v39  ;;  %3894 = vmatpush1.bf16.msra.mxu0 %v3893_v2  ;;  %v1581_v37 = vld [vmem:[%s5334_s11 + $0xb8] sm:$0xff]  ;;  %v3339_v39 = vld [vmem:[%s5333_s10] ss:$0 sm:$0xff] }
 0x470   : > { %3895 = vmatprep.subr.bf16.mxu0 %v4302_v47  ;;  %v3923_v38 = vpack.c.bf16 %v1581_v37, %v1580_v36  ;;  %v1764_v37 = vld [vmem:[%s5336_s13 + $0x40] sm:$0xff] }
 0x472   : > { %v1299_v40 = vpop.permute.xlu1 %1298 }
 0x473   : > { %1307 = vst.msk [vmem:[#allocation2 + $0x30] sm:$0x3] %vm1107_vm4, %v1299_v40  ;;  %3897 = vmatpush1.bf16.msra.mxu0 %v3896_v5 }
 0x474   : > { %3898 = vmatprep.subr.bf16.mxu0 %v4302_v47 }
 0x476   : > { %v1327_v41 = vld [vmem:[#allocation2 + $0x20] sm:$0xff] }
 0x477   : > { %1424 = vmatmul.mubr.f32.gmra.mrb[8].mxu0 %v1327_v41 }
 0x478   : > { %3338 = vmatprep.mubr.msk.f32.mxu0 %vm725_vm9, %v1330_v42  ;;  %3900 = vmatpush1.bf16.msra.mxu0 %v3899_v13 }
 0x479   : > { %3901 = vmatprep.subr.bf16.mxu0 %v4302_v47 }
 0x47a   : > { %v1329_v43 = vld [vmem:[#allocation2 + $0x30] sm:$0x3] }
 0x47b   : > { %1429 = vmatmul.mubr.f32.gmra.mrb[10].mxu0 %v1329_v43 }
 0x47c   : > { %3903 = vmatpush1.bf16.msra.mxu0 %v3902_v17 }
 0x47d   : > { %3904 = vmatprep.subr.bf16.mxu0 %v4302_v47 }
 0x480   : > { %3906 = vmatpush1.bf16.msra.mxu0 %v3905_v20 }
 0x481   : > { %3907 = vmatprep.subr.bf16.mxu0 %v4302_v47 }
 0x484   : > { %3909 = vmatpush1.bf16.msra.mxu0 %v3908_v23 }
 0x485   : > { %3910 = vmatprep.subr.bf16.mxu0 %v4302_v47 }
 0x488   : > { %3912 = vmatpush1.bf16.msra.mxu0 %v3911_v26  ;;  %v1757_v26 = vld [vmem:[%s5336_s13 + $0x8] sm:$0xff] }
 0x489   : > { %3913 = vmatprep.subr.bf16.mxu0 %v4302_v47  ;;  %v3926_v28 = vpack.c.bf16 %v1757_v26, %v1756_v25 }
 0x48c   : > { %3915 = vmatpush1.bf16.msra.mxu0 %v3914_v29  ;;  %v1759_v29 = vld [vmem:[%s5336_s13 + $0x18] sm:$0xff] }
 0x48d   : > { %3916 = vmatprep.subr.bf16.mxu0 %v4302_v47  ;;  %v3929_v30 = vpack.c.bf16 %v1759_v29, %v1758_v27  ;;  %v1942_v29 = vld [vmem:[%s5338_s15] sm:$0xff] }
 0x490   : > { %3918 = vmatpush1.bf16.msra.mxu0 %v3917_v32  ;;  %v1761_v32 = vld [vmem:[%s5336_s13 + $0x28] sm:$0xff] }
 0x491   : > { %3919 = vmatprep.subr.bf16.mxu0 %v4302_v47  ;;  %v3932_v33 = vpack.c.bf16 %v1761_v32, %v1760_v31  ;;  %v1944_v31 = vld [vmem:[%s5338_s15 + $0x10] sm:$0xff] }
 0x494   : > { %3921 = vmatpush1.bf16.msra.mxu0 %v3920_v35  ;;  %v1763_v35 = vld [vmem:[%s5336_s13 + $0x38] sm:$0xff] }
 0x495   : > { %3922 = vmatprep.subr.bf16.mxu0 %v4302_v47  ;;  %v3935_v36 = vpack.c.bf16 %v1763_v35, %v1762_v34  ;;  %v1945_v35 = vld [vmem:[%s5338_s15 + $0x18] sm:$0xff] }
 0x498   : > { %3924 = vmatpush1.bf16.msra.mxu0 %v3923_v38  ;;  %v1765_v38 = vld [vmem:[%s5336_s13 + $0x48] sm:$0xff] }
 0x53d   : > { %v1415_v49 = vpop.f32.mrb[4].mxu0 }
 0x53e   : > { %v1416_v50 = vadd.f32 %v3334_v48, %v1415_v49  ;;  %v1417_v51 = vpop.f32.mrb[5].mxu0 }
 0x540   : > { %3680 = vmatprep.mubr.msk.f32.mxu1 %vm725_vm9, %v1416_v50 }
 0x541   : > { %v1420_v52 = vpop.f32.mrb[6].mxu0 }
 0x542   : > { %v1421_v53 = vadd.f32 %v3334_v48, %v1420_v52  ;;  %v1422_v54 = vpop.f32.mrb[7].mxu0 }
 0x544   : > { %3681 = vmatmul.mubr.msk.f32.vlgmr.msra.gmra.mrb[8].mxu1 %vm725_vm9, %v1421_v53 }
 0x545   : > { %3927 = vmatpush1.bf16.msra.mxu1 %v3926_v28 }
 0x546   : > { %3928 = vmatprep.subr.bf16.mxu1 %v4302_v47 }
 0x549   : > { %3930 = vmatpush1.bf16.msra.mxu1 %v3929_v30  ;;  %v1943_v30 = vld [vmem:[%s5338_s15 + $0x8] sm:$0xff] }
 0x54a   : > { %v1425_v55 = vpop.f32.mrb[8].mxu0  ;;  %3931 = vmatprep.subr.bf16.mxu1 %v4302_v47  ;;  %v3961_v34 = vpack.c.bf16 %v1943_v30, %v1942_v29  ;;  %v2348_v29 = vld [vmem:[#allocation5 + $0x108] sm:$0xff]  ;;  %v2333_v30 = vld [vmem:[#allocation5 + $0x90] sm:$0xff] }
 0x54b   : > { %v1426_v56 = vadd.f32 %v3334_v48, %v1425_v55  ;;  %v1427_v57 = vpop.f32.mrb[9].mxu0 }
 0x54c   : > { %3962 = vmatprep.subr.bf16.mxu0 %v3961_v34 }
 0x54d   : > { %3683 = vmatprep.mubr.msk.f32.mxu1 %vm725_vm9, %v1426_v56  ;;  %3933 = vmatpush1.bf16.msra.mxu1 %v3932_v33 }
 0x54e   : > { %v1430_v58 = vpop.f32.mrb[10].mxu0  ;;  %3934 = vmatprep.subr.bf16.mxu1 %v4302_v47 }
 0x54f   : > { %v1431_v59 = vadd.f32 %v3334_v48, %v1430_v58  ;;  %v1432_v60 = vpop.f32.mrb[11].mxu0 }
 0x551   : > { %3684 = vmatmul.mubr.msk.f32.gmra.mrb[10].mxu1 %vm725_vm9, %v1431_v59 }
 0x552   : > { %3936 = vmatpush1.bf16.msra.mxu1 %v3935_v36 }
 0x553   : > { %3937 = vmatprep.subr.bf16.mxu1 %v4302_v47 }
 0x617   : > { %v3682_v40 = vpop.f32.mrb[8].mxu1 }
 0x618   : > { %v1533_v41 = vadd.f32 %v3682_v40, %v3339_v39  ;;  %v1527_v42 = vpop.f32.mrb[9].mxu1  ;;  %v1766_v40 = vld [vmem:[%s5336_s13 + $0x50] sm:$0xff] }
 0x619   : > { %v1528_v43 = vadd.f32 %v3339_v39, %v1527_v42 }
 0x61a   : > { %v1551_v44 = vmul.f32 0.01, %v1533_v41  ;;  %vm1547_vm11 = vcmp.ge.f32.partialorder %v1533_v41, 0.0 }
 0x61b   : > { %v1550_v45 = vmul.f32 0.01, %v1528_v43  ;;  %vm1546_vm12 = vcmp.ge.f32.partialorder %v1528_v43, 0.0 }
 0x61c   : > { %v1555_v46 = vsel %vm1547_vm11, %v1533_v41, %v1551_v44  ;;  %v1767_v41 = vld [vmem:[%s5336_s13 + $0x58] sm:$0xff]  ;;  %v1769_v44 = vld [vmem:[%s5336_s13 + $0x68] sm:$0xff]  ;;  %vm4304_vm11 = vmmov 0  }
 0x61d   : > { %1604 = vrot.lane.b32.xlu1 %v1555_v46, %s4299_s30  ;;  %v1588_v48 = vrot.slane %v1555_v46, 7  ;;  %v1619_v49 = vrot.slane %v1555_v46, 1  ;;  %v1554_v50 = vsel %vm1546_vm12, %v1528_v43, %v1550_v45  ;;  %v3941_v42 = vpack.c.bf16 %v1767_v41, %v1766_v40  ;;  %v1768_v43 = vld [vmem:[%s5336_s13 + $0x60] sm:$0xff]  ;;  %v1770_v46 = vld [vmem:[%s5336_s13 + $0x70] sm:$0xff] }
 0x61e   : > { %1602 = vrot.lane.b32.xlu0 %v1554_v50, %s4299_s30  ;;  %v1587_v51 = vrot.slane %v1554_v50, 7  ;;  %v1618_v52 = vrot.slane %v1554_v50, 1  ;;  %v3944_v45 = vpack.c.bf16 %v1769_v44, %v1768_v43  ;;  %v1772_v50 = vld [vmem:[%s5336_s13 + $0x80] sm:$0xff] }
 0x620   : > { %v1589_v53 = vsel %vm1074_vm13, %v1587_v51, %v1588_v48  ;;  %1598 = vst.msk [vmem:[#allocation2] sm:$0xfe] %vm1086_vm14, %v1587_v51  ;;  %v1620_v54 = vsel %vm784_vm0, %v1618_v52, %v1619_v49  ;;  %v1773_v51 = vld [vmem:[%s5336_s13 + $0x88] sm:$0xff] }
 0x621   : > { %1629 = vst.msk [vmem:[#allocation2 + $0x8] sm:$0xff] %vm725_vm9, %v1620_v54  ;;  %1599 = vst.msk [vmem:[#allocation2 + $0x10] sm:$0xff] %vm725_vm9, %v1589_v53  ;;  %v3950_v52 = vpack.c.bf16 %v1773_v51, %v1772_v50  ;;  %v1774_v53 = vld [vmem:[%s5336_s13 + $0x90] sm:$0xff]  ;;  %v1775_v54 = vld [vmem:[%s5336_s13 + $0x98] sm:$0xff] }
 0x624   : > { %v3685_v55 = vpop.f32.mrb[10].mxu1 }
 0x625   : > { %v1543_v56 = vadd.f32 %v3685_v55, %v3339_v39  ;;  %v1537_v57 = vpop.f32.mrb[11].mxu1  ;;  %v3953_v55 = vpack.c.bf16 %v1775_v54, %v1774_v53 }
 0x626   : > { %v1538_v58 = vadd.f32 %v3339_v39, %v1537_v57  ;;  %v3938_v39 = vpack.c.bf16 %v1765_v38, %v1764_v37  ;;  %v1777_v57 = vld [vmem:[%s5336_s13 + $0xa8] sm:$0xff]  ;;  %v3965_v37 = vpack.c.bf16 %v1945_v35, %v1944_v31  ;;  %v1946_v38 = vld [vmem:[%s5338_s15 + $0x20] sm:$0xff] }
 0x627   : > { %v1553_v59 = vmul.f32 0.01, %v1543_v56  ;;  %vm1549_vm15 = vcmp.ge.f32.partialorder %v1543_v56, 0.0 }
 0x628   : > { %v1552_v60 = vmul.f32 0.01, %v1538_v58  ;;  %vm1548_vm1 = vcmp.ge.f32.partialorder %v1538_v58, 0.0  ;;  %v1634_v61 = vld [vmem:[#allocation2 + $0x8] sm:$0xff]  ;;  %3939 = vmatpush1.bf16.msra.mxu1 %v3938_v39 }
 0x629   : > { %v1557_v62 = vsel %vm1549_vm15, %v1543_v56, %v1553_v59  ;;  %3345 = vmatprep.mubr.msk.f32.mxu0 %vm725_vm9, %v1634_v61  ;;  %3940 = vmatprep.subr.bf16.mxu1 %v4302_v47  ;;  %v1776_v56 = vld [vmem:[%s5336_s13 + $0xa0] sm:$0xff]  ;;  %v1778_v59 = vld [vmem:[%s5336_s13 + $0xb0] sm:$0xff]  ;;  %v1947_v39 = vld [vmem:[%s5338_s15 + $0x28] sm:$0xff] }
 0x62a   : > { %1608 = vrot.lane.b32.xlu1 %v1557_v62, %s4299_s30  ;;  %v1592_v63 = vrot.slane %v1557_v62, 7  ;;  %v1623_v0 = vrot.slane %v1557_v62, 1  ;;  %v1556_v1 = vsel %vm1548_vm1, %v1538_v58, %v1552_v60  ;;  %v3956_v58 = vpack.c.bf16 %v1777_v57, %v1776_v56  ;;  %v1779_v60 = vld [vmem:[%s5336_s13 + $0xb8] sm:$0xff]  ;;  %v3344_v62 = vld [vmem:[%s5335_s12] ss:$0 sm:$0xff] }
 0x62b   : > { %1606 = vrot.lane.b32.xlu0 %v1556_v1, %s4299_s30  ;;  %v1590_v2 = vrot.slane %v1556_v1, 7  ;;  %v1621_v3 = vrot.slane %v1556_v1, 1  ;;  %v3959_v61 = vpack.c.bf16 %v1779_v60, %v1778_v59  ;;  %vm3179_vm1 = vcmask 261120  }
 0x62c   : > { %1632 = vst.msk [vmem:[#allocation2 + $0x38] sm:$0x1] %vm1123_vm2, %v1623_v0  ;;  %3942 = vmatpush1.bf16.msra.mxu1 %v3941_v42 }
 0x62d   : > { %v1591_v4 = vsel %vm1074_vm13, %v1588_v48, %v1590_v2  ;;  %v1593_v5 = vsel %vm1074_vm13, %v1590_v2, %v1592_v63  ;;  %v1622_v10 = vsel %vm784_vm0, %v1619_v49, %v1621_v3  ;;  %v1624_v12 = vsel %vm784_vm0, %v1621_v3, %v1623_v0  ;;  %3943 = vmatprep.subr.bf16.mxu1 %v4302_v47  ;;  %v1771_v48 = vld [vmem:[%s5336_s13 + $0x78] sm:$0xff] }
 0x62e   : > { %1601 = vst.msk [vmem:[#allocation2 + $0x30] sm:$0x3] %vm732_vm10, %v1593_v5  ;;  %v3947_v49 = vpack.c.bf16 %v1771_v48, %v1770_v46  ;;  %v3969_v46 = vpack.c.bf16 %v1947_v39, %v1946_v38  ;;  %v2318_v38 = vld [vmem:[#allocation5 + $0x18] sm:$0xff]  ;;  %v2349_v39 = vld [vmem:[#allocation5 + $0x110] sm:$0xff] }
 0x62f   : > { %1630 = vst.msk [vmem:[#allocation2 + $0x18] sm:$0xff] %vm725_vm9, %v1622_v10  ;;  %1631 = vst.msk [vmem:[#allocation2 + $0x28] sm:$0xff] %vm725_vm9, %v1624_v12 }
 0x630   : > { %1600 = vst.msk [vmem:[#allocation2 + $0x20] sm:$0xff] %vm725_vm9, %v1591_v4  ;;  %3945 = vmatpush1.bf16.msra.mxu1 %v3944_v45 }
 0x631   : > { %3946 = vmatprep.subr.bf16.mxu1 %v4302_v47 }
 0x633   : > { %v1640_v23 = vld [vmem:[#allocation2 + $0x38] sm:$0x3] }
 0x634   : > { %3948 = vmatpush1.bf16.msra.mxu1 %v3947_v49 }
 0x635   : > { %3949 = vmatprep.subr.bf16.mxu1 %v4302_v47 }
 0x636   : > { %v1636_v17 = vld [vmem:[#allocation2 + $0x18] sm:$0xff]  ;;  %v1638_v21 = vld [vmem:[#allocation2 + $0x28] sm:$0xff] }
 0x638   : > { %3951 = vmatpush1.bf16.msra.mxu1 %v3950_v52 }
 0x639   : > { %3952 = vmatprep.subr.bf16.mxu1 %v4302_v47 }
 0x63c   : > { %3954 = vmatpush1.bf16.msra.mxu1 %v3953_v55 }
 0x63d   : > { %3955 = vmatprep.subr.bf16.mxu1 %v4302_v47 }
 0x640   : > { %3957 = vmatpush1.bf16.msra.mxu1 %v3956_v58 }
 0x641   : > { %3958 = vmatprep.subr.bf16.mxu1 %v4302_v47 }
 0x644   : > { %3960 = vmatpush1.bf16.msra.mxu1 %v3959_v61  ;;  %v1948_v61 = vld [vmem:[%s5338_s15 + $0x30] sm:$0xff] }
 0x68f   : > { %v1605_v13 = vpop.permute.xlu1 %1604 }
 0x690   : > { %1615 = vst.msk [vmem:[#allocation2 + $0x10] sm:$0xff] %vm1103_vm3, %v1605_v13  ;;  %v1603_v14 = vpop.permute.xlu0 %1602 }
 0x691   : > { %1614 = vst.msk [vmem:[#allocation2] sm:$0xff] %vm1103_vm3, %v1603_v14 }
 0x697   : > { %v1635_v20 = vld [vmem:[#allocation2 + $0x10] sm:$0xff] }
 0x698   : > { %v1633_v16 = vld [vmem:[#allocation2] sm:$0xff] }
 0x699   : > { %1724 = vmatmul.mubr.f32.vlgmr.msra.gmra.mrb[12].mxu0 %v1633_v16 }
 0x69a   : > { %3346 = vmatprep.mubr.msk.f32.mxu0 %vm725_vm9, %v1636_v17  ;;  %3964 = vmatpush3.bf16.msra.mxu0 %v3961_v34  ;;  %v2366_v34 = vld [vmem:[#allocation5 + $0x198] sm:$0xff] }
 0x69b   : > { %3966 = vmatprep.subr.bf16.mxu0 %v3965_v37 }
 0x69c   : > { %v1609_v18 = vpop.permute.xlu1 %1608 }
 0x69d   : > { %1617 = vst.msk [vmem:[#allocation2 + $0x30] sm:$0x3] %vm1107_vm4, %v1609_v18  ;;  %v1607_v19 = vpop.permute.xlu0 %1606  ;;  %1729 = vmatmul.mubr.f32.gmra.mrb[14].mxu0 %v1635_v20 }
 0x69e   : > { %1616 = vst.msk [vmem:[#allocation2 + $0x20] sm:$0xff] %vm1103_vm3, %v1607_v19  ;;  %3347 = vmatprep.mubr.msk.f32.mxu0 %vm725_vm9, %v1638_v21  ;;  %3968 = vmatpush3.bf16.msra.mxu0 %v3965_v37  ;;  %v2317_v37 = vld [vmem:[#allocation5 + $0x10] sm:$0xff] }
 0x69f   : > { %3970 = vmatprep.subr.bf16.mxu0 %v3969_v46 }
 0x6a2   : > { %3972 = vmatpush3.bf16.msra.mxu0 %v3969_v46  ;;  %v2335_v46 = vld [vmem:[#allocation5 + $0xa0] sm:$0xff] }
 0x6a4   : > { %v1639_v24 = vld [vmem:[#allocation2 + $0x30] sm:$0x3] }
 0x6a5   : > { %v1637_v22 = vld [vmem:[#allocation2 + $0x20] sm:$0xff] }
 0x6a6   : > { %1734 = vmatmul.mubr.f32.gmra.mrb[16].mxu0 %v1637_v22 }
 0x6a7   : > { %3348 = vmatprep.mubr.msk.f32.mxu0 %vm725_vm9, %v1640_v23 }
 0x6aa   : > { %1739 = vmatmul.mubr.f32.gmra.mrb[18].mxu0 %v1639_v24 }
 0x76c   : > { %v1725_v63 = vpop.f32.mrb[12].mxu0 }
 0x76d   : > { %v1726_v0 = vadd.f32 %v3344_v62, %v1725_v63  ;;  %v1727_v1 = vpop.f32.mrb[13].mxu0 }
 0x76f   : > { %v1748_v2 = vmul.f32 0.01, %v1726_v0  ;;  %vm1744_vm5 = vcmp.ge.f32.partialorder %v1726_v0, 0.0 }
 0x770   : > { %v1730_v3 = vpop.f32.mrb[14].mxu0 }
 0x771   : > { %v1731_v4 = vadd.f32 %v3344_v62, %v1730_v3  ;;  %v1732_v5 = vpop.f32.mrb[15].mxu0  ;;  %v1752_v10 = vsel %vm1744_vm5, %v1726_v0, %v1748_v2  ;;  %v3349_v0 = vld [vmem:[%s5337_s14] ss:$0 sm:$0xff]  ;;  %vm3253_vm5 = vcmask 0  }
 0x772   : > { %1800 = vrot.lane.b32.xlu0 %v1752_v10, %s4299_s30  ;;  %v1785_v12 = vrot.slane %v1752_v10, 7  ;;  %v1816_v16 = vrot.slane %v1752_v10, 1 }
 0x773   : > { %v1749_v13 = vmul.f32 0.01, %v1731_v4  ;;  %vm1745_vm6 = vcmp.ge.f32.partialorder %v1731_v4, 0.0 }
 0x774   : > { %1796 = vst.msk [vmem:[#allocation2] sm:$0xfe] %vm1086_vm14, %v1785_v12 }
 0x775   : > { %v1753_v14 = vsel %vm1745_vm6, %v1731_v4, %v1749_v13 }
 0x776   : > { %1802 = vrot.lane.b32.xlu1 %v1753_v14, %s4299_s30  ;;  %v1786_v17 = vrot.slane %v1753_v14, 7  ;;  %v1817_v18 = vrot.slane %v1753_v14, 1 }
 0x778   : > { %v1787_v19 = vsel %vm1074_vm13, %v1785_v12, %v1786_v17  ;;  %v1818_v20 = vsel %vm784_vm0, %v1816_v16, %v1817_v18 }
 0x779   : > { %v1735_v21 = vpop.f32.mrb[16].mxu0  ;;  %1827 = vst.msk [vmem:[#allocation2 + $0x8] sm:$0xff] %vm725_vm9, %v1818_v20  ;;  %1797 = vst.msk [vmem:[#allocation2 + $0x10] sm:$0xff] %vm725_vm9, %v1787_v19  ;;  %v2331_v19 = vld [vmem:[#allocation5 + $0x80] sm:$0xff]  ;;  %v2332_v20 = vld [vmem:[#allocation5 + $0x88] sm:$0xff] }
 0x77a   : > { %v1736_v22 = vadd.f32 %v3344_v62, %v1735_v21  ;;  %v1737_v23 = vpop.f32.mrb[17].mxu0  ;;  %v2363_v21 = vld [vmem:[#allocation5 + $0x180] sm:$0xff] }
 0x77b   : > { %v2364_v23 = vld [vmem:[#allocation5 + $0x188] sm:$0xff] }
 0x77c   : > { %v1750_v24 = vmul.f32 0.01, %v1736_v22  ;;  %vm1746_vm7 = vcmp.ge.f32.partialorder %v1736_v22, 0.0 }
 0x77d   : > { %v1740_v25 = vpop.f32.mrb[18].mxu0 }
 0x77e   : > { %v1741_v26 = vadd.f32 %v3344_v62, %v1740_v25  ;;  %v1742_v27 = vpop.f32.mrb[19].mxu0  ;;  %v1754_v28 = vsel %vm1746_vm7, %v1736_v22, %v1750_v24  ;;  %v1949_v62 = vld [vmem:[%s5338_s15 + $0x38] sm:$0xff]  ;;  %v3977_v22 = vpack.c.bf16 %v2332_v20, %v2331_v19  ;;  %v2315_v24 = vld [vmem:[#allocation5] sm:$0xff]  ;;  %v2354_v19 = vld [vmem:[#allocation5 + $0x138] sm:$0xff] }
 0x77f   : > { %1804 = vrot.lane.b32.xlu0 %v1754_v28, %s4299_s30  ;;  %v1788_v32 = vrot.slane %v1754_v28, 7  ;;  %v1819_v33 = vrot.slane %v1754_v28, 1  ;;  %v3973_v63 = vpack.c.bf16 %v1949_v62, %v1948_v61  ;;  %v2316_v25 = vld [vmem:[#allocation5 + $0x8] sm:$0xff]  ;;  %v2347_v28 = vld [vmem:[#allocation5 + $0x100] sm:$0xff] }
 0x780   : > { %v1751_v36 = vmul.f32 0.01, %v1741_v26  ;;  %vm1747_vm14 = vcmp.ge.f32.partialorder %v1741_v26, 0.0  ;;  %v1832_v42 = vld [vmem:[#allocation2 + $0x8] sm:$0xff]  ;;  %v3979_v27 = vpack.c.bf16 %v2316_v25, %v2315_v24  ;;  %3978 = vmatprep.subr.bf16.mxu1 %v3977_v22  ;;  %v4011_v31 = vpack.c.bf16 %v2348_v29, %v2347_v28  ;;  %v2340_v24 = vld [vmem:[#allocation5 + $0xc8] sm:$0xff] }
 0x781   : > { %v1789_v40 = vsel %vm1074_vm13, %v1786_v17, %v1788_v32  ;;  %v1820_v41 = vsel %vm784_vm0, %v1817_v18, %v1819_v33  ;;  %3350 = vmatprep.mubr.msk.f32.mxu1 %vm725_vm9, %v1832_v42  ;;  %3974 = vmatprep.subr.bf16.mxu0 %v3973_v63  ;;  %v2371_v25 = vld [vmem:[#allocation5 + $0x1c0] sm:$0xff] }
 0x782   : > { %1828 = vst.msk [vmem:[#allocation2 + $0x18] sm:$0xff] %vm725_vm9, %v1820_v41  ;;  %1798 = vst.msk [vmem:[#allocation2 + $0x20] sm:$0xff] %vm725_vm9, %v1789_v40  ;;  %v1755_v43 = vsel %vm1747_vm14, %v1741_v26, %v1751_v36  ;;  %3976 = vmatpush3.bf16.msra.mxu0 %v3973_v63  ;;  %v4009_v26 = vpack.c.bf16 %v2364_v23, %v2363_v21  ;;  %v3983_v40 = vpack.c.bf16 %v2318_v38, %v2317_v37  ;;  %v2350_v41 = vld [vmem:[#allocation5 + $0x118] sm:$0xff]  ;;  %v2337_v63 = vld [vmem:[#allocation5 + $0xb0] sm:$0xff] }
 0x783   : > { %1806 = vrot.lane.b32.xlu1 %v1755_v43, %s4299_s30  ;;  %v1790_v44 = vrot.slane %v1755_v43, 7  ;;  %v1821_v45 = vrot.slane %v1755_v43, 1  ;;  %v4015_v42 = vpack.c.bf16 %v2350_v41, %v2349_v39  ;;  %v4303_v43 = vmov 1966171168   ;;  %v2339_v23 = vld [vmem:[#allocation5 + $0xc0] sm:$0xff]  ;;  %v2356_v38 = vld [vmem:[#allocation5 + $0x148] sm:$0xff] }
 0x784   : > { %4010 = vmatprep.subr.bf16.mxu0 %v4009_v26  ;;  %v3993_v29 = vpack.c.bf16 %v2340_v24, %v2339_v23  ;;  %v2355_v37 = vld [vmem:[#allocation5 + $0x140] sm:$0xff] }
 0x785   : > { %v1791_v48 = vsel %vm1074_vm13, %v1788_v32, %v1790_v44  ;;  %v1822_v49 = vsel %vm784_vm0, %v1819_v33, %v1821_v45  ;;  %1830 = vst.msk [vmem:[#allocation2 + $0x38] sm:$0x1] %vm1123_vm2, %v1821_v45  ;;  %v2334_v32 = vld [vmem:[#allocation5 + $0x98] sm:$0xff]  ;;  %v2365_v33 = vld [vmem:[#allocation5 + $0x190] sm:$0xff]  ;;  %v2073_v44 = vunpack.c.l.s4 %v4303_v43  ;;  %vm5085_vm0 = vcmp.lt.s32.totalorder %v760_v7, 64  ;;  %v2375_v23 = vld [vmem:[#allocation5 + $0x1e0] sm:$0xff] }
 0x786   : > { %1799 = vst.msk [vmem:[#allocation2 + $0x30] sm:$0x3] %vm732_vm10, %v1791_v48  ;;  %v3981_v35 = vpack.c.bf16 %v2334_v32, %v2333_v30  ;;  %v4013_v36 = vpack.c.bf16 %v2366_v34, %v2365_v33  ;;  %v5078_v45 = vld [vmem:[%s5339_s16] ss:$0 sm:$0xff]  ;;  %v2336_v48 = vld [vmem:[#allocation5 + $0xa8] sm:$0xff] }
 0x787   : > { %1829 = vst.msk [vmem:[#allocation2 + $0x28] sm:$0xff] %vm725_vm9, %v1822_v49  ;;  %v2367_v49 = vld [vmem:[#allocation5 + $0x1a0] sm:$0xff]  ;;  %v2372_v30 = vld [vmem:[#allocation5 + $0x1c8] sm:$0xff] }
 0x788   : > { %v2324_v32 = vld [vmem:[#allocation5 + $0x48] sm:$0xff] }
 0x789   : > { %v1834_v53 = vld [vmem:[#allocation2 + $0x18] sm:$0xff] }
 0x78c   : > { %v1838_v59 = vld [vmem:[#allocation2 + $0x38] sm:$0x3] }
 0x78e   : > { %v1836_v56 = vld [vmem:[#allocation2 + $0x28] sm:$0xff] }
 0x7e4   : > { %v1801_v50 = vpop.permute.xlu0 %1800 }
 0x7e5   : > { %1812 = vst.msk [vmem:[#allocation2] sm:$0xff] %vm1103_vm3, %v1801_v50  ;;  %v2074_v50 = vunpack.c.0.s8 %v2073_v44 }
 0x7e8   : > { %v1803_v51 = vpop.permute.xlu1 %1802 }
 0x7e9   : > { %1813 = vst.msk [vmem:[#allocation2 + $0x10] sm:$0xff] %vm1103_vm3, %v1803_v51  ;;  %v3985_v51 = vpack.c.bf16 %v2336_v48, %v2335_v46  ;;  %v2341_v48 = vld [vmem:[#allocation5 + $0xd0] sm:$0xff] }
 0x7ec   : > { %v1831_v52 = vld [vmem:[#allocation2] sm:$0xff] }
 0x7ed   : > { %1922 = vmatmul.mubr.f32.vlgmr.msra.gmra.mrb[12].mxu1 %v1831_v52  ;;  %v2368_v52 = vld [vmem:[#allocation5 + $0x1a8] sm:$0xff] }
 0x7ee   : > { %3351 = vmatprep.mubr.msk.f32.mxu1 %vm725_vm9, %v1834_v53  ;;  %3980 = vmatpush3.bf16.msra.mxu1 %v3979_v27  ;;  %v2319_v53 = vld [vmem:[#allocation5 + $0x20] sm:$0xff] }
 0x7ef   : > { %3982 = vmatprep.subr.bf16.mxu1 %v3981_v35  ;;  %v4025_v35 = vpack.c.bf16 %v2372_v30, %v2371_v25 }
 0x7f0   : > { %v1833_v55 = vld [vmem:[#allocation2 + $0x10] sm:$0xff] }
 0x7f1   : > { %v1805_v54 = vpop.permute.xlu0 %1804  ;;  %1927 = vmatmul.mubr.f32.gmra.mrb[14].mxu1 %v1833_v55  ;;  %v4017_v55 = vpack.c.bf16 %v2368_v52, %v2367_v49  ;;  %v2342_v49 = vld [vmem:[#allocation5 + $0xd8] sm:$0xff] }
 0x7f2   : > { %1814 = vst.msk [vmem:[#allocation2 + $0x20] sm:$0xff] %vm1103_vm3, %v1805_v54  ;;  %3352 = vmatprep.mubr.msk.f32.mxu1 %vm725_vm9, %v1836_v56  ;;  %3984 = vmatpush3.bf16.msra.mxu1 %v3983_v40  ;;  %v2320_v54 = vld [vmem:[#allocation5 + $0x28] sm:$0xff]  ;;  %vm2097_vm3 = vcmp.ge.s32.totalorder %v760_v7, 64 }
 0x7f3   : > { %v3987_v56 = vpack.c.bf16 %v2320_v54, %v2319_v53  ;;  %3986 = vmatprep.subr.bf16.mxu1 %v3985_v51  ;;  %v2374_v54 = vld [vmem:[#allocation5 + $0x1d8] sm:$0xff] }
 0x7f5   : > { %v1807_v57 = vpop.permute.xlu1 %1806 }
 0x7f6   : > { %1815 = vst.msk [vmem:[#allocation2 + $0x30] sm:$0x3] %vm1107_vm4, %v1807_v57  ;;  %v2351_v57 = vld [vmem:[#allocation5 + $0x120] sm:$0xff]  ;;  %3988 = vmatpush3.bf16.msra.mxu1 %v3987_v56  ;;  %vm2098_vm4 = vcmp.lt.s32.totalorder %v760_v7, 128 }
 0x7f7   : > { %vm5160_vm8 = vmand %vm2097_vm3, %vm2098_vm4 }
 0x7f9   : > { %v1835_v58 = vld [vmem:[#allocation2 + $0x20] sm:$0xff] }
 0x7fa   : > { %1932 = vmatmul.mubr.f32.gmra.mrb[16].mxu1 %v1835_v58  ;;  %v2352_v58 = vld [vmem:[#allocation5 + $0x128] sm:$0xff] }
 0x7fb   : > { %3353 = vmatprep.mubr.msk.f32.mxu1 %vm725_vm9, %v1838_v59 }
 0x7fd   : > { %v1837_v60 = vld [vmem:[#allocation2 + $0x30] sm:$0x3] }
 0x7fe   : > { %1937 = vmatmul.mubr.f32.gmra.mrb[18].mxu1 %v1837_v60  ;;  %v4019_v60 = vpack.c.bf16 %v2352_v58, %v2351_v57 }
 0x8c0   : > { %v1923_v1 = vpop.f32.mrb[12].mxu1 }
 0x8c1   : > { %v1924_v2 = vadd.f32 %v3349_v0, %v1923_v1  ;;  %v1925_v3 = vpop.f32.mrb[13].mxu1  ;;  %v2369_v1 = vld [vmem:[#allocation5 + $0x1b0] sm:$0xff] }
 0x8c2   : > { %v2385_v3 = vld [vmem:[#allocation5 + $0x230] sm:$0xff] }
 0x8c3   : > { %3702 = vmatprep.mubr.msk.f32.mxu0 %vm725_vm9, %v1924_v2  ;;  %v5082_v2 = vsub.s32 %v2074_v50, %v4486_v8  ;;  %v2373_v50 = vld [vmem:[#allocation5 + $0x1d0] sm:$0xff] }
 0x8c4   : > { %v1928_v4 = vpop.f32.mrb[14].mxu1 }
 0x8c5   : > { %v1929_v5 = vadd.f32 %v3349_v0, %v1928_v4  ;;  %v1930_v10 = vpop.f32.mrb[15].mxu1 }
 0x8c6   : > { %v2370_v10 = vld [vmem:[#allocation5 + $0x1b8] sm:$0xff] }
 0x8c7   : > { %3703 = vmatmul.mubr.msk.f32.vlgmr.msra.gmra.mrb[20].mxu0 %vm725_vm9, %v1929_v5 }
 0x8c8   : > { %4012 = vmatpush3.bf16.msra.mxu0 %v4011_v31  ;;  %v2323_v31 = vld [vmem:[#allocation5 + $0x40] sm:$0xff] }
 0x8c9   : > { %4014 = vmatprep.subr.bf16.mxu0 %v4013_v36  ;;  %v3995_v36 = vpack.c.bf16 %v2324_v32, %v2323_v31  ;;  %v2359_v32 = vld [vmem:[#allocation5 + $0x160] sm:$0xff] }
 0x8cc   : > { %4016 = vmatpush3.bf16.msra.mxu0 %v4015_v42  ;;  %v4027_v42 = vpack.c.bf16 %v2356_v38, %v2355_v37 }
 0x8cd   : > { %v1933_v12 = vpop.f32.mrb[16].mxu1  ;;  %4018 = vmatprep.subr.bf16.mxu0 %v4017_v55 }
 0x8ce   : > { %v1934_v13 = vadd.f32 %v3349_v0, %v1933_v12  ;;  %v1935_v14 = vpop.f32.mrb[17].mxu1  ;;  %v2321_v12 = vld [vmem:[#allocation5 + $0x30] sm:$0xff] }
 0x8d0   : > { %3705 = vmatprep.mubr.msk.f32.mxu0 %vm725_vm9, %v1934_v13  ;;  %4020 = vmatpush3.bf16.msra.mxu0 %v4019_v60  ;;  %v2322_v13 = vld [vmem:[#allocation5 + $0x38] sm:$0xff] }
 0x8d1   : > { %v1938_v16 = vpop.f32.mrb[18].mxu1  ;;  %v2326_v60 = vld [vmem:[#allocation5 + $0x58] sm:$0xff] }
 0x8d2   : > { %v1939_v17 = vadd.f32 %v3349_v0, %v1938_v16  ;;  %v1940_v18 = vpop.f32.mrb[19].mxu1  ;;  %v2338_v0 = vld [vmem:[#allocation5 + $0xb8] sm:$0xff]  ;;  %v4021_v16 = vpack.c.bf16 %v2370_v10, %v2369_v1  ;;  %v2357_v1 = vld [vmem:[#allocation5 + $0x150] sm:$0xff] }
 0x8d3   : > { %v3989_v5 = vpack.c.bf16 %v2338_v0, %v2337_v63  ;;  %v2353_v18 = vld [vmem:[#allocation5 + $0x130] sm:$0xff]  ;;  %v3997_v63 = vpack.c.bf16 %v2342_v49, %v2341_v48  ;;  %v4029_v0 = vpack.c.bf16 %v2374_v54, %v2373_v50  ;;  %v2330_v48 = vld [vmem:[#allocation5 + $0x78] sm:$0xff] }
 0x8d4   : > { %3706 = vmatmul.mubr.msk.f32.gmra.mrb[22].mxu0 %vm725_vm9, %v1939_v17  ;;  %v3991_v17 = vpack.c.bf16 %v2322_v13, %v2321_v12  ;;  %v4023_v21 = vpack.c.bf16 %v2354_v19, %v2353_v18  ;;  %4022 = vmatprep.subr.bf16.mxu0 %v4021_v16  ;;  %v2362_v54 = vld [vmem:[#allocation5 + $0x178] sm:$0xff] }
 0x8d5   : > { %3990 = vmatprep.subr.bf16.mxu1 %v3989_v5 }
 0x8d6   : > { %3992 = vmatpush3.bf16.msra.mxu1 %v3991_v17  ;;  %4024 = vmatpush3.bf16.msra.mxu0 %v4023_v21  ;;  %v2343_v21 = vld [vmem:[#allocation5 + $0xe0] sm:$0xff] }
 0x8d7   : > { %3994 = vmatprep.subr.bf16.mxu1 %v3993_v29  ;;  %4026 = vmatprep.subr.bf16.mxu0 %v4025_v35 }
 0x8da   : > { %3996 = vmatpush3.bf16.msra.mxu1 %v3995_v36  ;;  %4028 = vmatpush3.bf16.msra.mxu0 %v4027_v42 }
 0x8db   : > { %3998 = vmatprep.subr.bf16.mxu1 %v3997_v63  ;;  %4030 = vmatprep.subr.bf16.mxu0 %v4029_v0 }
 0x99a   : > { %v3704_v59 = vpop.f32.mrb[20].mxu0 }
 0x99b   : > { %v2041_v61 = vadd.f32 %v3704_v59, %v5078_v45  ;;  %v2035_v62 = vpop.f32.mrb[21].mxu0  ;;  %v2325_v59 = vld [vmem:[#allocation5 + $0x50] sm:$0xff] }
 0x99c   : > { %v2036_v4 = vadd.f32 %v5078_v45, %v2035_v62  ;;  %v3999_v17 = vpack.c.bf16 %v2326_v60, %v2325_v59  ;;  %v2395_v60 = vld [vmem:[#allocation5 + $0x280] sm:$0xff] }
 0x99d   : > { %vm2055_vm9 = vcmp.ge.f32.partialorder %v2041_v61, 0.0  ;;  %v2059_v14 = vmul.f32 0.01, %v2041_v61 }
 0x99e   : > { %vm2054_vm10 = vcmp.ge.f32.partialorder %v2036_v4, 0.0  ;;  %v2058_v20 = vmul.f32 0.01, %v2036_v4  ;;  %4000 = vmatpush3.bf16.msra.mxu1 %v3999_v17 }
 0x99f   : > { %v2063_v22 = vsel %vm2055_vm9, %v2041_v61, %v2059_v14 }
 0x9a0   : > { %2146 = vst.msk [vmem:[#allocation3 + $0x4] sm:$0x1] %vm5085_vm0, %v2063_v22  ;;  %v2154_v26 = vrot.slane %v2063_v22, %v5082_v2  ;;  %v2182_v27 = vcombine.high %v2063_v22, %v2063_v22  ;;  %v2062_v28 = vsel %vm2054_vm10, %v2036_v4, %v2058_v20  ;;  %v2358_v4 = vld [vmem:[#allocation5 + $0x158] sm:$0xff]  ;;  %v2344_v22 = vld [vmem:[#allocation5 + $0xe8] sm:$0xff] }
 0x9a1   : > { %2070 = vst.msk [vmem:[#allocation3] sm:$0x1] %vm5085_vm0, %v2062_v28  ;;  %v2078_v33 = vrot.slane %v2062_v28, %v5082_v2  ;;  %v2109_v34 = vcombine.high %v2062_v28, %v2062_v28  ;;  %v4031_v20 = vpack.c.bf16 %v2358_v4, %v2357_v1  ;;  %v4001_v25 = vpack.c.bf16 %v2344_v22, %v2343_v21  ;;  %v2328_v28 = vld [vmem:[#allocation5 + $0x68] sm:$0xff] }
 0x9a2   : > { %v2162_v39 = vrot.slane %v2154_v26, %v5082_v2  ;;  %v2155_v40 = vcombine.high %v2154_v26, %v2154_v26  ;;  %v5098_v41 = vrot.slane %v2182_v27, %v5082_v2  ;;  %v2376_v26 = vld [vmem:[#allocation5 + $0x1e8] sm:$0xff]  ;;  %v2327_v27 = vld [vmem:[#allocation5 + $0x60] sm:$0xff] }
 0x9a3   : > { %v2086_v43 = vrot.slane %v2078_v33, %v5082_v2  ;;  %v2079_v44 = vcombine.high %v2078_v33, %v2078_v33  ;;  %v2116_v46 = vrot.slane %v2109_v34, %v5082_v2  ;;  %4032 = vmatpush3.bf16.msra.mxu0 %v4031_v20  ;;  %v4033_v30 = vpack.c.bf16 %v2376_v26, %v2375_v23  ;;  %v2360_v33 = vld [vmem:[#allocation5 + $0x168] sm:$0xff]  ;;  %v2379_v26 = vld [vmem:[#allocation5 + $0x200] sm:$0xff] }
 0x9a4   : > { %v2174_v51 = vcombine.high %v2162_v39, %v2162_v39  ;;  %v2169_v52 = vrot.slane %v2155_v40, %v5082_v2  ;;  %v2196_v53 = vrot.slane %v5098_v41, %v5082_v2  ;;  %v2199_v12 = vcombine.high %v5098_v41, %v5098_v41  ;;  %4002 = vmatprep.subr.bf16.mxu1 %v4001_v25  ;;  %v2345_v39 = vld [vmem:[#allocation5 + $0xf0] sm:$0xff]  ;;  %v2346_v40 = vld [vmem:[#allocation5 + $0xf8] sm:$0xff]  ;;  %v2428_v4 = vld [vmem:[#allocation5 + $0x388] sm:$0xff] }
 0x9a5   : > { %v2101_v55 = vcombine.high %v2086_v43, %v2086_v43  ;;  %v2093_v56 = vrot.slane %v2079_v44, %v5082_v2  ;;  %v2123_v57 = vrot.slane %v2116_v46, %v5082_v2  ;;  %v2126_v58 = vcombine.high %v2116_v46, %v2116_v46  ;;  %4034 = vmatprep.subr.bf16.mxu0 %v4033_v30  ;;  %v2377_v41 = vld [vmem:[#allocation5 + $0x1f0] sm:$0xff]  ;;  %v2378_v44 = vld [vmem:[#allocation5 + $0x1f8] sm:$0xff]  ;;  %v2412_v30 = vld [vmem:[#allocation5 + $0x308] sm:$0xff] }
 0x9a6   : > { %2176 = vst.msk [vmem:[#allocation3 + $0x5] sm:$0x1] %vm5085_vm0, %v2174_v51  ;;  %2170 = vrot.lane.b32.xlu0 %v2169_v52, %s4299_s30  ;;  %v2177_v62 = vcombine.high %v2169_v52, %v2169_v52  ;;  %2198 = vst.msk [vmem:[#allocation3 + $0x6] sm:$0x1] %vm5085_vm0, %v2196_v53  ;;  %v4003_v31 = vpack.c.bf16 %v2328_v28, %v2327_v27  ;;  %v4035_v35 = vpack.c.bf16 %v2360_v33, %v2359_v32  ;;  %v2329_v46 = vld [vmem:[#allocation5 + $0x70] sm:$0xff]  ;;  %v2380_v28 = vld [vmem:[#allocation5 + $0x208] sm:$0xff] }
 0x9a7   : > { %v3707_v61 = vpop.f32.mrb[22].mxu0  ;;  %2103 = vst.msk [vmem:[#allocation3 + $0x1] sm:$0x1] %vm5085_vm0, %v2101_v55  ;;  %2125 = vst.msk [vmem:[#allocation3 + $0x2] sm:$0x1] %vm5085_vm0, %v2123_v57  ;;  %v2138_v13 = vcombine.high %v2123_v57, %v2123_v57  ;;  %v2104_v16 = vcombine.high %v2093_v56, %v2093_v56  ;;  %v2133_v19 = vrot.slane %v2126_v58, %v5082_v2  ;;  %v2540_v27 = vsub.s32 3, %v4486_v8 }
 0x9a8   : > { %v2051_v5 = vadd.f32 %v3707_v61, %v5078_v45  ;;  %v2045_v10 = vpop.f32.mrb[23].mxu0  ;;  %2178 = vrot.lane.b32.xlu1 %v2177_v62, %s4299_s30  ;;  %v2206_v38 = vrot.slane %v2199_v12, %v5082_v2  ;;  %4004 = vmatpush3.bf16.msra.mxu1 %v4003_v31  ;;  %v4005_v43 = vpack.c.bf16 %v2346_v40, %v2345_v39  ;;  %v2396_v61 = vld [vmem:[#allocation5 + $0x288] sm:$0xff]  ;;  %v2427_v62 = vld [vmem:[#allocation5 + $0x380] sm:$0xff]  ;;  %v2397_v32 = vld [vmem:[#allocation5 + $0x290] sm:$0xff]  ;;  %v2556_v39 = vsub.s32 7, %v4486_v8 }
 0x9a9   : > { %v2046_v14 = vadd.f32 %v5078_v45, %v2045_v10  ;;  %2140 = vst.msk [vmem:[#allocation3 + $0x3] sm:$0x1] %vm5085_vm0, %v2138_v13  ;;  %v2211_v45 = vcombine.high %v2196_v53, %v2196_v53  ;;  %v2141_v42 = vcombine.high %v2133_v19, %v2133_v19  ;;  %4036 = vmatpush3.bf16.msra.mxu0 %v4035_v35  ;;  %v2361_v53 = vld [vmem:[#allocation5 + $0x170] sm:$0xff]  ;;  %v2398_v33 = vld [vmem:[#allocation5 + $0x298] sm:$0xff] }
 0x9aa   : > { %vm2057_vm13 = vcmp.ge.f32.partialorder %v2051_v5, 0.0  ;;  %v2061_v18 = vmul.f32 0.01, %v2051_v5  ;;  %2094 = vrot.lane.b32.xlu0 %v2093_v56, %s4299_s30  ;;  %v4037_v52 = vpack.c.bf16 %v2378_v44, %v2377_v41  ;;  %4006 = vmatprep.subr.bf16.mxu1 %v4005_v43  ;;  %v4007_v55 = vpack.c.bf16 %v2330_v48, %v2329_v46  ;;  %v2429_v40 = vld [vmem:[#allocation5 + $0x390] sm:$0xff]  ;;  %v2430_v41 = vld [vmem:[#allocation5 + $0x398] sm:$0xff] }
 0x9ab   : > { %vm2056_vm2 = vcmp.ge.f32.partialorder %v2046_v14, 0.0  ;;  %v2060_v24 = vmul.f32 0.01, %v2046_v14  ;;  %2213 = vst.msk [vmem:[#allocation3 + $0x7] sm:$0x1] %vm5085_vm0, %v2211_v45  ;;  %v4039_v56 = vpack.c.bf16 %v2362_v54, %v2361_v53  ;;  %v2214_v58 = vcombine.high %v2206_v38, %v2206_v38  ;;  %v2381_v48 = vld [vmem:[#allocation5 + $0x210] sm:$0xff] }
 0x9ac   : > { %v2065_v29 = vsel %vm2057_vm13, %v2051_v5, %v2061_v18  ;;  %2105 = vrot.lane.b32.xlu1 %v2104_v16, %s4299_s30  ;;  %4038 = vmatprep.subr.bf16.mxu0 %v4037_v52  ;;  %v4041_v1 = vpack.c.bf16 %v2396_v61, %v2395_v60  ;;  %v4073_v10 = vpack.c.bf16 %v2428_v4, %v2427_v62  ;;  %v2414_v52 = vld [vmem:[#allocation5 + $0x318] sm:$0xff]  ;;  %v2399_v53 = vld [vmem:[#allocation5 + $0x2a0] sm:$0xff] }
 0x9ad   : > { %2292 = vst.msk [vmem:[#allocation3 + $0xc] sm:$0x1] %vm5085_vm0, %v2065_v29  ;;  %v2064_v34 = vsel %vm2056_vm2, %v2046_v14, %v2060_v24  ;;  %4008 = vmatpush3.bf16.msra.mxu1 %v4007_v55  ;;  %4040 = vmatpush3.bf16.msra.mxu0 %v4039_v56  ;;  %v2300_v12 = vrot.slane %v2065_v29, %v5082_v2  ;;  %v2411_v29 = vld [vmem:[#allocation5 + $0x300] sm:$0xff]  ;;  %v2400_v56 = vld [vmem:[#allocation5 + $0x2a8] sm:$0xff] }
 0x9ae   : > { %2219 = vst.msk [vmem:[#allocation3 + $0x8] sm:$0x1] %vm5085_vm0, %v2064_v34  ;;  %v2227_v36 = vrot.slane %v2064_v34, %v5082_v2  ;;  %v2255_v37 = vcombine.high %v2064_v34, %v2064_v34  ;;  %2134 = vrot.lane.b32.xlu0 %v2133_v19, %s4299_s30  ;;  %4042 = vmatprep.subr.bf16.mxu1 %v4041_v1 }
 0x9af   : > { %4074 = vmatprep.subr.bf16.mxu0 %v4073_v10  ;;  %v2301_v16 = vcombine.high %v2300_v12, %v2300_v12  ;;  %v4045_v54 = vpack.c.bf16 %v2398_v33, %v2397_v32  ;;  %v4077_v55 = vpack.c.bf16 %v2430_v41, %v2429_v40  ;;  %v4049_v1 = vpack.c.bf16 %v2400_v56, %v2399_v53  ;;  %v2416_v10 = vld [vmem:[#allocation5 + $0x328] sm:$0xff]  ;;  %v2401_v12 = vld [vmem:[#allocation5 + $0x2b0] sm:$0xff]  ;;  %v2419_v32 = vld [vmem:[#allocation5 + $0x340] sm:$0xff] }
 0x9b0   : > { %v2235_v49 = vrot.slane %v2227_v36, %v5082_v2  ;;  %v2228_v50 = vcombine.high %v2227_v36, %v2227_v36  ;;  %v2262_v51 = vrot.slane %v2255_v37, %v5082_v2  ;;  %2142 = vrot.lane.b32.xlu1 %v2141_v42, %s4299_s30  ;;  %v4043_v36 = vpack.c.bf16 %v2380_v28, %v2379_v26  ;;  %v2387_v28 = vld [vmem:[#allocation5 + $0x240] sm:$0xff]  ;;  %v2420_v33 = vld [vmem:[#allocation5 + $0x348] sm:$0xff]  ;;  %v2389_v41 = vld [vmem:[#allocation5 + $0x250] sm:$0xff] }
 0x9b1   : > { %v2308_v18 = vrot.slane %v2301_v16, %v5082_v2  ;;  %v4075_v37 = vpack.c.bf16 %v2412_v30, %v2411_v29  ;;  %v2434_v16 = vld [vmem:[#allocation5 + $0x3b8] sm:$0xff]  ;;  %v2388_v29 = vld [vmem:[#allocation5 + $0x248] sm:$0xff]  ;;  %v4091_v40 = vpack.c.bf16 %v2420_v33, %v2419_v32 }
 0x9b2   : > { %v2247_v57 = vcombine.high %v2235_v49, %v2235_v49  ;;  %v2269_v59 = vrot.slane %v2262_v51, %v5082_v2  ;;  %2207 = vrot.lane.b32.xlu0 %v2206_v38, %s4299_s30  ;;  %v2242_v63 = vrot.slane %v2228_v50, %v5082_v2  ;;  %v2272_v0 = vcombine.high %v2262_v51, %v2262_v51  ;;  %v2382_v49 = vld [vmem:[#allocation5 + $0x218] sm:$0xff]  ;;  %v2413_v51 = vld [vmem:[#allocation5 + $0x310] sm:$0xff]  ;;  %v2392_v56 = vld [vmem:[#allocation5 + $0x268] sm:$0xff] }
 0x9b3   : > { %v2548_v38 = vsub.s32 5, %v4486_v8  ;;  %v4047_v61 = vpack.c.bf16 %v2382_v49, %v2381_v48  ;;  %v4079_v62 = vpack.c.bf16 %v2414_v52, %v2413_v51  ;;  %v2422_v48 = vld [vmem:[#allocation5 + $0x358] sm:$0xff]  ;;  %v2407_v49 = vld [vmem:[#allocation5 + $0x2e0] sm:$0xff]  ;;  %v2440_v52 = vld [vmem:[#allocation5 + $0x3e8] sm:$0xff] }
 0x9b4   : > { %2249 = vst.msk [vmem:[#allocation3 + $0x9] sm:$0x1] %vm5085_vm0, %v2247_v57  ;;  %2271 = vst.msk [vmem:[#allocation3 + $0xa] sm:$0x1] %vm5085_vm0, %v2269_v59  ;;  %v2284_v5 = vcombine.high %v2269_v59, %v2269_v59  ;;  %2215 = vrot.lane.b32.xlu1 %v2214_v58, %s4299_s30  ;;  %v2250_v13 = vcombine.high %v2242_v63, %v2242_v63  ;;  %v2279_v14 = vrot.slane %v2272_v0, %v5082_v2  ;;  %v2431_v57 = vld [vmem:[#allocation5 + $0x3a0] sm:$0xff]  ;;  %v2432_v58 = vld [vmem:[#allocation5 + $0x3a8] sm:$0xff] }
 0x9b5   : > { %v2384_v0 = vld [vmem:[#allocation5 + $0x228] sm:$0xff]  ;;  %v4081_v4 = vpack.c.bf16 %v2432_v58, %v2431_v57  ;;  %v2439_v51 = vld [vmem:[#allocation5 + $0x3e0] sm:$0xff]  ;;  %v2494_v32 = vld [vmem:[#allocation5 + $0x598] sm:$0xff] }
 0x9b6   : > { %2286 = vst.msk [vmem:[#allocation3 + $0xb] sm:$0x1] %vm5085_vm0, %v2284_v5  ;;  %2243 = vrot.lane.b32.xlu0 %v2242_v63, %s4299_s30  ;;  %v2287_v17 = vcombine.high %v2279_v14, %v2279_v14  ;;  %v2383_v63 = vld [vmem:[#allocation5 + $0x220] sm:$0xff]  ;;  %v4097_v58 = vpack.c.bf16 %v2440_v52, %v2439_v51 }
 0x9b7   : > { %v2415_v5 = vld [vmem:[#allocation5 + $0x320] sm:$0xff] }
 0x9b8   : > { %2251 = vrot.lane.b32.xlu1 %v2250_v13, %s4299_s30  ;;  %v2402_v13 = vld [vmem:[#allocation5 + $0x2b8] sm:$0xff] }
 0x9ba   : > { %2280 = vrot.lane.b32.xlu0 %v2279_v14, %s4299_s30  ;;  %v2433_v14 = vld [vmem:[#allocation5 + $0x3b0] sm:$0xff] }
 0x9bc   : > { %2288 = vrot.lane.b32.xlu1 %v2287_v17, %s4299_s30  ;;  %v4051_v17 = vpack.c.bf16 %v2384_v0, %v2383_v63  ;;  %v2441_v63 = vld [vmem:[#allocation5 + $0x3f0] sm:$0xff]  ;;  %v2442_v0 = vld [vmem:[#allocation5 + $0x3f8] sm:$0xff] }
 0x9be   : > { %2309 = vrot.lane.b32.xlu0 %v2308_v18, %s4299_s30  ;;  %v4083_v18 = vpack.c.bf16 %v2416_v10, %v2415_v5  ;;  %v2393_v5 = vld [vmem:[#allocation5 + $0x270] sm:$0xff]  ;;  %v2394_v10 = vld [vmem:[#allocation5 + $0x278] sm:$0xff] }
 0xa18   : > { %v2171_v19 = vpop.permute.xlu0 %2170 }
 0xa19   : > { %2173 = vst.msk [vmem:[#allocation3 + $0x4] sm:$0x1] %vm5160_vm8, %v2171_v19  ;;  %v2386_v19 = vld [vmem:[#allocation5 + $0x238] sm:$0xff] }
 0xa1a   : > { %v2179_v20 = vpop.permute.xlu1 %2178 }
 0xa1b   : > { %2181 = vst.msk [vmem:[#allocation3 + $0x5] sm:$0x1] %vm5160_vm8, %v2179_v20  ;;  %v4053_v20 = vpack.c.bf16 %v2402_v13, %v2401_v12  ;;  %v4101_v13 = vpack.c.bf16 %v2442_v0, %v2441_v63  ;;  %v2449_v0 = vld [vmem:[#allocation5 + $0x430] sm:$0xff] }
 0xa1c   : > { %v2095_v21 = vpop.permute.xlu0 %2094 }
 0xa1d   : > { %2100 = vst.msk [vmem:[#allocation3] sm:$0x1] %vm5160_vm8, %v2095_v21  ;;  %v4085_v21 = vpack.c.bf16 %v2434_v16, %v2433_v14  ;;  %v2425_v14 = vld [vmem:[#allocation5 + $0x370] sm:$0xff]  ;;  %v2426_v16 = vld [vmem:[#allocation5 + $0x378] sm:$0xff] }
 0xa1e   : > { %v2106_v2 = vpop.permute.xlu1 %2105 }
 0xa1f   : > { %2108 = vst.msk [vmem:[#allocation3 + $0x1] sm:$0x1] %vm5160_vm8, %v2106_v2  ;;  %v2417_v2 = vld [vmem:[#allocation5 + $0x330] sm:$0xff] }
 0xa20   : > { %v2135_v7 = vpop.permute.xlu0 %2134 }
 0xa21   : > { %2137 = vst.msk [vmem:[#allocation3 + $0x2] sm:$0x1] %vm5160_vm8, %v2135_v7  ;;  %v2418_v7 = vld [vmem:[#allocation5 + $0x338] sm:$0xff] }
 0xa22   : > { %v2143_v22 = vpop.permute.xlu1 %2142  ;;  %v4087_v26 = vpack.c.bf16 %v2418_v7, %v2417_v2  ;;  %v2544_v2 = vsub.s32 4, %v4486_v8  ;;  %v2552_v7 = vsub.s32 6, %v4486_v8  ;;  %v3086_v8 = vld [vmem:[%s5342_s19 + $0x10] sm:$0xff] }
 0xa23   : > { %2145 = vst.msk [vmem:[#allocation3 + $0x3] sm:$0x1] %vm5160_vm8, %v2143_v22  ;;  %v2403_v22 = vld [vmem:[#allocation5 + $0x2c0] sm:$0xff] }
 0xa24   : > { %v2208_v23 = vpop.permute.xlu0 %2207 }
 0xa25   : > { %2210 = vst.msk [vmem:[#allocation3 + $0x6] sm:$0x1] %vm5160_vm8, %v2208_v23  ;;  %v2404_v23 = vld [vmem:[#allocation5 + $0x2c8] sm:$0xff] }
 0xa26   : > { %v2216_v24 = vpop.permute.xlu1 %2215  ;;  %v4057_v30 = vpack.c.bf16 %v2404_v23, %v2403_v22 }
 0xa27   : > { %2218 = vst.msk [vmem:[#allocation3 + $0x7] sm:$0x1] %vm5160_vm8, %v2216_v24  ;;  %v2435_v24 = vld [vmem:[#allocation5 + $0x3c0] sm:$0xff] }
 0xa28   : > { %v2244_v45 = vpop.permute.xlu0 %2243 }
 0xa29   : > { %2246 = vst.msk [vmem:[#allocation3 + $0x8] sm:$0x1] %vm5160_vm8, %v2244_v45  ;;  %v2436_v45 = vld [vmem:[#allocation5 + $0x3c8] sm:$0xff] }
 0xa2a   : > { %v2252_v25 = vpop.permute.xlu1 %2251 }
 0xa2b   : > { %2254 = vst.msk [vmem:[#allocation3 + $0x9] sm:$0x1] %vm5160_vm8, %v2252_v25  ;;  %v4055_v25 = vpack.c.bf16 %v2386_v19, %v2385_v3  ;;  %v2491_v3 = vld [vmem:[#allocation5 + $0x580] sm:$0xff]  ;;  %v2492_v19 = vld [vmem:[#allocation5 + $0x588] sm:$0xff] }
 0xa2c   : > { %v2281_v31 = vpop.permute.xlu0 %2280  ;;  %v4137_v23 = vpack.c.bf16 %v2492_v19, %v2491_v3  ;;  %v2451_v19 = vld [vmem:[#allocation5 + $0x440] sm:$0xff] }
 0xa2d   : > { %2283 = vst.msk [vmem:[#allocation3 + $0xa] sm:$0x1] %vm5160_vm8, %v2281_v31  ;;  %v4089_v31 = vpack.c.bf16 %v2436_v45, %v2435_v24  ;;  %v2443_v24 = vld [vmem:[#allocation5 + $0x400] sm:$0xff]  ;;  %v2444_v45 = vld [vmem:[#allocation5 + $0x408] sm:$0xff] }
 0xa2e   : > { %v2289_v34 = vpop.permute.xlu1 %2288  ;;  %v5187_v35 = vld [vmem:[#allocation3] sm:$0xff]  ;;  %v4107_v33 = vpack.c.bf16 %v2444_v45, %v2443_v24 }
 0xa2f   : > { %2291 = vst.msk [vmem:[#allocation3 + $0xb] sm:$0x1] %vm5160_vm8, %v2289_v34  ;;  %v2533_v42 = vrot.slane %v5187_v35, %v4489_v9  ;;  %v2541_v43 = vrot.slane %v5187_v35, %v2540_v27  ;;  %v2529_v44 = vrot.slane %v5187_v35, %v4499_v15  ;;  %v2537_v46 = vrot.slane %v5187_v35, %v4495_v11  ;;  %v2405_v34 = vld [vmem:[#allocation5 + $0x2d0] sm:$0xff]  ;;  %v2470_v24 = vld [vmem:[#allocation5 + $0x4d8] sm:$0xff] }
 0xa30   : > { %v2310_v50 = vpop.permute.xlu0 %2309  ;;  %v2549_v59 = vrot.slane %v5187_v35, %v2548_v38  ;;  %v2557_v60 = vrot.slane %v5187_v35, %v2556_v39  ;;  %v2438_v38 = vld [vmem:[#allocation5 + $0x3d8] sm:$0xff]  ;;  %v4059_v39 = vpack.c.bf16 %v2388_v29, %v2387_v28  ;;  %v2461_v28 = vld [vmem:[#allocation5 + $0x490] sm:$0xff] }
 0xa31   : > { %2312 = vst.msk [vmem:[#allocation3 + $0xc] sm:$0x1] %vm5160_vm8, %v2310_v50  ;;  %2655 = vmatprep.mubr.f32.mxu1 %v2533_v42  ;;  %2725 = vmatprep.mubr.f32.mxu0 %v2541_v43  ;;  %v2390_v42 = vld [vmem:[#allocation5 + $0x258] sm:$0xff]  ;;  %v2408_v50 = vld [vmem:[#allocation5 + $0x2e8] sm:$0xff]  ;;  %v2501_v45 = vld [vmem:[#allocation5 + $0x5d0] sm:$0xff] }
 0xa32   : > { %2656 = vmatmul.mubr.f32.vlgmr.msra.gmra.mrb[20].mxu1 %v2529_v44  ;;  %2726 = vmatmul.mubr.f32.vlgmr.msra.gmra.mrb[24].mxu0 %v2537_v46  ;;  %v2421_v46 = vld [vmem:[#allocation5 + $0x350] sm:$0xff]  ;;  %v4063_v53 = vpack.c.bf16 %v2390_v42, %v2389_v41  ;;  %v4065_v57 = vpack.c.bf16 %v2408_v50, %v2407_v49  ;;  %v2462_v29 = vld [vmem:[#allocation5 + $0x498] sm:$0xff]  ;;  %v2495_v49 = vld [vmem:[#allocation5 + $0x5a0] sm:$0xff] }
 0xa33   : > { %4044 = vmatpush3.bf16.msra.mxu1 %v4043_v36  ;;  %4076 = vmatpush3.bf16.msra.mxu0 %v4075_v37  ;;  %v2406_v36 = vld [vmem:[#allocation5 + $0x2d8] sm:$0xff]  ;;  %v2437_v37 = vld [vmem:[#allocation5 + $0x3d0] sm:$0xff]  ;;  %v4109_v42 = vpack.c.bf16 %v2462_v29, %v2461_v28  ;;  %v2496_v50 = vld [vmem:[#allocation5 + $0x5a8] sm:$0xff] }
 0xa34   : > { %2795 = vmatprep.mubr.f32.mxu1 %v2549_v59  ;;  %2865 = vmatprep.mubr.f32.mxu0 %v2557_v60  ;;  %v4061_v43 = vpack.c.bf16 %v2406_v36, %v2405_v34  ;;  %v4093_v44 = vpack.c.bf16 %v2438_v38, %v2437_v37  ;;  %v2423_v59 = vld [vmem:[#allocation5 + $0x360] sm:$0xff]  ;;  %v2424_v60 = vld [vmem:[#allocation5 + $0x368] sm:$0xff]  ;;  %v2545_v34 = vrot.slane %v5187_v35, %v2544_v2  ;;  %v2445_v38 = vld [vmem:[#allocation5 + $0x410] sm:$0xff] }
 0xa35   : > { %4046 = vmatprep.subr.bf16.mxu1 %v4045_v54  ;;  %4078 = vmatprep.subr.bf16.mxu0 %v4077_v55  ;;  %v4095_v54 = vpack.c.bf16 %v2422_v48, %v2421_v46  ;;  %v2391_v55 = vld [vmem:[#allocation5 + $0x260] sm:$0xff]  ;;  %v2553_v36 = vrot.slane %v5187_v35, %v2552_v7  ;;  %v2464_v48 = vld [vmem:[#allocation5 + $0x4a8] sm:$0xff] }
 0xa36   : > { %v2463_v46 = vld [vmem:[#allocation5 + $0x4a0] sm:$0xff] }
 0xa37   : > { %4048 = vmatpush3.bf16.msra.mxu1 %v4047_v61  ;;  %4080 = vmatpush3.bf16.msra.mxu0 %v4079_v62  ;;  %v2409_v61 = vld [vmem:[#allocation5 + $0x2f0] sm:$0xff]  ;;  %v2410_v62 = vld [vmem:[#allocation5 + $0x2f8] sm:$0xff] }
 0xa38   : > { %4050 = vmatprep.subr.bf16.mxu1 %v4049_v1  ;;  %4082 = vmatprep.subr.bf16.mxu0 %v4081_v4  ;;  %v4067_v1 = vpack.c.bf16 %v2392_v56, %v2391_v55  ;;  %v4099_v4 = vpack.c.bf16 %v2424_v60, %v2423_v59  ;;  %v4069_v12 = vpack.c.bf16 %v2410_v62, %v2409_v61  ;;  %v2479_v55 = vld [vmem:[#allocation5 + $0x520] sm:$0xff]  ;;  %v2466_v59 = vld [vmem:[#allocation5 + $0x4b8] sm:$0xff]  ;;  %v2497_v60 = vld [vmem:[#allocation5 + $0x5b0] sm:$0xff] }
 0xa39   : > { %v4145_v56 = vpack.c.bf16 %v2496_v50, %v2495_v49  ;;  %v2488_v49 = vld [vmem:[#allocation5 + $0x568] sm:$0xff]  ;;  %v2473_v50 = vld [vmem:[#allocation5 + $0x4f0] sm:$0xff] }
 0xa3b   : > { %4052 = vmatpush3.bf16.msra.mxu1 %v4051_v17  ;;  %4084 = vmatpush3.bf16.msra.mxu0 %v4083_v18  ;;  %v2459_v17 = vld [vmem:[#allocation5 + $0x480] sm:$0xff]  ;;  %v2460_v18 = vld [vmem:[#allocation5 + $0x488] sm:$0xff] }
 0xa3c   : > { %4054 = vmatprep.subr.bf16.mxu1 %v4053_v20  ;;  %4086 = vmatprep.subr.bf16.mxu0 %v4085_v21  ;;  %v4071_v20 = vpack.c.bf16 %v2394_v10, %v2393_v5  ;;  %v4103_v21 = vpack.c.bf16 %v2426_v16, %v2425_v14  ;;  %v4105_v22 = vpack.c.bf16 %v2460_v18, %v2459_v17  ;;  %v2482_v10 = vld [vmem:[#allocation5 + $0x538] sm:$0xff]  ;;  %v2499_v14 = vld [vmem:[#allocation5 + $0x5c0] sm:$0xff]  ;;  %v2500_v16 = vld [vmem:[#allocation5 + $0x5c8] sm:$0xff] }
 0xa3d   : > { %v4153_v7 = vpack.c.bf16 %v2500_v16, %v2499_v14  ;;  %v2512_v14 = vld [vmem:[#allocation5 + $0x628] sm:$0xff]  ;;  %v2514_v16 = vld [vmem:[#allocation5 + $0x638] sm:$0xff] }
 0xa3f   : > { %4056 = vmatpush3.bf16.msra.mxu1 %v4055_v25  ;;  %4088 = vmatpush3.bf16.msra.mxu0 %v4087_v26  ;;  %v2475_v25 = vld [vmem:[#allocation5 + $0x500] sm:$0xff]  ;;  %v2476_v26 = vld [vmem:[#allocation5 + $0x508] sm:$0xff] }
 0xa40   : > { %4058 = vmatprep.subr.bf16.mxu1 %v4057_v30  ;;  %4090 = vmatprep.subr.bf16.mxu0 %v4089_v31  ;;  %v5208_v30 = vld [vmem:[#allocation3 + $0x8] sm:$0x1f]  ;;  %v2493_v31 = vld [vmem:[#allocation5 + $0x590] sm:$0xff]  ;;  %v4139_v37 = vpack.c.bf16 %v2476_v26, %v2475_v25 }
 0xa41   : > { %v2565_v41 = vrot.slane %v5208_v30, %v4489_v9  ;;  %v2573_v35 = vrot.slane %v5208_v30, %v2540_v27  ;;  %v4113_v9 = vpack.c.bf16 %v2464_v48, %v2463_v46  ;;  %v2498_v27 = vld [vmem:[#allocation5 + $0x5b8] sm:$0xff]  ;;  %v2456_v46 = vld [vmem:[#allocation5 + $0x468] sm:$0xff]  ;;  %v2487_v48 = vld [vmem:[#allocation5 + $0x560] sm:$0xff] }
 0xa42   : > { %v4149_v5 = vpack.c.bf16 %v2498_v27, %v2497_v60  ;;  %v2502_v25 = vld [vmem:[#allocation5 + $0x5d8] sm:$0xff] }
 0xa43   : > { %4060 = vmatpush3.bf16.msra.mxu1 %v4059_v39  ;;  %4092 = vmatpush3.bf16.msra.mxu0 %v4091_v40  ;;  %v2446_v39 = vld [vmem:[#allocation5 + $0x418] sm:$0xff]  ;;  %v2477_v40 = vld [vmem:[#allocation5 + $0x510] sm:$0xff] }
 0xa44   : > { %4062 = vmatprep.subr.bf16.mxu1 %v4061_v43  ;;  %4094 = vmatprep.subr.bf16.mxu0 %v4093_v44  ;;  %v4141_v43 = vpack.c.bf16 %v2494_v32, %v2493_v31  ;;  %v2478_v44 = vld [vmem:[#allocation5 + $0x518] sm:$0xff]  ;;  %v4111_v51 = vpack.c.bf16 %v2446_v39, %v2445_v38  ;;  %v2453_v31 = vld [vmem:[#allocation5 + $0x450] sm:$0xff]  ;;  %v2472_v38 = vld [vmem:[#allocation5 + $0x4e8] sm:$0xff] }
 0xa45   : > { %v4143_v52 = vpack.c.bf16 %v2478_v44, %v2477_v40  ;;  %v2454_v32 = vld [vmem:[#allocation5 + $0x458] sm:$0xff]  ;;  %v2503_v39 = vld [vmem:[#allocation5 + $0x5e0] sm:$0xff]  ;;  %v2504_v40 = vld [vmem:[#allocation5 + $0x5e8] sm:$0xff] }
 0xa46   : > { %v2455_v44 = vld [vmem:[#allocation5 + $0x460] sm:$0xff]  ;;  %v2490_v60 = vld [vmem:[#allocation5 + $0x578] sm:$0xff] }
 0xa47   : > { %4064 = vmatpush3.bf16.msra.mxu1 %v4063_v53  ;;  %4096 = vmatpush3.bf16.msra.mxu0 %v4095_v54  ;;  %v2447_v53 = vld [vmem:[#allocation5 + $0x420] sm:$0xff]  ;;  %v2448_v54 = vld [vmem:[#allocation5 + $0x428] sm:$0xff] }
 0xa48   : > { %4066 = vmatprep.subr.bf16.mxu1 %v4065_v57  ;;  %4098 = vmatprep.subr.bf16.mxu0 %v4097_v58  ;;  %v2480_v57 = vld [vmem:[#allocation5 + $0x528] sm:$0xff]  ;;  %v2465_v58 = vld [vmem:[#allocation5 + $0x4b0] sm:$0xff]  ;;  %v4115_v61 = vpack.c.bf16 %v2448_v54, %v2447_v53  ;;  %v4131_v53 = vpack.c.bf16 %v2456_v46, %v2455_v44  ;;  %v4163_v54 = vpack.c.bf16 %v2488_v49, %v2487_v48  ;;  %v3097_v48 = vld [vmem:[%s5342_s19 + $0x68] sm:$0xff] }
 0xa49   : > { %v4147_v62 = vpack.c.bf16 %v2480_v57, %v2479_v55  ;;  %v4117_v63 = vpack.c.bf16 %v2466_v59, %v2465_v58  ;;  %v2458_v57 = vld [vmem:[#allocation5 + $0x478] sm:$0xff]  ;;  %v2489_v59 = vld [vmem:[#allocation5 + $0x570] sm:$0xff]  ;;  %v3098_v49 = vld [vmem:[%s5342_s19 + $0x70] sm:$0xff] }
 0xa4a   : > { %v3096_v46 = vld [vmem:[%s5342_s19 + $0x60] sm:$0xff] }
 0xa4b   : > { %4068 = vmatpush3.bf16.msra.mxu1 %v4067_v1  ;;  %4100 = vmatpush3.bf16.msra.mxu0 %v4099_v4  ;;  %v2450_v1 = vld [vmem:[#allocation5 + $0x438] sm:$0xff]  ;;  %v2481_v4 = vld [vmem:[#allocation5 + $0x530] sm:$0xff] }
 0xa4c   : > { %4070 = vmatprep.subr.bf16.mxu1 %v4069_v12  ;;  %4102 = vmatprep.subr.bf16.mxu0 %v4101_v13  ;;  %v2467_v12 = vld [vmem:[#allocation5 + $0x4c0] sm:$0xff]  ;;  %v2468_v13 = vld [vmem:[#allocation5 + $0x4c8] sm:$0xff]  ;;  %v4119_v17 = vpack.c.bf16 %v2450_v1, %v2449_v0  ;;  %v4151_v18 = vpack.c.bf16 %v2482_v10, %v2481_v4  ;;  %v2561_v1 = vrot.slane %v5208_v30, %v4499_v15  ;;  %v2509_v4 = vld [vmem:[#allocation5 + $0x610] sm:$0xff] }
 0xa4d   : > { %v4121_v3 = vpack.c.bf16 %v2468_v13, %v2467_v12  ;;  %v2569_v10 = vrot.slane %v5208_v30, %v4495_v11  ;;  %v2511_v13 = vld [vmem:[#allocation5 + $0x620] sm:$0xff]  ;;  %v2513_v11 = vld [vmem:[#allocation5 + $0x630] sm:$0xff] }
 0xa4e   : > { %v4176_v15 = vpack.c.bf16 %v2512_v14, %v2511_v13 }
 0xa4f   : > { %4072 = vmatpush3.bf16.msra.mxu1 %v4071_v20  ;;  %4104 = vmatpush3.bf16.msra.mxu0 %v4103_v21  ;;  %v2452_v20 = vld [vmem:[#allocation5 + $0x448] sm:$0xff]  ;;  %v2483_v21 = vld [vmem:[#allocation5 + $0x540] sm:$0xff] }
 0xa50   : > { %4106 = vmatprep.subr.bf16.mxu1 %v4105_v22  ;;  %4138 = vmatprep.subr.bf16.mxu0 %v4137_v23  ;;  %v2484_v22 = vld [vmem:[#allocation5 + $0x548] sm:$0xff]  ;;  %v2469_v23 = vld [vmem:[#allocation5 + $0x4d0] sm:$0xff]  ;;  %v4123_v26 = vpack.c.bf16 %v2452_v20, %v2451_v19 }
 0xa51   : > { %v4155_v28 = vpack.c.bf16 %v2484_v22, %v2483_v21  ;;  %v4125_v29 = vpack.c.bf16 %v2470_v24, %v2469_v23  ;;  %v2517_v20 = vld [vmem:[#allocation5 + $0x650] sm:$0xff]  ;;  %v2518_v21 = vld [vmem:[#allocation5 + $0x658] sm:$0xff]  ;;  %v2519_v22 = vld [vmem:[#allocation5 + $0x660] sm:$0xff] }
 0xa52   : > { %2796 = vmatmul.mubr.f32.vlgmr.msra.gmra.mrb[22].mxu1 %v2545_v34  ;;  %2866 = vmatmul.mubr.f32.vlgmr.msra.gmra.mrb[26].mxu0 %v2553_v36  ;;  %v4157_v34 = vpack.c.bf16 %v2502_v25, %v2501_v45  ;;  %v2486_v36 = vld [vmem:[#allocation5 + $0x558] sm:$0xff]  ;;  %v2520_v23 = vld [vmem:[#allocation5 + $0x668] sm:$0xff]  ;;  %v2521_v45 = vld [vmem:[#allocation5 + $0x670] sm:$0xff] }
 0xa53   : > { %4108 = vmatpush3.bf16.msra.mxu1 %v4107_v33  ;;  %2935 = vmatprep.mubr.f32.mxu1 %v2565_v41  ;;  %v2485_v33 = vld [vmem:[#allocation5 + $0x550] sm:$0xff]  ;;  %v4127_v41 = vpack.c.bf16 %v2454_v32, %v2453_v31  ;;  %v4188_v24 = vpack.c.bf16 %v2520_v23, %v2519_v22  ;;  %v2522_v25 = vld [vmem:[#allocation5 + $0x678] sm:$0xff]  ;;  %v3176_v22 = vld [vmem:[%s5344_s21 + $0x10] sm:$0xff] }
 0xa54   : > { %4140 = vmatpush3.bf16.msra.mxu0 %v4139_v37  ;;  %3005 = vmatprep.mubr.f32.mxu0 %v2573_v35  ;;  %v2471_v37 = vld [vmem:[#allocation5 + $0x4e0] sm:$0xff]  ;;  %v4161_v35 = vpack.c.bf16 %v2504_v40, %v2503_v39  ;;  %v3092_v39 = vld [vmem:[%s5342_s19 + $0x40] sm:$0xff]  ;;  %v3177_v23 = vld [vmem:[%s5344_s21 + $0x18] sm:$0xff] }
 0xa55   : > { %4110 = vmatprep.subr.bf16.mxu1 %v4109_v42  ;;  %4142 = vmatprep.subr.bf16.mxu0 %v4141_v43  ;;  %v4159_v42 = vpack.c.bf16 %v2486_v36, %v2485_v33  ;;  %v4129_v43 = vpack.c.bf16 %v2472_v38, %v2471_v37  ;;  %v3085_v31 = vld [vmem:[%s5342_s19 + $0x8] sm:$0xff]  ;;  %v3090_v36 = vld [vmem:[%s5342_s19 + $0x30] sm:$0xff]  ;;  %v3091_v37 = vld [vmem:[%s5342_s19 + $0x38] sm:$0xff] }
 0xa56   : > { %v3089_v33 = vld [vmem:[%s5342_s19 + $0x28] sm:$0xff]  ;;  %v4203_v38 = vpack.c.bf16 %v3091_v37, %v3090_v36 }
 0xa57   : > { %4112 = vmatpush3.bf16.msra.mxu1 %v4111_v51  ;;  %v2474_v51 = vld [vmem:[#allocation5 + $0x4f8] sm:$0xff] }
 0xa58   : > { %4144 = vmatpush3.bf16.msra.mxu0 %v4143_v52  ;;  %4114 = vmatprep.subr.bf16.mxu1 %v4113_v9  ;;  %v2505_v52 = vld [vmem:[#allocation5 + $0x5f0] sm:$0xff]  ;;  %v2506_v9 = vld [vmem:[#allocation5 + $0x5f8] sm:$0xff]  ;;  %v4133_v55 = vpack.c.bf16 %v2474_v51, %v2473_v50 }
 0xa59   : > { %4146 = vmatprep.subr.bf16.mxu0 %v4145_v56  ;;  %v2457_v56 = vld [vmem:[#allocation5 + $0x470] sm:$0xff]  ;;  %v4165_v58 = vpack.c.bf16 %v2506_v9, %v2505_v52  ;;  %v3093_v40 = vld [vmem:[%s5342_s19 + $0x48] sm:$0xff] }
 0xa5a   : > { %v4135_v27 = vpack.c.bf16 %v2458_v57, %v2457_v56  ;;  %v3099_v50 = vld [vmem:[%s5342_s19 + $0x78] sm:$0xff]  ;;  %v3174_v52 = vld [vmem:[%s5344_s21] sm:$0xff]  ;;  %v3175_v9 = vld [vmem:[%s5344_s21 + $0x8] sm:$0xff] }
 0xa5b   : > { %4116 = vmatpush3.bf16.msra.mxu1 %v4115_v61  ;;  %v4167_v61 = vpack.c.bf16 %v2490_v60, %v2489_v59  ;;  %v4215_v51 = vpack.c.bf16 %v3099_v50, %v3098_v49  ;;  %v2523_v56 = vld [vmem:[%s5341_s18] sm:$0x1] }
 0xa5c   : > { %4148 = vmatpush3.bf16.msra.mxu0 %v4147_v62  ;;  %4118 = vmatprep.subr.bf16.mxu1 %v4117_v63  ;;  %v2507_v62 = vld [vmem:[#allocation5 + $0x600] sm:$0xff]  ;;  %v2508_v63 = vld [vmem:[#allocation5 + $0x608] sm:$0xff] }
 0xa5d   : > { %4150 = vmatprep.subr.bf16.mxu0 %v4149_v5  ;;  %v4170_v0 = vpack.c.bf16 %v2508_v63, %v2507_v62  ;;  %v2510_v5 = vld [vmem:[#allocation5 + $0x618] sm:$0xff] }
 0xa5e   : > { %v4173_v12 = vpack.c.bf16 %v2510_v5, %v2509_v4 }
 0xa5f   : > { %4120 = vmatpush3.bf16.msra.mxu1 %v4119_v17  ;;  %v4179_v17 = vpack.c.bf16 %v2514_v16, %v2513_v11 }
 0xa60   : > { %4152 = vmatpush3.bf16.msra.mxu0 %v4151_v18  ;;  %4122 = vmatprep.subr.bf16.mxu1 %v4121_v3  ;;  %v2515_v18 = vld [vmem:[#allocation5 + $0x640] sm:$0xff]  ;;  %v2516_v3 = vld [vmem:[#allocation5 + $0x648] sm:$0xff] }
 0xa61   : > { %4154 = vmatprep.subr.bf16.mxu0 %v4153_v7  ;;  %v4182_v19 = vpack.c.bf16 %v2516_v3, %v2515_v18  ;;  %v4185_v7 = vpack.c.bf16 %v2518_v21, %v2517_v20 }
 0xa63   : > { %4124 = vmatpush3.bf16.msra.mxu1 %v4123_v26  ;;  %v4191_v26 = vpack.c.bf16 %v2522_v25, %v2521_v45  ;;  %v3100_v45 = vld [vmem:[%s5343_s20] sm:$0x1] }
 0xa64   : > { %4156 = vmatpush3.bf16.msra.mxu0 %v4155_v28  ;;  %4126 = vmatprep.subr.bf16.mxu1 %v4125_v29  ;;  %v2577_v28 = vrot.slane %v5208_v30, %v2544_v2  ;;  %v3084_v29 = vld [vmem:[%s5342_s19] sm:$0xff]  ;;  %v3087_v2 = vld [vmem:[%s5342_s19 + $0x18] sm:$0xff] }
 0xa65   : > { %4158 = vmatprep.subr.bf16.mxu0 %v4157_v34  ;;  %v4194_v32 = vpack.c.bf16 %v3085_v31, %v3084_v29  ;;  %v4197_v30 = vpack.c.bf16 %v3087_v2, %v3086_v8  ;;  %v3178_v8 = vld [vmem:[#allocation4] sm:$0x1] }
 0xa67   : > { %4128 = vmatpush3.bf16.msra.mxu1 %v4127_v41  ;;  %v4206_v41 = vpack.c.bf16 %v3093_v40, %v3092_v39 }
 0xa68   : > { %4160 = vmatpush3.bf16.msra.mxu0 %v4159_v42  ;;  %4130 = vmatprep.subr.bf16.mxu1 %v4129_v43  ;;  %v3094_v42 = vld [vmem:[%s5342_s19 + $0x50] sm:$0xff]  ;;  %v3095_v43 = vld [vmem:[%s5342_s19 + $0x58] sm:$0xff] }
 0xa69   : > { %4162 = vmatprep.subr.bf16.mxu0 %v4161_v35  ;;  %v4209_v44 = vpack.c.bf16 %v3095_v43, %v3094_v42  ;;  %v4212_v35 = vpack.c.bf16 %v3097_v48, %v3096_v46 }
 0xa6b   : > { %4132 = vmatpush3.bf16.msra.mxu1 %v4131_v53  ;;  %v4218_v53 = vpack.c.bf16 %v3175_v9, %v3174_v52 }
 0xa6c   : > { %4164 = vmatpush3.bf16.msra.mxu0 %v4163_v54  ;;  %4134 = vmatprep.subr.bf16.mxu1 %v4133_v55 }
 0xa6d   : > { %4166 = vmatprep.subr.bf16.mxu0 %v4165_v58 }
 0xa6f   : > { %4136 = vmatpush3.bf16.msra.mxu1 %v4135_v27 }
 0xa70   : > { %4168 = vmatpush3.bf16.msra.mxu0 %v4167_v61  ;;  %4169 = vmatprep.subr.bf16.mxu1 %v4302_v47 }
 0xa71   : > { %4193 = vmatprep.subr.bf16.mxu0 %v4302_v47 }
 0xa72   : > { %2936 = vmatmul.mubr.f32.vlgmr.msra.gmra.mrb[24].mxu1 %v2561_v1 }
 0xa73   : > { %3006 = vmatmul.mubr.f32.vlgmr.msra.gmra.mrb[28].mxu0 %v2569_v10  ;;  %4171 = vmatpush3.bf16.msra.mxu1 %v4170_v0 }
 0xa74   : > { %4172 = vmatprep.subr.bf16.mxu1 %v4302_v47  ;;  %3740 = vmatprep.mubr.msk.f32.mxu1 %vm4304_vm11, %v4298_v6 }
 0xa75   : > { %3775 = vmatprep.mubr.msk.f32.mxu0 %vm4304_vm11, %v4298_v6  ;;  %4195 = vmatpush3.bf16.msra.mxu0 %v4194_v32 }
 0xa76   : > { %4196 = vmatprep.subr.bf16.mxu0 %v4302_v47 }
 0xa77   : > { %4174 = vmatpush3.bf16.msra.mxu1 %v4173_v12 }
 0xa78   : > { %4175 = vmatprep.subr.bf16.mxu1 %v4302_v47 }
 0xa79   : > { %4198 = vmatpush3.bf16.msra.mxu0 %v4197_v30 }
 0xa7a   : > { %4199 = vmatprep.subr.bf16.mxu0 %v4302_v47 }
 0xa7b   : > { %4177 = vmatpush3.bf16.msra.mxu1 %v4176_v15 }
 0xa7c   : > { %4178 = vmatprep.subr.bf16.mxu1 %v4302_v47 }
 0xa7f   : > { %4180 = vmatpush3.bf16.msra.mxu1 %v4179_v17 }
 0xa80   : > { %4181 = vmatprep.subr.bf16.mxu1 %v4302_v47 }
 0xa83   : > { %4183 = vmatpush3.bf16.msra.mxu1 %v4182_v19 }
 0xa84   : > { %4184 = vmatprep.subr.bf16.mxu1 %v4302_v47 }
 0xa87   : > { %4186 = vmatpush3.bf16.msra.mxu1 %v4185_v7 }
 0xa88   : > { %4187 = vmatprep.subr.bf16.mxu1 %v4302_v47 }
 0xa8b   : > { %4189 = vmatpush3.bf16.msra.mxu1 %v4188_v24  ;;  %v4221_v24 = vpack.c.bf16 %v3177_v23, %v3176_v22 }
 0xa8c   : > { %4190 = vmatprep.subr.bf16.mxu1 %v4302_v47 }
 0xa8f   : > { %4192 = vmatpush3.bf16.msra.mxu1 %v4191_v26 }
 0xa90   : > { %4217 = vmatprep.subr.bf16.mxu1 %v4302_v47 }
 0xa92   : > { %3741 = vmatmul.mubr.f32.vlgmr.msra.gmra.mrb[26].mxu1 %v2577_v28 }
 0xa93   : > { %3786 = vmatprep.mubr.msk.f32.mxu1 %vm4304_vm11, %v4298_v6  ;;  %v3088_v6 = vld [vmem:[%s5342_s19 + $0x20] sm:$0xff]  ;;  %4219 = vmatpush3.bf16.msra.mxu1 %v4218_v53 }
 0xa94   : > { %v4200_v34 = vpack.c.bf16 %v3089_v33, %v3088_v6  ;;  %4220 = vmatprep.subr.bf16.mxu1 %v4302_v47 }
 0xa96   : > { %4201 = vmatpush3.bf16.msra.mxu0 %v4200_v34 }
 0xa97   : > { %4202 = vmatprep.subr.bf16.mxu0 %v4302_v47  ;;  %4222 = vmatpush3.bf16.msra.mxu1 %v4221_v24 }
 0xa9a   : > { %4204 = vmatpush3.bf16.msra.mxu0 %v4203_v38 }
 0xa9b   : > { %4205 = vmatprep.subr.bf16.mxu0 %v4302_v47 }
 0xa9e   : > { %4207 = vmatpush3.bf16.msra.mxu0 %v4206_v41 }
 0xa9f   : > { %4208 = vmatprep.subr.bf16.mxu0 %v4302_v47 }
 0xaa2   : > { %4210 = vmatpush3.bf16.msra.mxu0 %v4209_v44 }
 0xaa3   : > { %4211 = vmatprep.subr.bf16.mxu0 %v4302_v47 }
 0xaa6   : > { %4213 = vmatpush3.bf16.msra.mxu0 %v4212_v35 }
 0xaa7   : > { %4214 = vmatprep.subr.bf16.mxu0 %v4302_v47 }
 0xaaa   : > { %4216 = vmatpush3.bf16.msra.mxu0 %v4215_v51 }
 0xb05   : > { %v3429_v54 = vpop.f32.mrb[20].mxu1  ;;  %v3464_v55 = vpop.f32.mrb[24].mxu0 }
 0xb06   : > { %v3430_v57 = vpop.f32.mrb[21].mxu1  ;;  %v3465_v58 = vpop.f32.mrb[25].mxu0 }
 0xb07   : > { %v3431_v59 = vadd.f32 %v3430_v57, %v3429_v54  ;;  %v3466_v60 = vadd.f32 %v3465_v58, %v3464_v55 }
 0xb09   : > { %v2658_v27 = vadd.f32 %v3431_v59, %v2523_v56 }
 0xb0b   : > { %v2728_v61 = vadd.f32 %v3466_v60, %v2658_v27 }
 0xb25   : > { %v3499_v62 = vpop.f32.mrb[22].mxu1  ;;  %v3534_v63 = vpop.f32.mrb[26].mxu0 }
 0xb26   : > { %v3500_v0 = vpop.f32.mrb[23].mxu1  ;;  %v3535_v1 = vpop.f32.mrb[27].mxu0 }
 0xb27   : > { %v3501_v4 = vadd.f32 %v3500_v0, %v3499_v62  ;;  %v3536_v5 = vadd.f32 %v3535_v1, %v3534_v63 }
 0xb29   : > { %v2798_v10 = vadd.f32 %v3501_v4, %v2728_v61 }
 0xb2b   : > { %v2868_v47 = vadd.f32 %v3536_v5, %v2798_v10 }
 0xb45   : > { %v3569_v12 = vpop.f32.mrb[24].mxu1 }
 0xb46   : > { %v3604_v13 = vpop.f32.mrb[28].mxu0  ;;  %v3570_v14 = vpop.f32.mrb[25].mxu1 }
 0xb47   : > { %v3571_v15 = vadd.f32 %v3570_v14, %v3569_v12  ;;  %v3605_v11 = vpop.f32.mrb[29].mxu0 }
 0xb48   : > { %v3606_v16 = vadd.f32 %v3605_v11, %v3604_v13 }
 0xb49   : > { %v2938_v17 = vadd.f32 %v3571_v15, %v2868_v47 }
 0xb4b   : > { %v3008_v18 = vadd.f32 %v3606_v16, %v2938_v17 }
 0xb65   : > { %v3077_v3 = vpop.f32.mrb[26].mxu1 }
 0xb66   : > { %v3078_v19 = vadd.f32 %v3077_v3, %v3008_v18  ;;  %v3742_v20 = vpop.f32.mrb[27].mxu1 }
 0xb68   : > { %vm3081_vm12 = vcmp.ge.f32.partialorder %v3078_v19, 0.0  ;;  %v3082_v21 = vmul.f32 0.01, %v3078_v19 }
 0xb6a   : > { %v3083_v7 = vsel %vm3081_vm12, %v3078_v19, %v3082_v21 }
 0xb6b   : > { %3776 = vmatmul.mubr.f32.vlgmr.msra.gmra.mrb[30].mxu0 %v3083_v7 }
 0xc3e   : > { %v3167_v25 = vpop.f32.mrb[30].mxu0 }
 0xc3f   : > { %v3168_v26 = vadd.f32 %v3167_v25, %v3100_v45  ;;  %v3777_v28 = vpop.f32.mrb[31].mxu0 }
 0xc41   : > { %vm3171_vm15 = vcmp.ge.f32.partialorder %v3168_v26, 0.0  ;;  %v3172_v29 = vmul.f32 0.01, %v3168_v26 }
 0xc43   : > { %v3173_v31 = vsel %vm3171_vm15, %v3168_v26, %v3172_v29 }
 0xc44   : > { %3787 = vmatmul.mubr.msk.f32.vlgmr.msra.gmra.mrb[28].mxu1 %vm3179_vm1, %v3173_v31 }
 0xd17   : > { %v3249_v32 = vpop.f32.mrb[28].mxu1 }
 0xd18   : > { %v3250_v2 = vadd.f32 %v3249_v32, %v3178_v8  ;;  %v3788_v30 = vpop.f32.mrb[29].mxu1 }
 0xd1a   : > { %3254 = vst.msk [vmem:[%s723_s0] sm:$0x1] %vm3253_vm5, %v3250_v2 }
 0xd1b PF: > { %s36_s24 = sadd.s32 1, %s4292_s24  }
 0xd1c   : > { %p33_p3 = scmp.ge.s32.totalorder %s36_s24, 4  }
 0xd1e   :  { %35 = sbr.rel (!%p33_p3) target bundleno = 10 (0xa), region = 147 }
 0xd25   :  { %3272 = vsyncpa [#allocation6], 1 }
 0xd26   :  { %3274 = vsyncpa [#allocation6 + $0x1], 1 }

</bundles_post_ra>
